<compile_context>
chip_gen: v6e
topology: v6e:2x2x1
jax: 0.10.0
libtpu: 0.0.40
codegen_flags: <defaults>
</compile_context>

<pallas_src>
import jax
import jax.numpy as jnp
from jax import lax
from jax.experimental import pallas as pl
from jax.experimental.pallas import tpu as pltpu


def encoder_kernel(emb2_ref, len_ref, wih_ref, bih_ref, whh_ref, bhh_ref,
                   wfc_ref, bfc_ref, out_ref, hid_ref, gx_ref):
    # Shapes (G = lane-padded per-direction hidden, Bp = sublane-padded batch):
    #   emb2_ref : (T*Bp, 2E) bf16   row block t = [emb[t] | emb[T-1-t]]
    #   len_ref  : (Bp, 1)    int32
    #   wih_ref  : (2E, 6G)   bf16   block-structured, cols [r_f r_b z_f z_b n_f n_b]
    #   whh_ref  : (2G, 6G)   bf16   block-diagonal fwd/bwd recurrent weights
    #   bih/bhh  : (1, 6G)    f32
    #   wfc_ref  : (2G, D)    f32,  bfc_ref: (1, D)
    #   out_ref  : (T, Bp, 2G) f32   [fwd G | bwd G]
    #   hid_ref  : (Bp, D)    f32
    #   gx_ref   : (T*Bp, 6G) f32    hoisted input projection scratch
    T, Bp, G2 = out_ref.shape
    G = G2 // 2

    # ---- Hoisted input-to-hidden projection: one big MXU matmul ------------
    gx_ref[...] = (
        jnp.dot(emb2_ref[...], wih_ref[...], preferred_element_type=jnp.float32)
        + bih_ref[...]
    )

    len_col = len_ref[...]                                     # (Bp, 1) int32
    whh = whh_ref[...]                                         # (2G, 6G) bf16
    bhh = jnp.broadcast_to(bhh_ref[...], (Bp, 6 * G))          # hoisted broadcast
    col_is_fwd = lax.broadcasted_iota(jnp.int32, (Bp, 2 * G), 1) < G

    def step(i, h):
        tr = T - 1 - i
        # gx row block i already holds fwd gates at time i and bwd gates at tr.
        gx = gx_ref[pl.ds(pl.multiple_of(i * Bp, Bp), Bp), :]           # (Bp, 6G)
        # Single fused recurrent matmul for both directions (block-diag W_hh).
        gh = jnp.dot(h.astype(whh.dtype), whh,
                     preferred_element_type=jnp.float32) + bhh          # (Bp, 6G)
        # One sigmoid covers r & z of both directions; one tanh covers both n.
        rz = jax.nn.sigmoid(gx[:, 0:4 * G] + gh[:, 0:4 * G])
        r = rz[:, 0:2 * G]
        z = rz[:, 2 * G:4 * G]
        n = jnp.tanh(gx[:, 4 * G:6 * G] + r * gh[:, 4 * G:6 * G])
        h_new = (1.0 - z) * n + z * h                                   # (Bp, 2G)

        # Forward half valid iff i < len; backward half valid iff tr < len.
        t_here = jnp.where(col_is_fwd, i, tr)
        valid = t_here < len_col                                        # (Bp, 2G)
        out_val = jnp.where(valid, h_new, 0.0)
        out_ref[i, :, 0:G] = out_val[:, 0:G]           # full-vreg, lane-dense
        out_ref[tr, :, G:2 * G] = out_val[:, G:2 * G]  # full-vreg, lane-dense
        return jnp.where(valid, h_new, h)              # freeze past length

    h0 = jnp.zeros((Bp, 2 * G), jnp.float32)
    h_last = lax.fori_loop(0, T, step, h0, unroll=min(T, 8))

    # ---- hid = tanh(fc(cat([h_fwd_last, h_bwd_last], dim=1))) --------------
    hid_ref[...] = jnp.tanh(
        jnp.dot(h_last, wfc_ref[...], preferred_element_type=jnp.float32)
        + bfc_ref[...])


def init_encoder_params(key, vocab_size, embed_size, enc_hidden, dec_hidden):
    ks = jax.random.split(key, 12)
    H, E, D = enc_hidden, embed_size, dec_hidden
    s = 1.0 / jnp.sqrt(jnp.float32(H))
    u = lambda k, shape: jax.random.uniform(k, shape, jnp.float32, -s, s)
    return {
        "embed":  jax.random.normal(ks[0], (vocab_size, E), jnp.float32) * 0.1,
        "w_ih_f": u(ks[1], (E, 3 * H)),
        "w_hh_f": u(ks[2], (H, 3 * H)),
        "b_ih_f": u(ks[3], (1, 3 * H)),
        "b_hh_f": u(ks[4], (1, 3 * H)),
        "w_ih_b": u(ks[5], (E, 3 * H)),
        "w_hh_b": u(ks[6], (H, 3 * H)),
        "b_ih_b": u(ks[7], (1, 3 * H)),
        "b_hh_b": u(ks[8], (1, 3 * H)),
        "w_fc":   u(ks[9], (2 * H, D)),
        "b_fc":   u(ks[10], (1, D)),
    }


def encoder_forward(src, lengths, params):
    """src: (B, T) int32 tokens; lengths: (B,) int32. Returns (out, hid)."""
    B, T = src.shape
    E = params["embed"].shape[1]
    H = params["w_hh_f"].shape[0]
    D = params["b_fc"].shape[-1]

    G = ((H + 127) // 128) * 128          # lane-padded per-direction hidden
    Bp = ((B + 7) // 8) * 8               # sublane-padded batch

    # ---- time-major tokens / lengths (dummy batch rows have length 0) ------
    srcT = jnp.transpose(src).astype(jnp.int32)                 # (T, B)
    srcT = jnp.pad(srcT, ((0, 0), (0, Bp - B)))                 # (T, Bp)
    len_col = jnp.pad(lengths.astype(jnp.int32), (0, Bp - B)).reshape(Bp, 1)

    # ---- embedding gather, directly time-major; dropout = identity (eval) --
    emb_f = jnp.take(params["embed"], srcT, axis=0)             # (T, Bp, E)
    # Pair fwd time t with bwd time T-1-t so gx row-block t serves both dirs.
    emb2 = jnp.concatenate([emb_f, emb_f[::-1]], axis=-1)       # (T, Bp, 2E)
    emb2 = emb2.reshape(T * Bp, 2 * E).astype(jnp.bfloat16)

    # ---- fused / lane-padded weights; gate column layout per G-block:
    #        [ r_f | r_b | z_f | z_b | n_f | n_b ]
    def gates(w):
        return w[..., 0:H], w[..., H:2 * H], w[..., 2 * H:3 * H]

    def padG(w):            # (..., H) -> (..., G)
        return jnp.pad(w, [(0, 0)] * (w.ndim - 1) + [(0, G - H)])

    def padGG(w):           # (H, H) -> (G, G)
        return jnp.pad(w, ((0, G - H), (0, G - H)))

    rf, zf, nf = gates(params["w_ih_f"])
    rb, zb, nb = gates(params["w_ih_b"])
    ZE = jnp.zeros((E, G), jnp.float32)
    w_ih2 = jnp.concatenate([
        jnp.concatenate([padG(rf), ZE, padG(zf), ZE, padG(nf), ZE], axis=1),
        jnp.concatenate([ZE, padG(rb), ZE, padG(zb), ZE, padG(nb)], axis=1),
    ], axis=0).astype(jnp.bfloat16)                                   # (2E, 6G)

    brf, bzf, bnf = gates(params["b_ih_f"])
    brb, bzb, bnb = gates(params["b_ih_b"])
    b_ih2 = jnp.concatenate([padG(brf), padG(brb), padG(bzf), padG(bzb),
                             padG(bnf), padG(bnb)], axis=1)           # (1, 6G)

    hrf, hzf, hnf = gates(params["w_hh_f"])
    hrb, hzb, hnb = gates(params["w_hh_b"])
    ZG = jnp.zeros((G, G), jnp.float32)
    w_hh2 = jnp.concatenate([
        jnp.concatenate([padGG(hrf), ZG, padGG(hzf), ZG, padGG(hnf), ZG], axis=1),
        jnp.concatenate([ZG, padGG(hrb), ZG, padGG(hzb), ZG, padGG(hnb)], axis=1),
    ], axis=0).astype(jnp.bfloat16)                                   # (2G, 6G)

    crf, czf, cnf = gates(params["b_hh_f"])
    crb, czb, cnb = gates(params["b_hh_b"])
    b_hh2 = jnp.concatenate([padG(crf), padG(crb), padG(czf), padG(czb),
                             padG(cnf), padG(cnb)], axis=1)           # (1, 6G)

    w_fc2 = jnp.zeros((2 * G, D), jnp.float32)
    w_fc2 = w_fc2.at[0:H].set(params["w_fc"][0:H])
    w_fc2 = w_fc2.at[G:G + H].set(params["w_fc"][H:2 * H])            # (2G, D)

    # ---- VMEM budget (resident arrays + gx scratch, with headroom) ---------
    resident = (emb2.size * 2 + len_col.size * 4
                + w_ih2.size * 2 + b_ih2.size * 4
                + w_hh2.size * 2 + b_hh2.size * 4
                + w_fc2.size * 4 + params["b_fc"].size * 4
                + T * Bp * 2 * G * 4 + Bp * D * 4
                + T * Bp * 6 * G * 4)
    vmem_limit = int(min(max(32 << 20, 2 * resident + (2 << 20)), 64 << 20))

    vmem = pl.BlockSpec(memory_space=pltpu.MemorySpace.VMEM)
    out_tm, hid = pl.pallas_call(
        encoder_kernel,
        out_shape=(
            jax.ShapeDtypeStruct((T, Bp, 2 * G), jnp.float32),  # fused fwd|bwd outputs
            jax.ShapeDtypeStruct((Bp, D), jnp.float32),         # tanh(fc) head
        ),
        in_specs=[vmem] * 8,
        out_specs=(vmem, vmem),
        scratch_shapes=[pltpu.VMEM((T * Bp, 6 * G), jnp.float32)],
        compiler_params=pltpu.CompilerParams(vmem_limit_bytes=vmem_limit),
    )(emb2, len_col, w_ih2, b_ih2, w_hh2, b_hh2, w_fc2, params["b_fc"])

    # ---- unpad and restore PyTorch batch-first layout -----------------------
    out = jnp.concatenate([out_tm[:, :B, 0:H], out_tm[:, :B, G:G + H]], axis=-1)
    out = jnp.transpose(out, (1, 0, 2))            # (B, T, 2H) batch-first
    # NOTE: full-T output returned (padded positions are exact zeros); caller
    # may slice to max(lengths) — we avoid a host-side device_get sync here.
    hid = hid[:B][None]                            # (1, B, D) == unsqueeze(0)
    return out, hid


if __name__ == "__main__":
    vocab_size, embed_size = 50, 16
    enc_hidden, dec_hidden = 32, 32
    B, T = 2, 8

    key = jax.random.PRNGKey(0)
    k_par, k_src = jax.random.split(key)
    params = init_encoder_params(k_par, vocab_size, embed_size, enc_hidden, dec_hidden)

    src = jax.random.randint(k_src, (B, T), 0, vocab_size, dtype=jnp.int32)
    lengths = jnp.array([T, 5], dtype=jnp.int32)

    fwd = jax.jit(encoder_forward)
    out, hid = fwd(src, lengths, params)
    out = jax.block_until_ready(out)
    hid = jax.block_until_ready(hid)

    assert out.shape == (B, T, 2 * enc_hidden), out.shape
    assert hid.shape == (1, B, dec_hidden), hid.shape
    assert bool(jnp.all(jnp.isfinite(out))) and bool(jnp.all(jnp.isfinite(hid)))
    # padded positions of the shorter sequence must be exactly zero
    assert bool(jnp.all(out[1, 5:] == 0.0))

    print("KERNEL_OK")
</pallas_src>

<mosaic_0001>
module attributes {stable_mosaic.version = 11 : i64} {
  func.func @encoder_kernel(%arg0: memref<64x32xbf16, #tpu.memory_space<vmem>>, %arg1: memref<8x1xi32, #tpu.memory_space<vmem>>, %arg2: memref<32x768xbf16, #tpu.memory_space<vmem>>, %arg3: memref<1x768xf32, #tpu.memory_space<vmem>>, %arg4: memref<256x768xbf16, #tpu.memory_space<vmem>>, %arg5: memref<1x768xf32, #tpu.memory_space<vmem>>, %arg6: memref<256x32xf32, #tpu.memory_space<vmem>>, %arg7: memref<1x32xf32, #tpu.memory_space<vmem>>, %arg8: memref<8x8x256xf32, #tpu.memory_space<vmem>>, %arg9: memref<8x32xf32, #tpu.memory_space<vmem>>, %arg10: memref<64x768xf32, #tpu.memory_space<vmem>>) attributes {dimension_semantics = [], scalar_prefetch = 0 : i64, scratch_operands = 1 : i64, tpu.core_type = #tpu.core_type<tc>} {
    %c0 = arith.constant 0 : index
    %c0_0 = arith.constant 0 : index
    %0 = vector.load %arg0[%c0, %c0_0] : memref<64x32xbf16, #tpu.memory_space<vmem>>, vector<64x32xbf16>
    %c0_1 = arith.constant 0 : index
    %c0_2 = arith.constant 0 : index
    %1 = vector.load %arg2[%c0_1, %c0_2] : memref<32x768xbf16, #tpu.memory_space<vmem>>, vector<32x768xbf16>
    %cst = arith.constant dense<0.000000e+00> : vector<64x768xf32>
    %2 = tpu.matmul %0, %1, %cst {dimension_numbers = #tpu.dot_dimension_numbers<[1], [0], [0], [1], [0, 0, 1, 1], [], []>} : vector<64x32xbf16>, vector<32x768xbf16>, vector<64x768xf32> -> vector<64x768xf32>
    %c0_3 = arith.constant 0 : index
    %c0_4 = arith.constant 0 : index
    %3 = vector.load %arg3[%c0_3, %c0_4] : memref<1x768xf32, #tpu.memory_space<vmem>>, vector<1x768xf32>
    %4 = vector.broadcast %3 : vector<1x768xf32> to vector<64x768xf32>
    %5 = arith.addf %2, %4 : vector<64x768xf32>
    %c0_5 = arith.constant 0 : index
    %c0_6 = arith.constant 0 : index
    %6 = vector.load %arg10[%c0_5, %c0_6] : memref<64x768xf32, #tpu.memory_space<vmem>>, vector<64x768xf32>
    tpu.vector_store %arg10[%c0_5, %c0_6], %5 {strides = array<i32>} : memref<64x768xf32, #tpu.memory_space<vmem>>, vector<64x768xf32>,
    %c0_7 = arith.constant 0 : index
    %c0_8 = arith.constant 0 : index
    %7 = vector.load %arg1[%c0_7, %c0_8] : memref<8x1xi32, #tpu.memory_space<vmem>>, vector<8x1xi32>
    %c0_9 = arith.constant 0 : index
    %c0_10 = arith.constant 0 : index
    %8 = vector.load %arg4[%c0_9, %c0_10] : memref<256x768xbf16, #tpu.memory_space<vmem>>, vector<256x768xbf16>
    %c0_11 = arith.constant 0 : index
    %c0_12 = arith.constant 0 : index
    %9 = vector.load %arg5[%c0_11, %c0_12] : memref<1x768xf32, #tpu.memory_space<vmem>>, vector<1x768xf32>
    %10 = vector.shape_cast %9 : vector<1x768xf32> to vector<1x768xf32>
    %11 = vector.broadcast %10 : vector<1x768xf32> to vector<8x768xf32>
    %12 = tpu.iota {dimensions = array<i32: 1>} : vector<8x256xi32>
    %c128_i32 = arith.constant 128 : i32
    %13 = vector.broadcast %c128_i32 : i32 to vector<8x256xi32>
    %14 = arith.cmpi slt, %12, %13 : vector<8x256xi32>
    %cst_13 = arith.constant 0.000000e+00 : f32
    %15 = vector.broadcast %cst_13 : f32 to vector<8x256xf32>
    %c0_i32 = arith.constant 0 : i32
    %c7_i32 = arith.constant 7 : i32
    %16 = arith.subi %c7_i32, %c0_i32 : i32
    %c8_i32 = arith.constant 8 : i32
    %17 = arith.muli %c0_i32, %c8_i32 : i32
    %18 = tpu.assume_multiple %17, 8 : i32
    %19 = arith.index_cast %18 : i32 to index
    %c0_14 = arith.constant 0 : index
    %20 = vector.load %arg10[%19, %c0_14] : memref<64x768xf32, #tpu.memory_space<vmem>>, vector<8x768xf32>
    %21 = arith.truncf %15 : vector<8x256xf32> to vector<8x256xbf16>
    %cst_15 = arith.constant dense<0.000000e+00> : vector<8x768xf32>
    %22 = tpu.matmul %21, %8, %cst_15 {dimension_numbers = #tpu.dot_dimension_numbers<[1], [0], [0], [1], [0, 0, 1, 1], [], []>} : vector<8x256xbf16>, vector<256x768xbf16>, vector<8x768xf32> -> vector<8x768xf32>
    %23 = arith.addf %22, %11 : vector<8x768xf32>
    %24 = vector.extract_strided_slice %20 {offsets = [0, 0], sizes = [8, 512], strides = [1, 1]} : vector<8x768xf32> to vector<8x512xf32>
    %25 = vector.extract_strided_slice %23 {offsets = [0, 0], sizes = [8, 512], strides = [1, 1]} : vector<8x768xf32> to vector<8x512xf32>
    %26 = arith.addf %24, %25 : vector<8x512xf32>
    %27 = arith.negf %26 : vector<8x512xf32>
    %28 = math.exp %27 : vector<8x512xf32>
    %cst_16 = arith.constant 1.000000e+00 : f32
    %29 = vector.broadcast %cst_16 : f32 to vector<8x512xf32>
    %30 = arith.addf %29, %28 : vector<8x512xf32>
    %31 = arith.divf %29, %30 : vector<8x512xf32>
    %32 = vector.extract_strided_slice %31 {offsets = [0, 0], sizes = [8, 256], strides = [1, 1]} : vector<8x512xf32> to vector<8x256xf32>
    %33 = vector.extract_strided_slice %31 {offsets = [0, 256], sizes = [8, 256], strides = [1, 1]} : vector<8x512xf32> to vector<8x256xf32>
    %34 = vector.extract_strided_slice %20 {offsets = [0, 512], sizes = [8, 256], strides = [1, 1]} : vector<8x768xf32> to vector<8x256xf32>
    %35 = vector.extract_strided_slice %23 {offsets = [0, 512], sizes = [8, 256], strides = [1, 1]} : vector<8x768xf32> to vector<8x256xf32>
    %36 = arith.mulf %32, %35 : vector<8x256xf32>
    %37 = arith.addf %34, %36 : vector<8x256xf32>
    %38 = math.tanh %37 : vector<8x256xf32>
    %cst_17 = arith.constant 1.000000e+00 : f32
    %39 = vector.broadcast %cst_17 : f32 to vector<8x256xf32>
    %40 = arith.subf %39, %33 : vector<8x256xf32>
    %41 = arith.mulf %40, %38 : vector<8x256xf32>
    %42 = arith.mulf %33, %15 : vector<8x256xf32>
    %43 = arith.addf %41, %42 : vector<8x256xf32>
    %44 = vector.broadcast %c0_i32 : i32 to vector<8x256xi32>
    %45 = vector.broadcast %16 : i32 to vector<8x256xi32>
    %46 = arith.select %14, %44, %45 : vector<8x256xi1>, vector<8x256xi32>
    %47 = vector.broadcast %7 : vector<8x1xi32> to vector<8x256xi32>
    %48 = arith.cmpi slt, %46, %47 : vector<8x256xi32>
    %cst_18 = arith.constant 0.000000e+00 : f32
    %49 = vector.broadcast %cst_18 : f32 to vector<8x256xf32>
    %50 = arith.select %48, %43, %49 : vector<8x256xi1>, vector<8x256xf32>
    %51 = vector.extract_strided_slice %50 {offsets = [0, 0], sizes = [8, 128], strides = [1, 1]} : vector<8x256xf32> to vector<8x128xf32>
    %52 = arith.index_cast %c0_i32 : i32 to index
    %c0_19 = arith.constant 0 : index
    %c0_20 = arith.constant 0 : index
    %53 = vector.load %arg8[%52, %c0_19, %c0_20] : memref<8x8x256xf32, #tpu.memory_space<vmem>>, vector<1x8x128xf32>
    %54 = vector.shape_cast %53 : vector<1x8x128xf32> to vector<8x128xf32>
    %55 = vector.shape_cast %51 : vector<8x128xf32> to vector<1x8x128xf32>
    tpu.vector_store %arg8[%52, %c0_19, %c0_20], %55 {strides = array<i32>} : memref<8x8x256xf32, #tpu.memory_space<vmem>>, vector<1x8x128xf32>,
    %56 = vector.extract_strided_slice %50 {offsets = [0, 128], sizes = [8, 128], strides = [1, 1]} : vector<8x256xf32> to vector<8x128xf32>
    %57 = arith.index_cast %16 : i32 to index
    %c0_21 = arith.constant 0 : index
    %c128 = arith.constant 128 : index
    %58 = vector.load %arg8[%57, %c0_21, %c128] : memref<8x8x256xf32, #tpu.memory_space<vmem>>, vector<1x8x128xf32>
    %59 = vector.shape_cast %58 : vector<1x8x128xf32> to vector<8x128xf32>
    %60 = vector.shape_cast %56 : vector<8x128xf32> to vector<1x8x128xf32>
    tpu.vector_store %arg8[%57, %c0_21, %c128], %60 {strides = array<i32>} : memref<8x8x256xf32, #tpu.memory_space<vmem>>, vector<1x8x128xf32>,
    %61 = arith.select %48, %43, %15 : vector<8x256xi1>, vector<8x256xf32>
    %c1_i32 = arith.constant 1 : i32
    %c7_i32_22 = arith.constant 7 : i32
    %62 = arith.subi %c7_i32_22, %c1_i32 : i32
    %c8_i32_23 = arith.constant 8 : i32
    %63 = arith.muli %c1_i32, %c8_i32_23 : i32
    %64 = tpu.assume_multiple %63, 8 : i32
    %65 = arith.index_cast %64 : i32 to index
    %c0_24 = arith.constant 0 : index
    %66 = vector.load %arg10[%65, %c0_24] : memref<64x768xf32, #tpu.memory_space<vmem>>, vector<8x768xf32>
    %67 = arith.truncf %61 : vector<8x256xf32> to vector<8x256xbf16>
    %cst_25 = arith.constant dense<0.000000e+00> : vector<8x768xf32>
    %68 = tpu.matmul %67, %8, %cst_25 {dimension_numbers = #tpu.dot_dimension_numbers<[1], [0], [0], [1], [0, 0, 1, 1], [], []>} : vector<8x256xbf16>, vector<256x768xbf16>, vector<8x768xf32> -> vector<8x768xf32>
    %69 = arith.addf %68, %11 : vector<8x768xf32>
    %70 = vector.extract_strided_slice %66 {offsets = [0, 0], sizes = [8, 512], strides = [1, 1]} : vector<8x768xf32> to vector<8x512xf32>
    %71 = vector.extract_strided_slice %69 {offsets = [0, 0], sizes = [8, 512], strides = [1, 1]} : vector<8x768xf32> to vector<8x512xf32>
    %72 = arith.addf %70, %71 : vector<8x512xf32>
    %73 = arith.negf %72 : vector<8x512xf32>
    %74 = math.exp %73 : vector<8x512xf32>
    %cst_26 = arith.constant 1.000000e+00 : f32
    %75 = vector.broadcast %cst_26 : f32 to vector<8x512xf32>
    %76 = arith.addf %75, %74 : vector<8x512xf32>
    %77 = arith.divf %75, %76 : vector<8x512xf32>
    %78 = vector.extract_strided_slice %77 {offsets = [0, 0], sizes = [8, 256], strides = [1, 1]} : vector<8x512xf32> to vector<8x256xf32>
    %79 = vector.extract_strided_slice %77 {offsets = [0, 256], sizes = [8, 256], strides = [1, 1]} : vector<8x512xf32> to vector<8x256xf32>
    %80 = vector.extract_strided_slice %66 {offsets = [0, 512], sizes = [8, 256], strides = [1, 1]} : vector<8x768xf32> to vector<8x256xf32>
    %81 = vector.extract_strided_slice %69 {offsets = [0, 512], sizes = [8, 256], strides = [1, 1]} : vector<8x768xf32> to vector<8x256xf32>
    %82 = arith.mulf %78, %81 : vector<8x256xf32>
    %83 = arith.addf %80, %82 : vector<8x256xf32>
    %84 = math.tanh %83 : vector<8x256xf32>
    %cst_27 = arith.constant 1.000000e+00 : f32
    %85 = vector.broadcast %cst_27 : f32 to vector<8x256xf32>
    %86 = arith.subf %85, %79 : vector<8x256xf32>
    %87 = arith.mulf %86, %84 : vector<8x256xf32>
    %88 = arith.mulf %79, %61 : vector<8x256xf32>
    %89 = arith.addf %87, %88 : vector<8x256xf32>
    %90 = vector.broadcast %c1_i32 : i32 to vector<8x256xi32>
    %91 = vector.broadcast %62 : i32 to vector<8x256xi32>
    %92 = arith.select %14, %90, %91 : vector<8x256xi1>, vector<8x256xi32>
    %93 = vector.broadcast %7 : vector<8x1xi32> to vector<8x256xi32>
    %94 = arith.cmpi slt, %92, %93 : vector<8x256xi32>
    %cst_28 = arith.constant 0.000000e+00 : f32
    %95 = vector.broadcast %cst_28 : f32 to vector<8x256xf32>
    %96 = arith.select %94, %89, %95 : vector<8x256xi1>, vector<8x256xf32>
    %97 = vector.extract_strided_slice %96 {offsets = [0, 0], sizes = [8, 128], strides = [1, 1]} : vector<8x256xf32> to vector<8x128xf32>
    %98 = arith.index_cast %c1_i32 : i32 to index
    %c0_29 = arith.constant 0 : index
    %c0_30 = arith.constant 0 : index
    %99 = vector.load %arg8[%98, %c0_29, %c0_30] : memref<8x8x256xf32, #tpu.memory_space<vmem>>, vector<1x8x128xf32>
    %100 = vector.shape_cast %99 : vector<1x8x128xf32> to vector<8x128xf32>
    %101 = vector.shape_cast %97 : vector<8x128xf32> to vector<1x8x128xf32>
    tpu.vector_store %arg8[%98, %c0_29, %c0_30], %101 {strides = array<i32>} : memref<8x8x256xf32, #tpu.memory_space<vmem>>, vector<1x8x128xf32>,
    %102 = vector.extract_strided_slice %96 {offsets = [0, 128], sizes = [8, 128], strides = [1, 1]} : vector<8x256xf32> to vector<8x128xf32>
    %103 = arith.index_cast %62 : i32 to index
    %c0_31 = arith.constant 0 : index
    %c128_32 = arith.constant 128 : index
    %104 = vector.load %arg8[%103, %c0_31, %c128_32] : memref<8x8x256xf32, #tpu.memory_space<vmem>>, vector<1x8x128xf32>
    %105 = vector.shape_cast %104 : vector<1x8x128xf32> to vector<8x128xf32>
    %106 = vector.shape_cast %102 : vector<8x128xf32> to vector<1x8x128xf32>
    tpu.vector_store %arg8[%103, %c0_31, %c128_32], %106 {strides = array<i32>} : memref<8x8x256xf32, #tpu.memory_space<vmem>>, vector<1x8x128xf32>,
    %107 = arith.select %94, %89, %61 : vector<8x256xi1>, vector<8x256xf32>
    %c2_i32 = arith.constant 2 : i32
    %c7_i32_33 = arith.constant 7 : i32
    %108 = arith.subi %c7_i32_33, %c2_i32 : i32
    %c8_i32_34 = arith.constant 8 : i32
    %109 = arith.muli %c2_i32, %c8_i32_34 : i32
    %110 = tpu.assume_multiple %109, 8 : i32
    %111 = arith.index_cast %110 : i32 to index
    %c0_35 = arith.constant 0 : index
    %112 = vector.load %arg10[%111, %c0_35] : memref<64x768xf32, #tpu.memory_space<vmem>>, vector<8x768xf32>
    %113 = arith.truncf %107 : vector<8x256xf32> to vector<8x256xbf16>
    %cst_36 = arith.constant dense<0.000000e+00> : vector<8x768xf32>
    %114 = tpu.matmul %113, %8, %cst_36 {dimension_numbers = #tpu.dot_dimension_numbers<[1], [0], [0], [1], [0, 0, 1, 1], [], []>} : vector<8x256xbf16>, vector<256x768xbf16>, vector<8x768xf32> -> vector<8x768xf32>
    %115 = arith.addf %114, %11 : vector<8x768xf32>
    %116 = vector.extract_strided_slice %112 {offsets = [0, 0], sizes = [8, 512], strides = [1, 1]} : vector<8x768xf32> to vector<8x512xf32>
    %117 = vector.extract_strided_slice %115 {offsets = [0, 0], sizes = [8, 512], strides = [1, 1]} : vector<8x768xf32> to vector<8x512xf32>
    %118 = arith.addf %116, %117 : vector<8x512xf32>
    %119 = arith.negf %118 : vector<8x512xf32>
    %120 = math.exp %119 : vector<8x512xf32>
    %cst_37 = arith.constant 1.000000e+00 : f32
    %121 = vector.broadcast %cst_37 : f32 to vector<8x512xf32>
    %122 = arith.addf %121, %120 : vector<8x512xf32>
    %123 = arith.divf %121, %122 : vector<8x512xf32>
    %124 = vector.extract_strided_slice %123 {offsets = [0, 0], sizes = [8, 256], strides = [1, 1]} : vector<8x512xf32> to vector<8x256xf32>
    %125 = vector.extract_strided_slice %123 {offsets = [0, 256], sizes = [8, 256], strides = [1, 1]} : vector<8x512xf32> to vector<8x256xf32>
    %126 = vector.extract_strided_slice %112 {offsets = [0, 512], sizes = [8, 256], strides = [1, 1]} : vector<8x768xf32> to vector<8x256xf32>
    %127 = vector.extract_strided_slice %115 {offsets = [0, 512], sizes = [8, 256], strides = [1, 1]} : vector<8x768xf32> to vector<8x256xf32>
    %128 = arith.mulf %124, %127 : vector<8x256xf32>
    %129 = arith.addf %126, %128 : vector<8x256xf32>
    %130 = math.tanh %129 : vector<8x256xf32>
    %cst_38 = arith.constant 1.000000e+00 : f32
    %131 = vector.broadcast %cst_38 : f32 to vector<8x256xf32>
    %132 = arith.subf %131, %125 : vector<8x256xf32>
    %133 = arith.mulf %132, %130 : vector<8x256xf32>
    %134 = arith.mulf %125, %107 : vector<8x256xf32>
    %135 = arith.addf %133, %134 : vector<8x256xf32>
    %136 = vector.broadcast %c2_i32 : i32 to vector<8x256xi32>
    %137 = vector.broadcast %108 : i32 to vector<8x256xi32>
    %138 = arith.select %14, %136, %137 : vector<8x256xi1>, vector<8x256xi32>
    %139 = vector.broadcast %7 : vector<8x1xi32> to vector<8x256xi32>
    %140 = arith.cmpi slt, %138, %139 : vector<8x256xi32>
    %cst_39 = arith.constant 0.000000e+00 : f32
    %141 = vector.broadcast %cst_39 : f32 to vector<8x256xf32>
    %142 = arith.select %140, %135, %141 : vector<8x256xi1>, vector<8x256xf32>
    %143 = vector.extract_strided_slice %142 {offsets = [0, 0], sizes = [8, 128], strides = [1, 1]} : vector<8x256xf32> to vector<8x128xf32>
    %144 = arith.index_cast %c2_i32 : i32 to index
    %c0_40 = arith.constant 0 : index
    %c0_41 = arith.constant 0 : index
    %145 = vector.load %arg8[%144, %c0_40, %c0_41] : memref<8x8x256xf32, #tpu.memory_space<vmem>>, vector<1x8x128xf32>
    %146 = vector.shape_cast %145 : vector<1x8x128xf32> to vector<8x128xf32>
    %147 = vector.shape_cast %143 : vector<8x128xf32> to vector<1x8x128xf32>
    tpu.vector_store %arg8[%144, %c0_40, %c0_41], %147 {strides = array<i32>} : memref<8x8x256xf32, #tpu.memory_space<vmem>>, vector<1x8x128xf32>,
    %148 = vector.extract_strided_slice %142 {offsets = [0, 128], sizes = [8, 128], strides = [1, 1]} : vector<8x256xf32> to vector<8x128xf32>
    %149 = arith.index_cast %108 : i32 to index
    %c0_42 = arith.constant 0 : index
    %c128_43 = arith.constant 128 : index
    %150 = vector.load %arg8[%149, %c0_42, %c128_43] : memref<8x8x256xf32, #tpu.memory_space<vmem>>, vector<1x8x128xf32>
    %151 = vector.shape_cast %150 : vector<1x8x128xf32> to vector<8x128xf32>
    %152 = vector.shape_cast %148 : vector<8x128xf32> to vector<1x8x128xf32>
    tpu.vector_store %arg8[%149, %c0_42, %c128_43], %152 {strides = array<i32>} : memref<8x8x256xf32, #tpu.memory_space<vmem>>, vector<1x8x128xf32>,
    %153 = arith.select %140, %135, %107 : vector<8x256xi1>, vector<8x256xf32>
    %c3_i32 = arith.constant 3 : i32
    %c7_i32_44 = arith.constant 7 : i32
    %154 = arith.subi %c7_i32_44, %c3_i32 : i32
    %c8_i32_45 = arith.constant 8 : i32
    %155 = arith.muli %c3_i32, %c8_i32_45 : i32
    %156 = tpu.assume_multiple %155, 8 : i32
    %157 = arith.index_cast %156 : i32 to index
    %c0_46 = arith.constant 0 : index
    %158 = vector.load %arg10[%157, %c0_46] : memref<64x768xf32, #tpu.memory_space<vmem>>, vector<8x768xf32>
    %159 = arith.truncf %153 : vector<8x256xf32> to vector<8x256xbf16>
    %cst_47 = arith.constant dense<0.000000e+00> : vector<8x768xf32>
    %160 = tpu.matmul %159, %8, %cst_47 {dimension_numbers = #tpu.dot_dimension_numbers<[1], [0], [0], [1], [0, 0, 1, 1], [], []>} : vector<8x256xbf16>, vector<256x768xbf16>, vector<8x768xf32> -> vector<8x768xf32>
    %161 = arith.addf %160, %11 : vector<8x768xf32>
    %162 = vector.extract_strided_slice %158 {offsets = [0, 0], sizes = [8, 512], strides = [1, 1]} : vector<8x768xf32> to vector<8x512xf32>
    %163 = vector.extract_strided_slice %161 {offsets = [0, 0], sizes = [8, 512], strides = [1, 1]} : vector<8x768xf32> to vector<8x512xf32>
    %164 = arith.addf %162, %163 : vector<8x512xf32>
    %165 = arith.negf %164 : vector<8x512xf32>
    %166 = math.exp %165 : vector<8x512xf32>
    %cst_48 = arith.constant 1.000000e+00 : f32
    %167 = vector.broadcast %cst_48 : f32 to vector<8x512xf32>
    %168 = arith.addf %167, %166 : vector<8x512xf32>
    %169 = arith.divf %167, %168 : vector<8x512xf32>
    %170 = vector.extract_strided_slice %169 {offsets = [0, 0], sizes = [8, 256], strides = [1, 1]} : vector<8x512xf32> to vector<8x256xf32>
    %171 = vector.extract_strided_slice %169 {offsets = [0, 256], sizes = [8, 256], strides = [1, 1]} : vector<8x512xf32> to vector<8x256xf32>
    %172 = vector.extract_strided_slice %158 {offsets = [0, 512], sizes = [8, 256], strides = [1, 1]} : vector<8x768xf32> to vector<8x256xf32>
    %173 = vector.extract_strided_slice %161 {offsets = [0, 512], sizes = [8, 256], strides = [1, 1]} : vector<8x768xf32> to vector<8x256xf32>
    %174 = arith.mulf %170, %173 : vector<8x256xf32>
    %175 = arith.addf %172, %174 : vector<8x256xf32>
    %176 = math.tanh %175 : vector<8x256xf32>
    %cst_49 = arith.constant 1.000000e+00 : f32
    %177 = vector.broadcast %cst_49 : f32 to vector<8x256xf32>
    %178 = arith.subf %177, %171 : vector<8x256xf32>
    %179 = arith.mulf %178, %176 : vector<8x256xf32>
    %180 = arith.mulf %171, %153 : vector<8x256xf32>
    %181 = arith.addf %179, %180 : vector<8x256xf32>
    %182 = vector.broadcast %c3_i32 : i32 to vector<8x256xi32>
    %183 = vector.broadcast %154 : i32 to vector<8x256xi32>
    %184 = arith.select %14, %182, %183 : vector<8x256xi1>, vector<8x256xi32>
    %185 = vector.broadcast %7 : vector<8x1xi32> to vector<8x256xi32>
    %186 = arith.cmpi slt, %184, %185 : vector<8x256xi32>
    %cst_50 = arith.constant 0.000000e+00 : f32
    %187 = vector.broadcast %cst_50 : f32 to vector<8x256xf32>
    %188 = arith.select %186, %181, %187 : vector<8x256xi1>, vector<8x256xf32>
    %189 = vector.extract_strided_slice %188 {offsets = [0, 0], sizes = [8, 128], strides = [1, 1]} : vector<8x256xf32> to vector<8x128xf32>
    %190 = arith.index_cast %c3_i32 : i32 to index
    %c0_51 = arith.constant 0 : index
    %c0_52 = arith.constant 0 : index
    %191 = vector.load %arg8[%190, %c0_51, %c0_52] : memref<8x8x256xf32, #tpu.memory_space<vmem>>, vector<1x8x128xf32>
    %192 = vector.shape_cast %191 : vector<1x8x128xf32> to vector<8x128xf32>
    %193 = vector.shape_cast %189 : vector<8x128xf32> to vector<1x8x128xf32>
    tpu.vector_store %arg8[%190, %c0_51, %c0_52], %193 {strides = array<i32>} : memref<8x8x256xf32, #tpu.memory_space<vmem>>, vector<1x8x128xf32>,
    %194 = vector.extract_strided_slice %188 {offsets = [0, 128], sizes = [8, 128], strides = [1, 1]} : vector<8x256xf32> to vector<8x128xf32>
    %195 = arith.index_cast %154 : i32 to index
    %c0_53 = arith.constant 0 : index
    %c128_54 = arith.constant 128 : index
    %196 = vector.load %arg8[%195, %c0_53, %c128_54] : memref<8x8x256xf32, #tpu.memory_space<vmem>>, vector<1x8x128xf32>
    %197 = vector.shape_cast %196 : vector<1x8x128xf32> to vector<8x128xf32>
    %198 = vector.shape_cast %194 : vector<8x128xf32> to vector<1x8x128xf32>
    tpu.vector_store %arg8[%195, %c0_53, %c128_54], %198 {strides = array<i32>} : memref<8x8x256xf32, #tpu.memory_space<vmem>>, vector<1x8x128xf32>,
    %199 = arith.select %186, %181, %153 : vector<8x256xi1>, vector<8x256xf32>
    %c4_i32 = arith.constant 4 : i32
    %c7_i32_55 = arith.constant 7 : i32
    %200 = arith.subi %c7_i32_55, %c4_i32 : i32
    %c8_i32_56 = arith.constant 8 : i32
    %201 = arith.muli %c4_i32, %c8_i32_56 : i32
    %202 = tpu.assume_multiple %201, 8 : i32
    %203 = arith.index_cast %202 : i32 to index
    %c0_57 = arith.constant 0 : index
    %204 = vector.load %arg10[%203, %c0_57] : memref<64x768xf32, #tpu.memory_space<vmem>>, vector<8x768xf32>
    %205 = arith.truncf %199 : vector<8x256xf32> to vector<8x256xbf16>
    %cst_58 = arith.constant dense<0.000000e+00> : vector<8x768xf32>
    %206 = tpu.matmul %205, %8, %cst_58 {dimension_numbers = #tpu.dot_dimension_numbers<[1], [0], [0], [1], [0, 0, 1, 1], [], []>} : vector<8x256xbf16>, vector<256x768xbf16>, vector<8x768xf32> -> vector<8x768xf32>
    %207 = arith.addf %206, %11 : vector<8x768xf32>
    %208 = vector.extract_strided_slice %204 {offsets = [0, 0], sizes = [8, 512], strides = [1, 1]} : vector<8x768xf32> to vector<8x512xf32>
    %209 = vector.extract_strided_slice %207 {offsets = [0, 0], sizes = [8, 512], strides = [1, 1]} : vector<8x768xf32> to vector<8x512xf32>
    %210 = arith.addf %208, %209 : vector<8x512xf32>
    %211 = arith.negf %210 : vector<8x512xf32>
    %212 = math.exp %211 : vector<8x512xf32>
    %cst_59 = arith.constant 1.000000e+00 : f32
    %213 = vector.broadcast %cst_59 : f32 to vector<8x512xf32>
    %214 = arith.addf %213, %212 : vector<8x512xf32>
    %215 = arith.divf %213, %214 : vector<8x512xf32>
    %216 = vector.extract_strided_slice %215 {offsets = [0, 0], sizes = [8, 256], strides = [1, 1]} : vector<8x512xf32> to vector<8x256xf32>
    %217 = vector.extract_strided_slice %215 {offsets = [0, 256], sizes = [8, 256], strides = [1, 1]} : vector<8x512xf32> to vector<8x256xf32>
    %218 = vector.extract_strided_slice %204 {offsets = [0, 512], sizes = [8, 256], strides = [1, 1]} : vector<8x768xf32> to vector<8x256xf32>
    %219 = vector.extract_strided_slice %207 {offsets = [0, 512], sizes = [8, 256], strides = [1, 1]} : vector<8x768xf32> to vector<8x256xf32>
    %220 = arith.mulf %216, %219 : vector<8x256xf32>
    %221 = arith.addf %218, %220 : vector<8x256xf32>
    %222 = math.tanh %221 : vector<8x256xf32>
    %cst_60 = arith.constant 1.000000e+00 : f32
    %223 = vector.broadcast %cst_60 : f32 to vector<8x256xf32>
    %224 = arith.subf %223, %217 : vector<8x256xf32>
    %225 = arith.mulf %224, %222 : vector<8x256xf32>
    %226 = arith.mulf %217, %199 : vector<8x256xf32>
    %227 = arith.addf %225, %226 : vector<8x256xf32>
    %228 = vector.broadcast %c4_i32 : i32 to vector<8x256xi32>
    %229 = vector.broadcast %200 : i32 to vector<8x256xi32>
    %230 = arith.select %14, %228, %229 : vector<8x256xi1>, vector<8x256xi32>
    %231 = vector.broadcast %7 : vector<8x1xi32> to vector<8x256xi32>
    %232 = arith.cmpi slt, %230, %231 : vector<8x256xi32>
    %cst_61 = arith.constant 0.000000e+00 : f32
    %233 = vector.broadcast %cst_61 : f32 to vector<8x256xf32>
    %234 = arith.select %232, %227, %233 : vector<8x256xi1>, vector<8x256xf32>
    %235 = vector.extract_strided_slice %234 {offsets = [0, 0], sizes = [8, 128], strides = [1, 1]} : vector<8x256xf32> to vector<8x128xf32>
    %236 = arith.index_cast %c4_i32 : i32 to index
    %c0_62 = arith.constant 0 : index
    %c0_63 = arith.constant 0 : index
    %237 = vector.load %arg8[%236, %c0_62, %c0_63] : memref<8x8x256xf32, #tpu.memory_space<vmem>>, vector<1x8x128xf32>
    %238 = vector.shape_cast %237 : vector<1x8x128xf32> to vector<8x128xf32>
    %239 = vector.shape_cast %235 : vector<8x128xf32> to vector<1x8x128xf32>
    tpu.vector_store %arg8[%236, %c0_62, %c0_63], %239 {strides = array<i32>} : memref<8x8x256xf32, #tpu.memory_space<vmem>>, vector<1x8x128xf32>,
    %240 = vector.extract_strided_slice %234 {offsets = [0, 128], sizes = [8, 128], strides = [1, 1]} : vector<8x256xf32> to vector<8x128xf32>
    %241 = arith.index_cast %200 : i32 to index
    %c0_64 = arith.constant 0 : index
    %c128_65 = arith.constant 128 : index
    %242 = vector.load %arg8[%241, %c0_64, %c128_65] : memref<8x8x256xf32, #tpu.memory_space<vmem>>, vector<1x8x128xf32>
    %243 = vector.shape_cast %242 : vector<1x8x128xf32> to vector<8x128xf32>
    %244 = vector.shape_cast %240 : vector<8x128xf32> to vector<1x8x128xf32>
    tpu.vector_store %arg8[%241, %c0_64, %c128_65], %244 {strides = array<i32>} : memref<8x8x256xf32, #tpu.memory_space<vmem>>, vector<1x8x128xf32>,
    %245 = arith.select %232, %227, %199 : vector<8x256xi1>, vector<8x256xf32>
    %c5_i32 = arith.constant 5 : i32
    %c7_i32_66 = arith.constant 7 : i32
    %246 = arith.subi %c7_i32_66, %c5_i32 : i32
    %c8_i32_67 = arith.constant 8 : i32
    %247 = arith.muli %c5_i32, %c8_i32_67 : i32
    %248 = tpu.assume_multiple %247, 8 : i32
    %249 = arith.index_cast %248 : i32 to index
    %c0_68 = arith.constant 0 : index
    %250 = vector.load %arg10[%249, %c0_68] : memref<64x768xf32, #tpu.memory_space<vmem>>, vector<8x768xf32>
    %251 = arith.truncf %245 : vector<8x256xf32> to vector<8x256xbf16>
    %cst_69 = arith.constant dense<0.000000e+00> : vector<8x768xf32>
    %252 = tpu.matmul %251, %8, %cst_69 {dimension_numbers = #tpu.dot_dimension_numbers<[1], [0], [0], [1], [0, 0, 1, 1], [], []>} : vector<8x256xbf16>, vector<256x768xbf16>, vector<8x768xf32> -> vector<8x768xf32>
    %253 = arith.addf %252, %11 : vector<8x768xf32>
    %254 = vector.extract_strided_slice %250 {offsets = [0, 0], sizes = [8, 512], strides = [1, 1]} : vector<8x768xf32> to vector<8x512xf32>
    %255 = vector.extract_strided_slice %253 {offsets = [0, 0], sizes = [8, 512], strides = [1, 1]} : vector<8x768xf32> to vector<8x512xf32>
    %256 = arith.addf %254, %255 : vector<8x512xf32>
    %257 = arith.negf %256 : vector<8x512xf32>
    %258 = math.exp %257 : vector<8x512xf32>
    %cst_70 = arith.constant 1.000000e+00 : f32
    %259 = vector.broadcast %cst_70 : f32 to vector<8x512xf32>
    %260 = arith.addf %259, %258 : vector<8x512xf32>
    %261 = arith.divf %259, %260 : vector<8x512xf32>
    %262 = vector.extract_strided_slice %261 {offsets = [0, 0], sizes = [8, 256], strides = [1, 1]} : vector<8x512xf32> to vector<8x256xf32>
    %263 = vector.extract_strided_slice %261 {offsets = [0, 256], sizes = [8, 256], strides = [1, 1]} : vector<8x512xf32> to vector<8x256xf32>
    %264 = vector.extract_strided_slice %250 {offsets = [0, 512], sizes = [8, 256], strides = [1, 1]} : vector<8x768xf32> to vector<8x256xf32>
    %265 = vector.extract_strided_slice %253 {offsets = [0, 512], sizes = [8, 256], strides = [1, 1]} : vector<8x768xf32> to vector<8x256xf32>
    %266 = arith.mulf %262, %265 : vector<8x256xf32>
    %267 = arith.addf %264, %266 : vector<8x256xf32>
    %268 = math.tanh %267 : vector<8x256xf32>
    %cst_71 = arith.constant 1.000000e+00 : f32
    %269 = vector.broadcast %cst_71 : f32 to vector<8x256xf32>
    %270 = arith.subf %269, %263 : vector<8x256xf32>
    %271 = arith.mulf %270, %268 : vector<8x256xf32>
    %272 = arith.mulf %263, %245 : vector<8x256xf32>
    %273 = arith.addf %271, %272 : vector<8x256xf32>
    %274 = vector.broadcast %c5_i32 : i32 to vector<8x256xi32>
    %275 = vector.broadcast %246 : i32 to vector<8x256xi32>
    %276 = arith.select %14, %274, %275 : vector<8x256xi1>, vector<8x256xi32>
    %277 = vector.broadcast %7 : vector<8x1xi32> to vector<8x256xi32>
    %278 = arith.cmpi slt, %276, %277 : vector<8x256xi32>
    %cst_72 = arith.constant 0.000000e+00 : f32
    %279 = vector.broadcast %cst_72 : f32 to vector<8x256xf32>
    %280 = arith.select %278, %273, %279 : vector<8x256xi1>, vector<8x256xf32>
    %281 = vector.extract_strided_slice %280 {offsets = [0, 0], sizes = [8, 128], strides = [1, 1]} : vector<8x256xf32> to vector<8x128xf32>
    %282 = arith.index_cast %c5_i32 : i32 to index
    %c0_73 = arith.constant 0 : index
    %c0_74 = arith.constant 0 : index
    %283 = vector.load %arg8[%282, %c0_73, %c0_74] : memref<8x8x256xf32, #tpu.memory_space<vmem>>, vector<1x8x128xf32>
    %284 = vector.shape_cast %283 : vector<1x8x128xf32> to vector<8x128xf32>
    %285 = vector.shape_cast %281 : vector<8x128xf32> to vector<1x8x128xf32>
    tpu.vector_store %arg8[%282, %c0_73, %c0_74], %285 {strides = array<i32>} : memref<8x8x256xf32, #tpu.memory_space<vmem>>, vector<1x8x128xf32>,
    %286 = vector.extract_strided_slice %280 {offsets = [0, 128], sizes = [8, 128], strides = [1, 1]} : vector<8x256xf32> to vector<8x128xf32>
    %287 = arith.index_cast %246 : i32 to index
    %c0_75 = arith.constant 0 : index
    %c128_76 = arith.constant 128 : index
    %288 = vector.load %arg8[%287, %c0_75, %c128_76] : memref<8x8x256xf32, #tpu.memory_space<vmem>>, vector<1x8x128xf32>
    %289 = vector.shape_cast %288 : vector<1x8x128xf32> to vector<8x128xf32>
    %290 = vector.shape_cast %286 : vector<8x128xf32> to vector<1x8x128xf32>
    tpu.vector_store %arg8[%287, %c0_75, %c128_76], %290 {strides = array<i32>} : memref<8x8x256xf32, #tpu.memory_space<vmem>>, vector<1x8x128xf32>,
    %291 = arith.select %278, %273, %245 : vector<8x256xi1>, vector<8x256xf32>
    %c6_i32 = arith.constant 6 : i32
    %c7_i32_77 = arith.constant 7 : i32
    %292 = arith.subi %c7_i32_77, %c6_i32 : i32
    %c8_i32_78 = arith.constant 8 : i32
    %293 = arith.muli %c6_i32, %c8_i32_78 : i32
    %294 = tpu.assume_multiple %293, 8 : i32
    %295 = arith.index_cast %294 : i32 to index
    %c0_79 = arith.constant 0 : index
    %296 = vector.load %arg10[%295, %c0_79] : memref<64x768xf32, #tpu.memory_space<vmem>>, vector<8x768xf32>
    %297 = arith.truncf %291 : vector<8x256xf32> to vector<8x256xbf16>
    %cst_80 = arith.constant dense<0.000000e+00> : vector<8x768xf32>
    %298 = tpu.matmul %297, %8, %cst_80 {dimension_numbers = #tpu.dot_dimension_numbers<[1], [0], [0], [1], [0, 0, 1, 1], [], []>} : vector<8x256xbf16>, vector<256x768xbf16>, vector<8x768xf32> -> vector<8x768xf32>
    %299 = arith.addf %298, %11 : vector<8x768xf32>
    %300 = vector.extract_strided_slice %296 {offsets = [0, 0], sizes = [8, 512], strides = [1, 1]} : vector<8x768xf32> to vector<8x512xf32>
    %301 = vector.extract_strided_slice %299 {offsets = [0, 0], sizes = [8, 512], strides = [1, 1]} : vector<8x768xf32> to vector<8x512xf32>
    %302 = arith.addf %300, %301 : vector<8x512xf32>
    %303 = arith.negf %302 : vector<8x512xf32>
    %304 = math.exp %303 : vector<8x512xf32>
    %cst_81 = arith.constant 1.000000e+00 : f32
    %305 = vector.broadcast %cst_81 : f32 to vector<8x512xf32>
    %306 = arith.addf %305, %304 : vector<8x512xf32>
    %307 = arith.divf %305, %306 : vector<8x512xf32>
    %308 = vector.extract_strided_slice %307 {offsets = [0, 0], sizes = [8, 256], strides = [1, 1]} : vector<8x512xf32> to vector<8x256xf32>
    %309 = vector.extract_strided_slice %307 {offsets = [0, 256], sizes = [8, 256], strides = [1, 1]} : vector<8x512xf32> to vector<8x256xf32>
    %310 = vector.extract_strided_slice %296 {offsets = [0, 512], sizes = [8, 256], strides = [1, 1]} : vector<8x768xf32> to vector<8x256xf32>
    %311 = vector.extract_strided_slice %299 {offsets = [0, 512], sizes = [8, 256], strides = [1, 1]} : vector<8x768xf32> to vector<8x256xf32>
    %312 = arith.mulf %308, %311 : vector<8x256xf32>
    %313 = arith.addf %310, %312 : vector<8x256xf32>
    %314 = math.tanh %313 : vector<8x256xf32>
    %cst_82 = arith.constant 1.000000e+00 : f32
    %315 = vector.broadcast %cst_82 : f32 to vector<8x256xf32>
    %316 = arith.subf %315, %309 : vector<8x256xf32>
    %317 = arith.mulf %316, %314 : vector<8x256xf32>
    %318 = arith.mulf %309, %291 : vector<8x256xf32>
    %319 = arith.addf %317, %318 : vector<8x256xf32>
    %320 = vector.broadcast %c6_i32 : i32 to vector<8x256xi32>
    %321 = vector.broadcast %292 : i32 to vector<8x256xi32>
    %322 = arith.select %14, %320, %321 : vector<8x256xi1>, vector<8x256xi32>
    %323 = vector.broadcast %7 : vector<8x1xi32> to vector<8x256xi32>
    %324 = arith.cmpi slt, %322, %323 : vector<8x256xi32>
    %cst_83 = arith.constant 0.000000e+00 : f32
    %325 = vector.broadcast %cst_83 : f32 to vector<8x256xf32>
    %326 = arith.select %324, %319, %325 : vector<8x256xi1>, vector<8x256xf32>
    %327 = vector.extract_strided_slice %326 {offsets = [0, 0], sizes = [8, 128], strides = [1, 1]} : vector<8x256xf32> to vector<8x128xf32>
    %328 = arith.index_cast %c6_i32 : i32 to index
    %c0_84 = arith.constant 0 : index
    %c0_85 = arith.constant 0 : index
    %329 = vector.load %arg8[%328, %c0_84, %c0_85] : memref<8x8x256xf32, #tpu.memory_space<vmem>>, vector<1x8x128xf32>
    %330 = vector.shape_cast %329 : vector<1x8x128xf32> to vector<8x128xf32>
    %331 = vector.shape_cast %327 : vector<8x128xf32> to vector<1x8x128xf32>
    tpu.vector_store %arg8[%328, %c0_84, %c0_85], %331 {strides = array<i32>} : memref<8x8x256xf32, #tpu.memory_space<vmem>>, vector<1x8x128xf32>,
    %332 = vector.extract_strided_slice %326 {offsets = [0, 128], sizes = [8, 128], strides = [1, 1]} : vector<8x256xf32> to vector<8x128xf32>
    %333 = arith.index_cast %292 : i32 to index
    %c0_86 = arith.constant 0 : index
    %c128_87 = arith.constant 128 : index
    %334 = vector.load %arg8[%333, %c0_86, %c128_87] : memref<8x8x256xf32, #tpu.memory_space<vmem>>, vector<1x8x128xf32>
    %335 = vector.shape_cast %334 : vector<1x8x128xf32> to vector<8x128xf32>
    %336 = vector.shape_cast %332 : vector<8x128xf32> to vector<1x8x128xf32>
    tpu.vector_store %arg8[%333, %c0_86, %c128_87], %336 {strides = array<i32>} : memref<8x8x256xf32, #tpu.memory_space<vmem>>, vector<1x8x128xf32>,
    %337 = arith.select %324, %319, %291 : vector<8x256xi1>, vector<8x256xf32>
    %c7_i32_88 = arith.constant 7 : i32
    %c7_i32_89 = arith.constant 7 : i32
    %338 = arith.subi %c7_i32_89, %c7_i32_88 : i32
    %c8_i32_90 = arith.constant 8 : i32
    %339 = arith.muli %c7_i32_88, %c8_i32_90 : i32
    %340 = tpu.assume_multiple %339, 8 : i32
    %341 = arith.index_cast %340 : i32 to index
    %c0_91 = arith.constant 0 : index
    %342 = vector.load %arg10[%341, %c0_91] : memref<64x768xf32, #tpu.memory_space<vmem>>, vector<8x768xf32>
    %343 = arith.truncf %337 : vector<8x256xf32> to vector<8x256xbf16>
    %cst_92 = arith.constant dense<0.000000e+00> : vector<8x768xf32>
    %344 = tpu.matmul %343, %8, %cst_92 {dimension_numbers = #tpu.dot_dimension_numbers<[1], [0], [0], [1], [0, 0, 1, 1], [], []>} : vector<8x256xbf16>, vector<256x768xbf16>, vector<8x768xf32> -> vector<8x768xf32>
    %345 = arith.addf %344, %11 : vector<8x768xf32>
    %346 = vector.extract_strided_slice %342 {offsets = [0, 0], sizes = [8, 512], strides = [1, 1]} : vector<8x768xf32> to vector<8x512xf32>
    %347 = vector.extract_strided_slice %345 {offsets = [0, 0], sizes = [8, 512], strides = [1, 1]} : vector<8x768xf32> to vector<8x512xf32>
    %348 = arith.addf %346, %347 : vector<8x512xf32>
    %349 = arith.negf %348 : vector<8x512xf32>
    %350 = math.exp %349 : vector<8x512xf32>
    %cst_93 = arith.constant 1.000000e+00 : f32
    %351 = vector.broadcast %cst_93 : f32 to vector<8x512xf32>
    %352 = arith.addf %351, %350 : vector<8x512xf32>
    %353 = arith.divf %351, %352 : vector<8x512xf32>
    %354 = vector.extract_strided_slice %353 {offsets = [0, 0], sizes = [8, 256], strides = [1, 1]} : vector<8x512xf32> to vector<8x256xf32>
    %355 = vector.extract_strided_slice %353 {offsets = [0, 256], sizes = [8, 256], strides = [1, 1]} : vector<8x512xf32> to vector<8x256xf32>
    %356 = vector.extract_strided_slice %342 {offsets = [0, 512], sizes = [8, 256], strides = [1, 1]} : vector<8x768xf32> to vector<8x256xf32>
    %357 = vector.extract_strided_slice %345 {offsets = [0, 512], sizes = [8, 256], strides = [1, 1]} : vector<8x768xf32> to vector<8x256xf32>
    %358 = arith.mulf %354, %357 : vector<8x256xf32>
    %359 = arith.addf %356, %358 : vector<8x256xf32>
    %360 = math.tanh %359 : vector<8x256xf32>
    %cst_94 = arith.constant 1.000000e+00 : f32
    %361 = vector.broadcast %cst_94 : f32 to vector<8x256xf32>
    %362 = arith.subf %361, %355 : vector<8x256xf32>
    %363 = arith.mulf %362, %360 : vector<8x256xf32>
    %364 = arith.mulf %355, %337 : vector<8x256xf32>
    %365 = arith.addf %363, %364 : vector<8x256xf32>
    %366 = vector.broadcast %c7_i32_88 : i32 to vector<8x256xi32>
    %367 = vector.broadcast %338 : i32 to vector<8x256xi32>
    %368 = arith.select %14, %366, %367 : vector<8x256xi1>, vector<8x256xi32>
    %369 = vector.broadcast %7 : vector<8x1xi32> to vector<8x256xi32>
    %370 = arith.cmpi slt, %368, %369 : vector<8x256xi32>
    %cst_95 = arith.constant 0.000000e+00 : f32
    %371 = vector.broadcast %cst_95 : f32 to vector<8x256xf32>
    %372 = arith.select %370, %365, %371 : vector<8x256xi1>, vector<8x256xf32>
    %373 = vector.extract_strided_slice %372 {offsets = [0, 0], sizes = [8, 128], strides = [1, 1]} : vector<8x256xf32> to vector<8x128xf32>
    %374 = arith.index_cast %c7_i32_88 : i32 to index
    %c0_96 = arith.constant 0 : index
    %c0_97 = arith.constant 0 : index
    %375 = vector.load %arg8[%374, %c0_96, %c0_97] : memref<8x8x256xf32, #tpu.memory_space<vmem>>, vector<1x8x128xf32>
    %376 = vector.shape_cast %375 : vector<1x8x128xf32> to vector<8x128xf32>
    %377 = vector.shape_cast %373 : vector<8x128xf32> to vector<1x8x128xf32>
    tpu.vector_store %arg8[%374, %c0_96, %c0_97], %377 {strides = array<i32>} : memref<8x8x256xf32, #tpu.memory_space<vmem>>, vector<1x8x128xf32>,
    %378 = vector.extract_strided_slice %372 {offsets = [0, 128], sizes = [8, 128], strides = [1, 1]} : vector<8x256xf32> to vector<8x128xf32>
    %379 = arith.index_cast %338 : i32 to index
    %c0_98 = arith.constant 0 : index
    %c128_99 = arith.constant 128 : index
    %380 = vector.load %arg8[%379, %c0_98, %c128_99] : memref<8x8x256xf32, #tpu.memory_space<vmem>>, vector<1x8x128xf32>
    %381 = vector.shape_cast %380 : vector<1x8x128xf32> to vector<8x128xf32>
    %382 = vector.shape_cast %378 : vector<8x128xf32> to vector<1x8x128xf32>
    tpu.vector_store %arg8[%379, %c0_98, %c128_99], %382 {strides = array<i32>} : memref<8x8x256xf32, #tpu.memory_space<vmem>>, vector<1x8x128xf32>,
    %383 = arith.select %370, %365, %337 : vector<8x256xi1>, vector<8x256xf32>
    %c8_i32_100 = arith.constant 8 : i32
    %c0_101 = arith.constant 0 : index
    %c0_102 = arith.constant 0 : index
    %384 = vector.load %arg6[%c0_101, %c0_102] : memref<256x32xf32, #tpu.memory_space<vmem>>, vector<256x32xf32>
    %cst_103 = arith.constant dense<0.000000e+00> : vector<8x32xf32>
    %385 = tpu.matmul %383, %384, %cst_103 {dimension_numbers = #tpu.dot_dimension_numbers<[1], [0], [0], [1], [0, 0, 1, 1], [], []>} : vector<8x256xf32>, vector<256x32xf32>, vector<8x32xf32> -> vector<8x32xf32>
    %c0_104 = arith.constant 0 : index
    %c0_105 = arith.constant 0 : index
    %386 = vector.load %arg7[%c0_104, %c0_105] : memref<1x32xf32, #tpu.memory_space<vmem>>, vector<1x32xf32>
    %387 = vector.broadcast %386 : vector<1x32xf32> to vector<8x32xf32>
    %388 = arith.addf %385, %387 : vector<8x32xf32>
    %389 = math.tanh %388 : vector<8x32xf32>
    %c0_106 = arith.constant 0 : index
    %c0_107 = arith.constant 0 : index
    %390 = vector.load %arg9[%c0_106, %c0_107] : memref<8x32xf32, #tpu.memory_space<vmem>>, vector<8x32xf32>
    tpu.vector_store %arg9[%c0_106, %c0_107], %389 {strides = array<i32>} : memref<8x32xf32, #tpu.memory_space<vmem>>, vector<8x32xf32>,
    return
  }
}

</mosaic_0001>

<bundles_post_ra>
// kernel: encoder_forward.1
= control target key start
LH: loop header
LB: loop body
LE: loop exit
PB: predicated region body
PF: predicated region fallthrough
CT: control target
= control target key end

     0   :  { %v6470_v1 = vmov 0   ;;  %vm164_vm0 = vcmask 261120   ;;  %s6460_s2 = inlined_call_operand.vmem [shape: bf16[32,768], index: 2, kind: input, shape index: {}]   ;;  %s6461_s0 = inlined_call_operand.vmem [shape: bf16[64,32], index: 0, kind: input, shape index: {}]   ;;  %s6462_s4 = inlined_call_operand.vmem [shape: bf16[256,768], index: 4, kind: input, shape index: {}]   ;;  %s6463_s1 = inlined_call_operand.vmem [shape: s32[8,1], index: 1, kind: input, shape index: {}]   ;;  %s6464_s3 = inlined_call_operand.vmem [shape: f32[1,768], index: 3, kind: input, shape index: {}]   ;;  %s6465_s5 = inlined_call_operand.vmem [shape: f32[1,768], index: 5, kind: input, shape index: {}]   ;;  %s6466_s8 = inlined_call_operand.vmem [shape: f32[8,8,256], index: 8, kind: output, shape index: {0}]   ;;  %s6467_s6 = inlined_call_operand.vmem [shape: f32[256,32], index: 6, kind: input, shape index: {}]   ;;  %s6468_s7 = inlined_call_operand.vmem [shape: f32[1,32], index: 7, kind: input, shape index: {}]   ;;  %s6469_s9 = inlined_call_operand.vmem [shape: f32[8,32], index: 9, kind: output, shape index: {1}]  }
   0x1   :  { %v2920_v0 = vld [vmem:[%s6460_s2 + $0x34] ss:$24 sps:$4 sm:$0xff]   ;;  %209 = vmatprep.mubr.bf16.mxu0 %v6470_v1  ;;  %282 = vmatprep.mubr.bf16.mxu1 %v6470_v1  ;;  %v2924_v3 = vld [vmem:[%s6460_s2 + $0x30] ss:$24 sps:$4 sm:$0xff]   ;;  %v2926_v5 = vld [vmem:[%s6460_s2 + $0x4] ss:$24 sps:$4 sm:$0xff]  }
   0x2   :  { %v2922_v2 = vld [vmem:[%s6460_s2 + $0x3c] ss:$24 sps:$4 sm:$0xff]   ;;  %2919 = vset.pattern.permute.xlu0 %v6470_v1  ;;  %189 = vmatprep.subr.bf16.mxu0 %v2920_v0  ;;  %v2925_v4 = vld [vmem:[%s6460_s2 + $0x38] ss:$24 sps:$4 sm:$0xff]   ;;  %v2928_v6 = vld [vmem:[%s6460_s2 + $0xc] ss:$24 sps:$4 sm:$0xff]  }
   0x3   :  { %262 = vmatprep.subr.bf16.mxu1 %v2922_v2  ;;  %190 = vmatpush1.bf16.msra.mxu0 %v2924_v3  ;;  %v2930_v7 = vld [vmem:[%s6460_s2] ss:$24 sps:$4 sm:$0xff]   ;;  %v3526_v10 = vld [vmem:[%s6462_s4 + $0x154] ss:$24 sps:$4 sm:$0xff]   ;;  %v3531_v11 = vld [vmem:[%s6462_s4 + $0x150] ss:$24 sps:$4 sm:$0xff]  }
   0x4   :  { %263 = vmatpush1.bf16.msra.mxu1 %v2925_v4  ;;  %191 = vmatprep.subr.bf16.mxu0 %v2926_v5  ;;  %v2931_v8 = vld [vmem:[%s6460_s2 + $0x8] ss:$24 sps:$4 sm:$0xff]   ;;  %v3537_v12 = vld [vmem:[%s6462_s4 + $0x124] ss:$24 sps:$4 sm:$0xff]   ;;  %v3553_v14 = vld [vmem:[%s6462_s4 + $0xf4] ss:$24 sps:$4 sm:$0xff]  }
   0x5   :  { %264 = vmatprep.subr.bf16.mxu1 %v2928_v6  ;;  %v3521_v9 = vld [vmem:[%s6461_s0] sm:$0xff]   ;;  %v3566_v17 = vld [vmem:[%s6461_s0 + $0x8] sm:$0xff]   ;;  %v3607_v24 = vld [vmem:[%s6461_s0 + $0x10] sm:$0xff]  }
   0x6   :  { %v3547_v13 = vld [vmem:[%s6462_s4 + $0x120] ss:$24 sps:$4 sm:$0xff]   ;;  %v2948_v16 = vld [vmem:[%s6460_s2 + $0x44] ss:$24 sps:$4 sm:$0xff]   ;;  %v3572_v18 = vld [vmem:[%s6462_s4 + $0xf0] ss:$24 sps:$4 sm:$0xff]  }
   0x7   :  { %192 = vmatpush1.bf16.msra.mxu0 %v2930_v7  ;;  %v2946_v15 = vld [vmem:[%s6460_s2 + $0x40] ss:$24 sps:$4 sm:$0xff]   ;;  %v3578_v19 = vld [vmem:[%s6462_s4 + $0xc4] ss:$24 sps:$4 sm:$0xff]   ;;  %v3590_v21 = vld [vmem:[%s6462_s4 + $0x94] ss:$24 sps:$4 sm:$0xff]  }
   0x8   :  { %265 = vmatpush1.bf16.msra.mxu1 %v2931_v8  ;;  %335 = vmatprep.subr.bf16.mxu0 %v2948_v16  ;;  %v3585_v20 = vld [vmem:[%s6462_s4 + $0xc0] ss:$24 sps:$4 sm:$0xff]   ;;  %v2960_v22 = vld [vmem:[%s6460_s2 + $0x10] ss:$24 sps:$4 sm:$0xff]   ;;  %v2962_v23 = vld [vmem:[%s6460_s2 + $0x14] ss:$24 sps:$4 sm:$0xff]  }
   0x9   :  { %1067 = vmatprep.subr.bf16.mxu1 %v3526_v10  ;;  %v3612_v25 = vld [vmem:[%s6462_s4 + $0x15c] ss:$24 sps:$4 sm:$0xff]   ;;  %v3618_v26 = vld [vmem:[%s6462_s4 + $0x90] ss:$24 sps:$4 sm:$0xff]   ;;  %v3635_v28 = vld [vmem:[%s6462_s4 + $0x60] ss:$24 sps:$4 sm:$0xff]  }
   0xa   :  { %2694 = vmatmul.mubr.msk.bf16.vlgmr.msra.gmra.mxu0 %vm164_vm0, %v3521_v9  ;;  %v3624_v27 = vld [vmem:[%s6462_s4 + $0x64] ss:$24 sps:$4 sm:$0xff]   ;;  %v3642_v29 = vld [vmem:[%s6462_s4 + $0x34] ss:$24 sps:$4 sm:$0xff]   ;;  %v3654_v31 = vld [vmem:[%s6462_s4 + $0x30] ss:$24 sps:$4 sm:$0xff]  }
   0xb   :  { %2698 = vmatmul.mubr.msk.bf16.vlgmr.msra.gmra.mxu1 %vm164_vm0, %v3521_v9  ;;  %219 = vmatprep.mubr.bf16.mxu0 %v6470_v1  ;;  %v3648_v30 = vld [vmem:[%s6461_s0 + $0x18] sm:$0xff]   ;;  %v3677_v34 = vld [vmem:[%s6462_s4 + $0x2d4] ss:$24 sps:$4 sm:$0xff]   ;;  %v3689_v36 = vld [vmem:[%s6462_s4 + $0x2d0] ss:$24 sps:$4 sm:$0xff]  }
   0xc   :  { %1068 = vmatpush1.bf16.msra.mxu1 %v3531_v11  ;;  %292 = vmatprep.mubr.bf16.mxu1 %v6470_v1  ;;  %v3660_v32 = vld [vmem:[%s6462_s4 + $0x4] ss:$24 sps:$4 sm:$0xff]   ;;  %v3670_v33 = vld [vmem:[%s6462_s4] ss:$24 sps:$4 sm:$0xff]   ;;  %v3726_v42 = vld [vmem:[%s6462_s4 + $0x274] ss:$24 sps:$4 sm:$0xff]  }
   0xd   :  { %1069 = vmatprep.subr.bf16.mxu1 %v3537_v12  ;;  %336 = vmatpush1.bf16.msra.mxu0 %v2946_v15  ;;  %v3683_v35 = vld [vmem:[%s6462_s4 + $0x158] ss:$24 sps:$4 sm:$0xff]   ;;  %v3694_v37 = vld [vmem:[%s6462_s4 + $0x12c] ss:$24 sps:$4 sm:$0xff]   ;;  %v3707_v39 = vld [vmem:[%s6462_s4 + $0x128] ss:$24 sps:$4 sm:$0xff]  }
   0xe   :  { %337 = vmatprep.subr.bf16.mxu0 %v2962_v23  ;;  %v3700_v38 = vld [vmem:[%s6462_s4 + $0x2a4] ss:$24 sps:$4 sm:$0xff]   ;;  %v3712_v40 = vld [vmem:[%s6462_s4 + $0x2a0] ss:$24 sps:$4 sm:$0xff]   ;;  %v3737_v44 = vld [vmem:[%s6462_s4 + $0x270] ss:$24 sps:$4 sm:$0xff]  }
   0xf   :  { %v3719_v41 = vld [vmem:[%s6462_s4 + $0xfc] ss:$24 sps:$4 sm:$0xff]   ;;  %v3732_v43 = vld [vmem:[%s6462_s4 + $0xf8] ss:$24 sps:$4 sm:$0xff]   ;;  %v3744_v45 = vld [vmem:[%s6462_s4 + $0xcc] ss:$24 sps:$4 sm:$0xff]  }
  0x10   :  { %1070 = vmatpush1.bf16.msra.mxu1 %v3547_v13  ;;  %v3751_v46 = vld [vmem:[%s6462_s4 + $0x244] ss:$24 sps:$4 sm:$0xff]   ;;  %v3756_v47 = vld [vmem:[%s6462_s4 + $0xc8] ss:$24 sps:$4 sm:$0xff]   ;;  %v3777_v50 = vld [vmem:[%s6462_s4 + $0x214] ss:$24 sps:$4 sm:$0xff]  }
  0x11   :  { %1071 = vmatprep.subr.bf16.mxu1 %v3553_v14  ;;  %338 = vmatpush1.bf16.msra.mxu0 %v2960_v22  ;;  %v3761_v48 = vld [vmem:[%s6462_s4 + $0x240] ss:$24 sps:$4 sm:$0xff]   ;;  %v3770_v49 = vld [vmem:[%s6462_s4 + $0x9c] ss:$24 sps:$4 sm:$0xff]   ;;  %v3788_v52 = vld [vmem:[%s6462_s4 + $0x210] ss:$24 sps:$4 sm:$0xff]  }
  0x12   :  { %2695 = vmatmul.mubr.msk.bf16.gmra.mxu0 %vm164_vm0, %v3566_v17  ;;  %1108 = vmatprep.subr.bf16.mxu0 %v3612_v25  ;;  %v3783_v51 = vld [vmem:[%s6462_s4 + $0x98] ss:$24 sps:$4 sm:$0xff]   ;;  %v3795_v53 = vld [vmem:[%s6462_s4 + $0x6c] ss:$24 sps:$4 sm:$0xff]   ;;  %v3807_v55 = vld [vmem:[%s6462_s4 + $0x68] ss:$24 sps:$4 sm:$0xff]  }
  0x13   :  { %2699 = vmatmul.mubr.msk.bf16.gmra.mxu1 %vm164_vm0, %v3566_v17  ;;  %229 = vmatprep.mubr.bf16.mxu0 %v6470_v1  ;;  %v3802_v54 = vld [vmem:[%s6462_s4 + $0x1e4] ss:$24 sps:$4 sm:$0xff]   ;;  %v3812_v56 = vld [vmem:[%s6462_s4 + $0x1e0] ss:$24 sps:$4 sm:$0xff]   ;;  %v3828_v58 = vld [vmem:[%s6462_s4 + $0x1b4] ss:$24 sps:$4 sm:$0xff]  }
  0x14   :  { %1072 = vmatpush1.bf16.msra.mxu1 %v3572_v18  ;;  %302 = vmatprep.mubr.bf16.mxu1 %v6470_v1  ;;  %v3821_v57 = vld [vmem:[%s6462_s4 + $0x3c] ss:$24 sps:$4 sm:$0xff]   ;;  %v3834_v59 = vld [vmem:[%s6462_s4 + $0x38] ss:$24 sps:$4 sm:$0xff]   ;;  %v3846_v61 = vld [vmem:[%s6462_s4 + $0xc] ss:$24 sps:$4 sm:$0xff]  }
  0x15   :  { %1073 = vmatprep.subr.bf16.mxu1 %v3578_v19  ;;  %v3839_v60 = vld [vmem:[%s6462_s4 + $0x1b0] ss:$24 sps:$4 sm:$0xff]   ;;  %v3853_v62 = vld [vmem:[%s6462_s4 + $0x184] ss:$24 sps:$4 sm:$0xff]   ;;  %v3863_v0 = vld [vmem:[%s6462_s4 + $0x180] ss:$24 sps:$4 sm:$0xff]  }
  0x16   :  { %v3858_v63 = vld [vmem:[%s6462_s4 + $0x8] ss:$24 sps:$4 sm:$0xff]   ;;  %v3872_v2 = vld [vmem:[%s6462_s4 + $0x2dc] ss:$24 sps:$4 sm:$0xff]   ;;  %v3885_v4 = vld [vmem:[%s6462_s4 + $0x2d8] ss:$24 sps:$4 sm:$0xff]  }
  0x17   :  { %v3879_v3 = vld [vmem:[%s6462_s4 + $0x164] ss:$24 sps:$4 sm:$0xff]   ;;  %6662 = vst [vmem:[#allocation3_spill] sm:$0xff] %v3885_v4  ;;  %v3890_v5 = vld [vmem:[%s6462_s4 + $0x160] ss:$24 sps:$4 sm:$0xff]  }
  0x18   :  { %1074 = vmatpush1.bf16.msra.mxu1 %v3585_v20  ;;  %6663 = vst [vmem:[#allocation4_spill] sm:$0xff] %v3890_v5  ;;  %v3897_v6 = vld [vmem:[%s6462_s4 + $0x2ac] ss:$24 sps:$4 sm:$0xff]   ;;  %v3912_v8 = vld [vmem:[%s6462_s4 + $0x2a8] ss:$24 sps:$4 sm:$0xff]  }
  0x19   :  { %1075 = vmatprep.subr.bf16.mxu1 %v3590_v21  ;;  %6664 = vst [vmem:[#allocation5_spill] sm:$0xff] %v3897_v6  ;;  %v3904_v7 = vld [vmem:[%s6462_s4 + $0x134] ss:$24 sps:$4 sm:$0xff]   ;;  %6666 = vst [vmem:[#allocation7_spill] sm:$0xff] %v3912_v8  ;;  %v3929_v16 = vld [vmem:[%s6462_s4 + $0x104] ss:$24 sps:$4 sm:$0xff]  }
  0x1a   :  { %2696 = vmatmul.mubr.msk.bf16.gmra.mxu0 %vm164_vm0, %v3607_v24  ;;  %6665 = vst [vmem:[#allocation6_spill] sm:$0xff] %v3904_v7  ;;  %v3924_v15 = vld [vmem:[%s6462_s4 + $0x27c] ss:$24 sps:$4 sm:$0xff]   ;;  %6669 = vst [vmem:[#allocation10_spill] sm:$0xff] %v3929_v16  ;;  %v3942_v22 = vld [vmem:[%s6462_s4 + $0x100] ss:$24 sps:$4 sm:$0xff]  }
  0x1b   :  { %2700 = vmatmul.mubr.msk.bf16.gmra.mxu1 %vm164_vm0, %v3607_v24  ;;  %239 = vmatprep.mubr.bf16.mxu0 %v6470_v1  ;;  %6668 = vst [vmem:[#allocation9_spill] sm:$0xff] %v3924_v15  ;;  %6671 = vst [vmem:[#allocation12_spill] sm:$0xff] %v3942_v22  ;;  %v3949_v23 = vld [vmem:[%s6462_s4 + $0x24c] ss:$24 sps:$4 sm:$0xff]  }
  0x1c   :  { %1076 = vmatpush1.bf16.msra.mxu1 %v3618_v26  ;;  %312 = vmatprep.mubr.bf16.mxu1 %v6470_v1  ;;  %6672 = vst [vmem:[#allocation13_spill] sm:$0xff] %v3949_v23 }
  0x1d   :  { %1077 = vmatprep.subr.bf16.mxu1 %v3624_v27 }
  0x20   :  { %1078 = vmatpush1.bf16.msra.mxu1 %v3635_v28 }
  0x21   :  { %1079 = vmatprep.subr.bf16.mxu1 %v3642_v29 }
  0x22   :  { %2697 = vmatmul.mubr.msk.bf16.gmra.mxu0 %vm164_vm0, %v3648_v30 }
  0x23   :  { %2701 = vmatmul.mubr.msk.bf16.gmra.mxu1 %vm164_vm0, %v3648_v30  ;;  %355 = vmatprep.mubr.bf16.mxu0 %v6470_v1 }
  0x24   :  { %1080 = vmatpush1.bf16.msra.mxu1 %v3654_v31  ;;  %1099 = vmatprep.mubr.bf16.mxu1 %v6470_v1 }
  0x25   :  { %1081 = vmatprep.subr.bf16.mxu1 %v3660_v32 }
  0x28   :  { %1082 = vmatpush1.bf16.msra.mxu1 %v3670_v33 }
  0x29   :  { %1083 = vmatprep.subr.bf16.mxu1 %v3677_v34 }
  0x2a   :  { %2702 = vmatmul.mubr.msk.bf16.vlgmr.msra.gmra.mxu0 %vm164_vm0, %v3521_v9  ;;  %v3917_v9 = vld [vmem:[%s6462_s4 + $0x130] ss:$24 sps:$4 sm:$0xff]  }
  0x2b   :  { %1109 = vmatpush1.bf16.msra.mxu0 %v3683_v35  ;;  %365 = vmatprep.mubr.bf16.mxu0 %v6470_v1  ;;  %6667 = vst [vmem:[#allocation8_spill] sm:$0xff] %v3917_v9 }
  0x2c   :  { %1084 = vmatpush2.bf16.msra.mxu1 %v3689_v36  ;;  %1110 = vmatprep.subr.bf16.mxu0 %v3694_v37 }
  0x2d   :  { %1085 = vmatprep.subr.bf16.mxu1 %v3700_v38 }
  0x2f   :  { %1111 = vmatpush1.bf16.msra.mxu0 %v3707_v39 }
  0x30   :  { %1086 = vmatpush2.bf16.msra.mxu1 %v3712_v40  ;;  %1112 = vmatprep.subr.bf16.mxu0 %v3719_v41 }
  0x31   :  { %1087 = vmatprep.subr.bf16.mxu1 %v3726_v42 }
  0x32   :  { %2703 = vmatmul.mubr.msk.bf16.gmra.mxu0 %vm164_vm0, %v3566_v17  ;;  %v3937_v17 = vld [vmem:[%s6462_s4 + $0x278] ss:$24 sps:$4 sm:$0xff]  }
  0x33   :  { %1113 = vmatpush1.bf16.msra.mxu0 %v3732_v43  ;;  %375 = vmatprep.mubr.bf16.mxu0 %v6470_v1  ;;  %6670 = vst [vmem:[#allocation11_spill] sm:$0xff] %v3937_v17 }
  0x34   :  { %1088 = vmatpush2.bf16.msra.mxu1 %v3737_v44  ;;  %1114 = vmatprep.subr.bf16.mxu0 %v3744_v45 }
  0x35   :  { %1089 = vmatprep.subr.bf16.mxu1 %v3751_v46 }
  0x37   :  { %1115 = vmatpush1.bf16.msra.mxu0 %v3756_v47 }
  0x38   :  { %1090 = vmatpush2.bf16.msra.mxu1 %v3761_v48  ;;  %1116 = vmatprep.subr.bf16.mxu0 %v3770_v49 }
  0x39   :  { %1091 = vmatprep.subr.bf16.mxu1 %v3777_v50 }
  0x3a   :  { %2704 = vmatmul.mubr.msk.bf16.gmra.mxu0 %vm164_vm0, %v3607_v24  ;;  %v3954_v24 = vld [vmem:[%s6462_s4 + $0xd4] ss:$24 sps:$4 sm:$0xff]  }
  0x3b   :  { %1117 = vmatpush1.bf16.msra.mxu0 %v3783_v51  ;;  %385 = vmatprep.mubr.bf16.mxu0 %v6470_v1  ;;  %6673 = vst [vmem:[#allocation14_spill] sm:$0xff] %v3954_v24 }
  0x3c   :  { %1092 = vmatpush2.bf16.msra.mxu1 %v3788_v52  ;;  %1118 = vmatprep.subr.bf16.mxu0 %v3795_v53 }
  0x3d   :  { %1093 = vmatprep.subr.bf16.mxu1 %v3802_v54 }
  0x3f   :  { %1119 = vmatpush1.bf16.msra.mxu0 %v3807_v55 }
  0x40   :  { %1094 = vmatpush2.bf16.msra.mxu1 %v3812_v56  ;;  %1120 = vmatprep.subr.bf16.mxu0 %v3821_v57 }
  0x41   :  { %1095 = vmatprep.subr.bf16.mxu1 %v3828_v58 }
  0x42   :  { %2705 = vmatmul.mubr.msk.bf16.gmra.mxu0 %vm164_vm0, %v3648_v30  ;;  %v3961_v30 = vld [vmem:[%s6462_s4 + $0x248] ss:$24 sps:$4 sm:$0xff]  }
  0x43   :  { %1121 = vmatpush1.bf16.msra.mxu0 %v3834_v59  ;;  %1140 = vmatprep.mubr.bf16.mxu0 %v6470_v1  ;;  %6674 = vst [vmem:[#allocation15_spill] sm:$0xff] %v3961_v30 }
  0x44   :  { %1096 = vmatpush2.bf16.msra.mxu1 %v3839_v60  ;;  %1122 = vmatprep.subr.bf16.mxu0 %v3846_v61 }
  0x45   :  { %1097 = vmatprep.subr.bf16.mxu1 %v3853_v62 }
  0x47   :  { %1123 = vmatpush1.bf16.msra.mxu0 %v3858_v63 }
  0x48   :  { %1098 = vmatpush2.bf16.msra.mxu1 %v3863_v0  ;;  %1124 = vmatprep.subr.bf16.mxu0 %v3872_v2 }
  0x49   :  { %1149 = vmatprep.subr.bf16.mxu1 %v3879_v3 }
  0x4b   :  { %1100 = vmatmul.mubr.bf16.vlgmr.msra.gmra.mxu1 %v6470_v1  ;;  %1125 = vmatpush2.bf16.msra.mxu0 %v3885_v4 }
  0x4c   :  { %1150 = vmatpush1.bf16.msra.mxu1 %v3890_v5  ;;  %1126 = vmatprep.subr.bf16.mxu0 %v3897_v6  ;;  %v4009_v5 = vld [vmem:[%s6462_s4 + $0x1e8] ss:$24 sps:$4 sm:$0xff]  }
  0x4d   :  { %1151 = vmatprep.subr.bf16.mxu1 %v3904_v7  ;;  %1181 = vmatprep.mubr.bf16.mxu1 %v6470_v1  ;;  %v3966_v1 = vld [vmem:[%s6462_s4 + $0xd0] ss:$24 sps:$4 sm:$0xff]   ;;  %v3997_v7 = vld [vmem:[%s6462_s4 + $0x1ec] ss:$24 sps:$4 sm:$0xff]   ;;  %6682 = vst [vmem:[#allocation23_spill] sm:$0xff] %v4009_v5 }
  0x4e   :  { %6675 = vst [vmem:[#allocation16_spill] sm:$0xff] %v3966_v1  ;;  %6680 = vst [vmem:[#allocation21_spill] sm:$0xff] %v3997_v7 }
  0x4f   :  { %1127 = vmatpush2.bf16.msra.mxu0 %v3912_v8 }
  0x50   :  { %1152 = vmatpush1.bf16.msra.mxu1 %v3917_v9  ;;  %1128 = vmatprep.subr.bf16.mxu0 %v3924_v15  ;;  %v3985_v9 = vld [vmem:[%s6462_s4 + $0x218] ss:$24 sps:$4 sm:$0xff]  }
  0x51   :  { %1153 = vmatprep.subr.bf16.mxu1 %v3929_v16  ;;  %v3973_v16 = vld [vmem:[%s6462_s4 + $0x21c] ss:$24 sps:$4 sm:$0xff]   ;;  %6678 = vst [vmem:[#allocation19_spill] sm:$0xff] %v3985_v9 }
  0x52   :  { %6676 = vst [vmem:[#allocation17_spill] sm:$0xff] %v3973_v16 }
  0x53   :  { %1129 = vmatpush2.bf16.msra.mxu0 %v3937_v17 }
  0x54   :  { %1154 = vmatpush1.bf16.msra.mxu1 %v3942_v22  ;;  %1130 = vmatprep.subr.bf16.mxu0 %v3949_v23  ;;  %v3978_v22 = vld [vmem:[%s6462_s4 + $0xa4] ss:$24 sps:$4 sm:$0xff]  }
  0x55   :  { %1155 = vmatprep.subr.bf16.mxu1 %v3954_v24  ;;  %6677 = vst [vmem:[#allocation18_spill] sm:$0xff] %v3978_v22  ;;  %v3990_v24 = vld [vmem:[%s6462_s4 + $0xa0] ss:$24 sps:$4 sm:$0xff]  }
  0x56   :  { %6679 = vst [vmem:[#allocation20_spill] sm:$0xff] %v3990_v24 }
  0x57   :  { %1131 = vmatpush2.bf16.msra.mxu0 %v3961_v30 }
  0x58   :  { %1156 = vmatpush1.bf16.msra.mxu1 %v3966_v1  ;;  %1132 = vmatprep.subr.bf16.mxu0 %v3973_v16  ;;  %v4002_v1 = vld [vmem:[%s6462_s4 + $0x74] ss:$24 sps:$4 sm:$0xff]   ;;  %v444_v16 = vld [vmem:[%s6463_s1] sm:$0xff] }
  0x59   :  { %1157 = vmatprep.subr.bf16.mxu1 %v3978_v22  ;;  %6681 = vst [vmem:[#allocation22_spill] sm:$0xff] %v4002_v1  ;;  %v4014_v22 = vld [vmem:[%s6462_s4 + $0x70] ss:$24 sps:$4 sm:$0xff]   ;;  %1235 = vperm.xlu0 %2919, %v444_v16   ;;  %v4072_v16 = vld [vmem:[%s6462_s4 + $0x2e4] ss:$24 sps:$4 sm:$0xff]  }
  0x5a   :  { %6683 = vst [vmem:[#allocation24_spill] sm:$0xff] %v4014_v22  ;;  %6692 = vst [vmem:[#allocation33_spill] sm:$0xff] %v4072_v16 }
  0x5b   :  { %1133 = vmatpush2.bf16.msra.mxu0 %v3985_v9  ;;  %v4021_v9 = vld [vmem:[%s6462_s4 + $0x1bc] ss:$24 sps:$4 sm:$0xff]  }
  0x5c   :  { %1158 = vmatpush1.bf16.msra.mxu1 %v3990_v24  ;;  %1134 = vmatprep.subr.bf16.mxu0 %v3997_v7  ;;  %6684 = vst [vmem:[#allocation25_spill] sm:$0xff] %v4021_v9  ;;  %v4026_v24 = vld [vmem:[%s6462_s4 + $0x44] ss:$24 sps:$4 sm:$0xff]   ;;  %v4041_v7 = vld [vmem:[%s6462_s4 + $0x40] ss:$24 sps:$4 sm:$0xff]  }
  0x5d   :  { %1159 = vmatprep.subr.bf16.mxu1 %v4002_v1  ;;  %6685 = vst [vmem:[#allocation26_spill] sm:$0xff] %v4026_v24  ;;  %v4036_v1 = vld [vmem:[%s6462_s4 + $0x1b8] ss:$24 sps:$4 sm:$0xff]   ;;  %6687 = vst [vmem:[#allocation28_spill] sm:$0xff] %v4041_v7 }
  0x5e   :  { %6686 = vst [vmem:[#allocation27_spill] sm:$0xff] %v4036_v1 }
  0x5f   :  { %1135 = vmatpush2.bf16.msra.mxu0 %v4009_v5  ;;  %v4048_v5 = vld [vmem:[%s6462_s4 + $0x18c] ss:$24 sps:$4 sm:$0xff]  }
  0x60   :  { %1160 = vmatpush1.bf16.msra.mxu1 %v4014_v22  ;;  %1136 = vmatprep.subr.bf16.mxu0 %v4021_v9  ;;  %6688 = vst [vmem:[#allocation29_spill] sm:$0xff] %v4048_v5  ;;  %v4053_v22 = vld [vmem:[%s6462_s4 + $0x14] ss:$24 sps:$4 sm:$0xff]   ;;  %v4060_v9 = vld [vmem:[%s6462_s4 + $0x188] ss:$24 sps:$4 sm:$0xff]  }
  0x61   :  { %1161 = vmatprep.subr.bf16.mxu1 %v4026_v24  ;;  %6689 = vst [vmem:[#allocation30_spill] sm:$0xff] %v4053_v22  ;;  %6690 = vst [vmem:[#allocation31_spill] sm:$0xff] %v4060_v9  ;;  %v4065_v24 = vld [vmem:[%s6462_s4 + $0x10] ss:$24 sps:$4 sm:$0xff]  }
  0x62   :  { %6691 = vst [vmem:[#allocation32_spill] sm:$0xff] %v4065_v24 }
  0x63   :  { %1137 = vmatpush2.bf16.msra.mxu0 %v4036_v1 }
  0x64   :  { %1162 = vmatpush1.bf16.msra.mxu1 %v4041_v7  ;;  %1138 = vmatprep.subr.bf16.mxu0 %v4048_v5  ;;  %v4079_v7 = vld [vmem:[%s6462_s4 + $0x2e0] ss:$24 sps:$4 sm:$0xff]   ;;  %v6695_v5 = vmov 0  }
  0x65   :  { %1163 = vmatprep.subr.bf16.mxu1 %v4053_v22  ;;  %6693 = vst [vmem:[#allocation34_spill] sm:$0xff] %v4079_v7  ;;  %v4085_v22 = vld [vmem:[%s6462_s4 + $0x2b4] ss:$24 sps:$4 sm:$0xff]  }
  0x66   :  { %6694 = vst [vmem:[#allocation35_spill] sm:$0xff] %v4085_v22 }
  0x67   :  { %1139 = vmatpush2.bf16.msra.mxu0 %v4060_v9 }
  0x68   :  { %1164 = vmatpush1.bf16.msra.mxu1 %v4065_v24  ;;  %1255 = vmatprep.subr.bf16.mxu0 %v3526_v10  ;;  %v4093_v24 = vld [vmem:[%s6462_s4 + $0x2b0] ss:$24 sps:$4 sm:$0xff]  }
  0x69   :  { %1165 = vmatprep.subr.bf16.mxu1 %v4072_v16  ;;  %v4100_v16 = vld [vmem:[%s6462_s4 + $0x284] ss:$24 sps:$4 sm:$0xff]  }
  0x6a   :  { %1141 = vmatmul.mubr.bf16.vlgmr.msra.gmra.mxu0 %v6695_v5 }
  0x6b   :  { %1256 = vmatpush1.bf16.msra.mxu0 %v3531_v11  ;;  %v4114_v11 = vld [vmem:[%s6462_s4 + $0x254] ss:$24 sps:$4 sm:$0xff]  }
  0x6c   :  { %1166 = vmatpush2.bf16.msra.mxu1 %v4079_v7  ;;  %1257 = vmatprep.subr.bf16.mxu0 %v3537_v12  ;;  %v4107_v7 = vld [vmem:[%s6462_s4 + $0x280] ss:$24 sps:$4 sm:$0xff]   ;;  %v4121_v12 = vld [vmem:[%s6462_s4 + $0x250] ss:$24 sps:$4 sm:$0xff]  }
  0x6d   :  { %1167 = vmatprep.subr.bf16.mxu1 %v4085_v22 }
  0x6f   :  { %1258 = vmatpush1.bf16.msra.mxu0 %v3547_v13  ;;  %v4128_v13 = vld [vmem:[%s6462_s4 + $0x224] ss:$24 sps:$4 sm:$0xff]  }
  0x70   :  { %1168 = vmatpush2.bf16.msra.mxu1 %v4093_v24  ;;  %1259 = vmatprep.subr.bf16.mxu0 %v3553_v14  ;;  %v4135_v14 = vld [vmem:[%s6462_s4 + $0x220] ss:$24 sps:$4 sm:$0xff]  }
  0x71   :  { %1169 = vmatprep.subr.bf16.mxu1 %v4100_v16 }
  0x73   :  { %1260 = vmatpush1.bf16.msra.mxu0 %v3572_v18  ;;  %v4142_v18 = vld [vmem:[%s6462_s4 + $0x1f4] ss:$24 sps:$4 sm:$0xff]  }
  0x74   :  { %1170 = vmatpush2.bf16.msra.mxu1 %v4107_v7  ;;  %1261 = vmatprep.subr.bf16.mxu0 %v3578_v19  ;;  %v4149_v19 = vld [vmem:[%s6462_s4 + $0x1f0] ss:$24 sps:$4 sm:$0xff]  }
  0x75   :  { %1171 = vmatprep.subr.bf16.mxu1 %v4114_v11 }
  0x77   :  { %1262 = vmatpush1.bf16.msra.mxu0 %v3585_v20  ;;  %v4156_v20 = vld [vmem:[%s6462_s4 + $0x1c4] ss:$24 sps:$4 sm:$0xff]  }
  0x78   :  { %1172 = vmatpush2.bf16.msra.mxu1 %v4121_v12  ;;  %1263 = vmatprep.subr.bf16.mxu0 %v3590_v21  ;;  %v4163_v21 = vld [vmem:[%s6462_s4 + $0x1c0] ss:$24 sps:$4 sm:$0xff]  }
  0x79   :  { %1173 = vmatprep.subr.bf16.mxu1 %v4128_v13 }
  0x7b   :  { %1264 = vmatpush1.bf16.msra.mxu0 %v3618_v26  ;;  %v4170_v26 = vld [vmem:[%s6462_s4 + $0x194] ss:$24 sps:$4 sm:$0xff]  }
  0x7c   :  { %1174 = vmatpush2.bf16.msra.mxu1 %v4135_v14  ;;  %1265 = vmatprep.subr.bf16.mxu0 %v3624_v27  ;;  %v4177_v27 = vld [vmem:[%s6462_s4 + $0x190] ss:$24 sps:$4 sm:$0xff]  }
  0x7d   :  { %1175 = vmatprep.subr.bf16.mxu1 %v4142_v18 }
  0x7f   :  { %1266 = vmatpush1.bf16.msra.mxu0 %v3635_v28  ;;  %v6697_v28 = vld [vmem:[#allocation19_spill] sm:$0xff] }
  0x80   :  { %1176 = vmatpush2.bf16.msra.mxu1 %v4149_v19  ;;  %1267 = vmatprep.subr.bf16.mxu0 %v3642_v29  ;;  %v6698_v29 = vld [vmem:[#allocation21_spill] sm:$0xff] }
  0x81   :  { %1177 = vmatprep.subr.bf16.mxu1 %v4156_v20 }
  0x83   :  { %1268 = vmatpush1.bf16.msra.mxu0 %v3654_v31  ;;  %v6699_v31 = vld [vmem:[#allocation23_spill] sm:$0xff] }
  0x84   :  { %1178 = vmatpush2.bf16.msra.mxu1 %v4163_v21  ;;  %1269 = vmatprep.subr.bf16.mxu0 %v3660_v32  ;;  %v6700_v32 = vld [vmem:[#allocation25_spill] sm:$0xff] }
  0x85   :  { %1179 = vmatprep.subr.bf16.mxu1 %v4170_v26 }
  0x87   :  { %1270 = vmatpush1.bf16.msra.mxu0 %v3670_v33  ;;  %v54_v33 = vlaneseq }
  0x88   :  { %1180 = vmatpush2.bf16.msra.mxu1 %v4177_v27  ;;  %1271 = vmatprep.subr.bf16.mxu0 %v3677_v34  ;;  %v6701_v34 = vld [vmem:[#allocation29_spill] sm:$0xff] }
  0x89   :  { %1296 = vmatprep.subr.bf16.mxu1 %v3612_v25  ;;  %v6696_v25 = vld [vmem:[#allocation17_spill] sm:$0xff] }
  0x8b   :  { %1182 = vmatmul.mubr.bf16.vlgmr.msra.gmra.mxu1 %v6695_v5  ;;  %1272 = vmatpush2.bf16.msra.mxu0 %v3689_v36 }
  0x8c   :  { %1297 = vmatpush1.bf16.msra.mxu1 %v3683_v35  ;;  %1273 = vmatprep.subr.bf16.mxu0 %v3700_v38  ;;  %v4233_v35 = vshrl.u32 %v54_v33, 7 }
  0x8d   :  { %1298 = vmatprep.subr.bf16.mxu1 %v3694_v37 }
  0x8e   :  { %v6507_v36 = vsub.s32 0, %v4233_v35  ;;  %v6509_v37 = vsub.s32 2, %v4233_v35  ;;  %v6510_v38 = vsub.s32 1, %v4233_v35 }
  0x8f   :  { %1274 = vmatpush2.bf16.msra.mxu0 %v3712_v40 }
  0x90   :  { %1299 = vmatpush1.bf16.msra.mxu1 %v3707_v39  ;;  %1275 = vmatprep.subr.bf16.mxu0 %v3726_v42  ;;  %v4243_v39 = vld [vmem:[%s6464_s3] sm:$0x3f] }
  0x91   :  { %1300 = vmatprep.subr.bf16.mxu1 %v3719_v41  ;;  %v4267_v5 = vrot.slane %v4243_v39, %v6510_v38 }
  0x93   :  { %1276 = vmatpush2.bf16.msra.mxu0 %v3737_v44 }
  0x94   :  { %1301 = vmatpush1.bf16.msra.mxu1 %v3732_v43  ;;  %1277 = vmatprep.subr.bf16.mxu0 %v3751_v46 }
  0x95   :  { %1302 = vmatprep.subr.bf16.mxu1 %v3744_v45  ;;  %v4253_v45 = vrot.slane %v4243_v39, %v6507_v36 }
  0x97   :  { %1278 = vmatpush2.bf16.msra.mxu0 %v3761_v48 }
  0x98   :  { %1303 = vmatpush1.bf16.msra.mxu1 %v3756_v47  ;;  %1279 = vmatprep.subr.bf16.mxu0 %v3777_v50 }
  0x99   :  { %1304 = vmatprep.subr.bf16.mxu1 %v3770_v49  ;;  %v4262_v49 = vrot.slane %v4243_v39, %v6509_v37 }
  0x9b   :  { %1280 = vmatpush2.bf16.msra.mxu0 %v3788_v52 }
  0x9c   :  { %1305 = vmatpush1.bf16.msra.mxu1 %v3783_v51  ;;  %1281 = vmatprep.subr.bf16.mxu0 %v3802_v54 }
  0x9d   :  { %1306 = vmatprep.subr.bf16.mxu1 %v3795_v53 }
  0x9f   :  { %1282 = vmatpush2.bf16.msra.mxu0 %v3812_v56 }
  0xa0   :  { %1307 = vmatpush1.bf16.msra.mxu1 %v3807_v55  ;;  %1283 = vmatprep.subr.bf16.mxu0 %v3828_v58 }
  0xa1   :  { %1308 = vmatprep.subr.bf16.mxu1 %v3821_v57 }
  0xa3   :  { %1284 = vmatpush2.bf16.msra.mxu0 %v3839_v60 }
  0xa4   :  { %1309 = vmatpush1.bf16.msra.mxu1 %v3834_v59  ;;  %1285 = vmatprep.subr.bf16.mxu0 %v3853_v62 }
  0xa5   :  { %1310 = vmatprep.subr.bf16.mxu1 %v3846_v61 }
  0xa7   :  { %1286 = vmatpush2.bf16.msra.mxu0 %v3863_v0 }
  0xa8   :  { %1311 = vmatpush1.bf16.msra.mxu1 %v3858_v63  ;;  %1337 = vmatprep.subr.bf16.mxu0 %v3879_v3 }
  0xa9   :  { %1312 = vmatprep.subr.bf16.mxu1 %v3872_v2 }
  0xac   :  { %1313 = vmatpush2.bf16.msra.mxu1 %v3885_v4 }
  0xad   :  { %1314 = vmatprep.subr.bf16.mxu1 %v3897_v6 }
  0xb0   :  { %1315 = vmatpush2.bf16.msra.mxu1 %v3912_v8 }
  0xb1   :  { %1316 = vmatprep.subr.bf16.mxu1 %v3924_v15 }
  0xb4   :  { %1317 = vmatpush2.bf16.msra.mxu1 %v3937_v17 }
  0xb5   :  { %1318 = vmatprep.subr.bf16.mxu1 %v3949_v23 }
  0xb8   :  { %1319 = vmatpush2.bf16.msra.mxu1 %v3961_v30 }
  0xb9   :  { %1320 = vmatprep.subr.bf16.mxu1 %v6696_v25 }
  0xbc   :  { %1321 = vmatpush2.bf16.msra.mxu1 %v6697_v28 }
  0xbd   :  { %1322 = vmatprep.subr.bf16.mxu1 %v6698_v29 }
  0xc0   :  { %1323 = vmatpush2.bf16.msra.mxu1 %v6699_v31 }
  0xc1   :  { %1324 = vmatprep.subr.bf16.mxu1 %v6700_v32 }
  0xc4   :  { %1325 = vmatpush2.bf16.msra.mxu1 %v4036_v1 }
  0xc5   :  { %1326 = vmatprep.subr.bf16.mxu1 %v6701_v34 }
  0xc8   :  { %1327 = vmatpush2.bf16.msra.mxu1 %v4060_v9  ;;  %v6702_v9 = vsub.s32 3, %v4233_v35 }
  0xc9   :  { %1443 = vmatprep.subr.bf16.mxu1 %v3526_v10 }
  0xca   :  { %v4247_v41 = vpop.f32.mrf.mxu0  ;;  %v4272_v36 = vrot.slane %v4243_v39, %v6702_v9 }
  0xcb   :  { %v4245_v40 = vpop.f32.mrf.mxu1 }
  0xcc   :  { %v4257_v47 = vpop.f32.mrf.mxu0 }
  0xcd   :  { %v4255_v10 = vpop.f32.mrf.mxu1 }
  0xce   :  { %v215_v43 = vpop.f32.mrf.mxu0 }
  0xcf   :  { %v288_v33 = vpop.f32.mrf.mxu1  ;;  %v4278_v1 = vadd.f32 %v215_v43, %v4253_v45 }
  0xd0   :  { %v4275_v34 = vadd.f32 %v288_v33, %v4262_v49  ;;  %v217_v32 = vpop.f32.mrf.mxu0 }
  0xd1   :  { %6704 = vst [vmem:[#allocation37_spill] sm:$0xff] %v4278_v1  ;;  %v290_v37 = vpop.f32.mrf.mxu1  ;;  %v4284_v38 = vadd.f32 %v217_v32, %v4267_v5 }
  0xd2   :  { %6703 = vst [vmem:[#allocation36_spill] sm:$0xff] %v4275_v34  ;;  %v4281_v31 = vadd.f32 %v290_v37, %v4272_v36  ;;  %v221_v29 = vpop.f32.mrf.mxu0 }
  0xd3   :  { %6706 = vst [vmem:[#allocation39_spill] sm:$0xff] %v4284_v38  ;;  %v294_v28 = vpop.f32.mrf.mxu1  ;;  %v4287_v25 = vadd.f32 %v221_v29, %v4253_v45 }
  0xd4   :  { %6705 = vst [vmem:[#allocation38_spill] sm:$0xff] %v4281_v31  ;;  %v4290_v9 = vadd.f32 %v294_v28, %v4262_v49  ;;  %v223_v33 = vpop.f32.mrf.mxu0 }
  0xd5   :  { %6707 = vst [vmem:[#allocation40_spill] sm:$0xff] %v4287_v25  ;;  %v296_v34 = vpop.f32.mrf.mxu1  ;;  %v4293_v43 = vadd.f32 %v223_v33, %v4267_v5 }
  0xd6   :  { %6708 = vst [vmem:[#allocation41_spill] sm:$0xff] %v4290_v9  ;;  %v4296_v1 = vadd.f32 %v296_v34, %v4272_v36  ;;  %v225_v37 = vpop.f32.mrf.mxu0 }
  0xd7   :  { %6709 = vst [vmem:[#allocation42_spill] sm:$0xff] %v4293_v43  ;;  %v298_v31 = vpop.f32.mrf.mxu1  ;;  %v4299_v32 = vadd.f32 %v225_v37, %v4253_v45 }
  0xd8   :  { %6710 = vst [vmem:[#allocation43_spill] sm:$0xff] %v4296_v1  ;;  %v4302_v38 = vadd.f32 %v298_v31, %v4262_v49  ;;  %v227_v29 = vpop.f32.mrf.mxu0 }
  0xd9   :  { %6711 = vst [vmem:[#allocation44_spill] sm:$0xff] %v4299_v32  ;;  %v300_v25 = vpop.f32.mrf.mxu1  ;;  %v4305_v28 = vadd.f32 %v227_v29, %v4267_v5 }
  0xda   :  { %6712 = vst [vmem:[#allocation45_spill] sm:$0xff] %v4302_v38  ;;  %v4308_v9 = vadd.f32 %v300_v25, %v4272_v36  ;;  %v231_v33 = vpop.f32.mrf.mxu0 }
  0xdb   :  { %6713 = vst [vmem:[#allocation46_spill] sm:$0xff] %v4305_v28  ;;  %v304_v43 = vpop.f32.mrf.mxu1  ;;  %v4311_v34 = vadd.f32 %v231_v33, %v4253_v45 }
  0xdc   :  { %6714 = vst [vmem:[#allocation47_spill] sm:$0xff] %v4308_v9  ;;  %v4314_v1 = vadd.f32 %v304_v43, %v4262_v49  ;;  %v233_v37 = vpop.f32.mrf.mxu0 }
  0xdd   :  { %6715 = vst [vmem:[#allocation48_spill] sm:$0xff] %v4311_v34  ;;  %v306_v32 = vpop.f32.mrf.mxu1  ;;  %v4317_v31 = vadd.f32 %v233_v37, %v4267_v5 }
  0xde   :  { %6716 = vst [vmem:[#allocation49_spill] sm:$0xff] %v4314_v1  ;;  %v4320_v38 = vadd.f32 %v306_v32, %v4272_v36  ;;  %v235_v29 = vpop.f32.mrf.mxu0 }
  0xdf   :  { %6717 = vst [vmem:[#allocation50_spill] sm:$0xff] %v4317_v31  ;;  %v308_v28 = vpop.f32.mrf.mxu1  ;;  %v4323_v25 = vadd.f32 %v235_v29, %v4253_v45 }
  0xe0   :  { %6718 = vst [vmem:[#allocation51_spill] sm:$0xff] %v4320_v38  ;;  %v4326_v9 = vadd.f32 %v308_v28, %v4262_v49  ;;  %v237_v33 = vpop.f32.mrf.mxu0 }
  0xe1   :  { %6719 = vst [vmem:[#allocation52_spill] sm:$0xff] %v4323_v25  ;;  %v310_v34 = vpop.f32.mrf.mxu1  ;;  %v4329_v43 = vadd.f32 %v237_v33, %v4267_v5 }
  0xe2   :  { %6720 = vst [vmem:[#allocation53_spill] sm:$0xff] %v4326_v9  ;;  %v4332_v1 = vadd.f32 %v310_v34, %v4272_v36  ;;  %v241_v37 = vpop.f32.mrf.mxu0 }
  0xe3   :  { %6721 = vst [vmem:[#allocation54_spill] sm:$0xff] %v4329_v43  ;;  %v314_v31 = vpop.f32.mrf.mxu1  ;;  %v4335_v32 = vadd.f32 %v241_v37, %v4253_v45 }
  0xe4   :  { %6722 = vst [vmem:[#allocation55_spill] sm:$0xff] %v4332_v1  ;;  %v4338_v38 = vadd.f32 %v314_v31, %v4262_v49  ;;  %v243_v29 = vpop.f32.mrf.mxu0  ;;  %v6511_v1 = vsub.s32 4, %v4233_v35 }
  0xe5   :  { %6723 = vst [vmem:[#allocation56_spill] sm:$0xff] %v4335_v32  ;;  %v316_v25 = vpop.f32.mrf.mxu1  ;;  %v4341_v28 = vadd.f32 %v243_v29, %v4267_v5  ;;  %v6514_v29 = vsub.s32 5, %v4233_v35 }
  0xe6   :  { %6724 = vst [vmem:[#allocation57_spill] sm:$0xff] %v4338_v38  ;;  %v4344_v9 = vadd.f32 %v316_v25, %v4272_v36  ;;  %v245_v33 = vpop.f32.mrf.mxu0 }
  0xe7   :  { %6725 = vst [vmem:[#allocation58_spill] sm:$0xff] %v4341_v28  ;;  %v318_v43 = vpop.f32.mrf.mxu1  ;;  %v4347_v34 = vadd.f32 %v245_v33, %v4253_v45  ;;  %v4365_v33 = vrot.slane %v4243_v39, %v6511_v1 }
  0xe8   :  { %6726 = vst [vmem:[#allocation59_spill] sm:$0xff] %v4344_v9  ;;  %v4351_v37 = vadd.f32 %v318_v43, %v4262_v49  ;;  %v247_v31 = vpop.f32.mrf.mxu0  ;;  %v4372_v43 = vrot.slane %v4243_v39, %v6514_v29 }
  0xe9   :  { %6727 = vst [vmem:[#allocation60_spill] sm:$0xff] %v4347_v34  ;;  %v320_v38 = vpop.f32.mrf.mxu1  ;;  %v4354_v32 = vadd.f32 %v247_v31, %v4267_v5 }
  0xea   :  { %6728 = vst [vmem:[#allocation61_spill] sm:$0xff] %v4351_v37  ;;  %v4358_v25 = vadd.f32 %v320_v38, %v4272_v36  ;;  %v4360_v9 = vpop.f32.mrf.mxu0 }
  0xeb   :  { %6729 = vst [vmem:[#allocation62_spill] sm:$0xff] %v4354_v32 }
  0xec   :  { %6730 = vst [vmem:[#allocation63_spill] sm:$0xff] %v4358_v25  ;;  %v4367_v34 = vpop.f32.mrf.mxu0 }
  0xee   :  { %v361_v31 = vpop.f32.mrf.mxu0 }
  0xef   :  { %v4375_v37 = vadd.f32 %v361_v31, %v4365_v33 }
  0xf0   :  { %v363_v38 = vpop.f32.mrf.mxu0 }
  0xf1   :  { %6731 = vst [vmem:[#allocation64_spill] sm:$0xff] %v4375_v37  ;;  %v4378_v25 = vadd.f32 %v363_v38, %v4372_v43 }
  0xf2   :  { %v367_v32 = vpop.f32.mrf.mxu0 }
  0xf3   :  { %6732 = vst [vmem:[#allocation65_spill] sm:$0xff] %v4378_v25  ;;  %v4381_v28 = vadd.f32 %v367_v32, %v4365_v33 }
  0xf4   :  { %v369_v1 = vpop.f32.mrf.mxu0 }
  0xf5   :  { %6733 = vst [vmem:[#allocation66_spill] sm:$0xff] %v4381_v28  ;;  %v4384_v30 = vadd.f32 %v369_v1, %v4372_v43 }
  0xf6   :  { %v371_v23 = vpop.f32.mrf.mxu0 }
  0xf7   :  { %6734 = vst [vmem:[#allocation67_spill] sm:$0xff] %v4384_v30  ;;  %v4387_v39 = vadd.f32 %v371_v23, %v4365_v33 }
  0xf8   :  { %v373_v29 = vpop.f32.mrf.mxu0 }
  0xf9   :  { %6735 = vst [vmem:[#allocation68_spill] sm:$0xff] %v4387_v39  ;;  %v4390_v31 = vadd.f32 %v373_v29, %v4372_v43 }
  0xfa   :  { %v377_v37 = vpop.f32.mrf.mxu0 }
  0xfb   :  { %6736 = vst [vmem:[#allocation69_spill] sm:$0xff] %v4390_v31  ;;  %v4393_v38 = vadd.f32 %v377_v37, %v4365_v33 }
  0xfc   :  { %v379_v25 = vpop.f32.mrf.mxu0 }
  0xfd   :  { %6737 = vst [vmem:[#allocation70_spill] sm:$0xff] %v4393_v38  ;;  %v4396_v32 = vadd.f32 %v379_v25, %v4372_v43 }
  0xfe   :  { %v381_v28 = vpop.f32.mrf.mxu0 }
  0xff   :  { %6738 = vst [vmem:[#allocation71_spill] sm:$0xff] %v4396_v32  ;;  %v4399_v1 = vadd.f32 %v381_v28, %v4365_v33 }
 0x100   :  { %v383_v30 = vpop.f32.mrf.mxu0 }
 0x101   :  { %6739 = vst [vmem:[#allocation72_spill] sm:$0xff] %v4399_v1  ;;  %v4402_v23 = vadd.f32 %v383_v30, %v4372_v43 }
 0x102   :  { %v387_v39 = vpop.f32.mrf.mxu0 }
 0x103   :  { %6740 = vst [vmem:[#allocation73_spill] sm:$0xff] %v4402_v23  ;;  %v4405_v29 = vadd.f32 %v387_v39, %v4365_v33  ;;  %v541_v39 = vld [vmem:[%s6465_s5] sm:$0x3f] }
 0x104   :  { %v389_v31 = vpop.f32.mrf.mxu0 }
 0x105   :  { %6741 = vst [vmem:[#allocation74_spill] sm:$0xff] %v4405_v29  ;;  %v4408_v37 = vadd.f32 %v389_v31, %v4372_v43  ;;  %v6745_v29 = vsub.s32 0, %v4233_v35 }
 0x106   :  { %v391_v38 = vpop.f32.mrf.mxu0 }
 0x107   :  { %6742 = vst [vmem:[#allocation75_spill] sm:$0xff] %v4408_v37  ;;  %v4411_v25 = vadd.f32 %v391_v38, %v4365_v33  ;;  %v4421_v31 = vrot.slane %v541_v39, %v6745_v29  ;;  %v6747_v37 = vsub.s32 1, %v4233_v35  ;;  %v6748_v29 = vsub.s32 2, %v4233_v35 }
 0x108   :  { %v393_v32 = vpop.f32.mrf.mxu0 }
 0x109   :  { %6743 = vst [vmem:[#allocation76_spill] sm:$0xff] %v4411_v25  ;;  %v4414_v28 = vadd.f32 %v393_v32, %v4372_v43  ;;  %6746 = vst [vmem:[#allocation78_spill] sm:$0xff] %v4421_v31  ;;  %v4425_v38 = vrot.slane %v541_v39, %v6747_v37  ;;  %v212_v32 = vadd.f32 %v4247_v41, %v4253_v45 }
 0x10a   :  { %v4435_v4 = vrot.slane %v541_v39, %v6748_v29 }
 0x10b   :  { %6744 = vst [vmem:[#allocation77_spill] sm:$0xff] %v4414_v28  ;;  %v1101_v1 = vpop.f32.mrf.mxu1 }
 0x10c   :  { %v1102_v25 = vadd.f32 %v1101_v1, %v4421_v31  ;;  %v6749_v1 = vsub.s32 3, %v4233_v35 }
 0x10d   :  { %v1103_v17 = vpop.f32.mrf.mxu1 }
 0x10e   :  { %v1190_v28 = vadd.f32 %v1102_v25, %v212_v32  ;;  %v4439_v31 = vrot.slane %v541_v39, %v6749_v1  ;;  %v287_v25 = vadd.f32 %v4255_v10, %v4272_v36  ;;  %v6751_v36 = vsub.s32 5, %v4233_v35 }
 0x10f   :  { %v1105_v30 = vpop.f32.mrf.mxu1 }
 0x110   :  { %v1104_v30 = vadd.f32 %v1103_v17, %v4425_v38  ;;  %v2802_v8 = vmul.f32 -1.442695, %v1190_v28  ;;  %v4453_v10 = vrot.slane %v541_v39, %v6751_v36 }
 0x111   :  { %v1106_v23 = vpop.f32.mrf.mxu1 }
 0x112   :  { %v214_v23 = vadd.f32 %v4257_v47, %v4267_v5  ;;  %3086 = vpow2.f32 %v2802_v8  ;;  %v285_v47 = vadd.f32 %v4245_v40, %v4262_v49  ;;  %v6750_v40 = vsub.s32 4, %v4233_v35 }
 0x113   :  { %v360_v35 = vadd.f32 %v4367_v34, %v4372_v43 }
 0x114   :  { %v1191_v15 = vadd.f32 %v1104_v30, %v214_v23  ;;  %v4449_v49 = vrot.slane %v541_v39, %v6750_v40 }
 0x116   :  { %v2803_v6 = vmul.f32 -1.442695, %v1191_v15 }
 0x118   :  { %3088 = vpow2.f32 %v2803_v6 }
 0x11f   :  { %v3087_v23 = vpop.eup %3086 }
 0x120   :  { %v1206_v6 = vadd.f32 1.0, %v3087_v23 }
 0x125   :  { %v3089_v29 = vpop.eup %3088 }
 0x12a   :  { %v1142_v37 = vpop.f32.mrf.mxu0 }
 0x12b   :  { %v1143_v17 = vadd.f32 %v1142_v37, %v4435_v4  ;;  %v1207_v37 = vadd.f32 1.0, %v3089_v29 }
 0x12c   :  { %v1144_v41 = vpop.f32.mrf.mxu0 }
 0x12d   :  { %v1145_v15 = vadd.f32 %v1144_v41, %v4439_v31  ;;  %v1192_v28 = vadd.f32 %v1143_v17, %v285_v47 }
 0x12e   :  { %v1146_v45 = vpop.f32.mrf.mxu0 }
 0x12f   :  { %v1193_v8 = vadd.f32 %v1145_v15, %v287_v25  ;;  %v2804_v32 = vmul.f32 -1.442695, %v1192_v28  ;;  %v358_v28 = vadd.f32 %v4360_v9, %v4365_v33 }
 0x130   :  { %v1147_v5 = vpop.f32.mrf.mxu0 }
 0x131   :  { %v2805_v30 = vmul.f32 -1.442695, %v1193_v8  ;;  %3090 = vpow2.f32 %v2804_v32 }
 0x133   :  { %3092 = vpow2.f32 %v2805_v30 }
 0x134   :  { %3094 = vrcp.f32 %v1206_v6 }
 0x135   :  { %3096 = vrcp.f32 %v1207_v37 }
 0x13e   :  { %v3091_v1 = vpop.eup %3090 }
 0x13f   :  { %v1208_v45 = vadd.f32 1.0, %v3091_v1 }
 0x140   :  { %v3093_v41 = vpop.eup %3092 }
 0x141   :  { %v1209_v47 = vadd.f32 1.0, %v3093_v41  ;;  %v3095_v5 = vpop.eup %3094  ;;  %3098 = vrcp.f32 %v1208_v45  ;;  %v4461_v41 = vpop.permute.xlu0 %1235 }
 0x142   :  { %v3097_v30 = vpop.eup %3096  ;;  %vm2806_vm1 = vcmp.gt.s32.totalorder %v4461_v41, 0  ;;  %vm2807_vm2 = vcmp.gt.s32.totalorder %v4461_v41, 7  ;;  %vm2831_vm5 = vcmp.gt.s32.totalorder %v4461_v41, 1  ;;  %vm2832_vm6 = vcmp.gt.s32.totalorder %v4461_v41, 6 }
 0x143   :  { %3100 = vrcp.f32 %v1209_v47  ;;  %vm2809_vm3 = vmpackc.low %vm2807_vm2, %vm2807_vm2  ;;  %vm2839_vm7 = vcmp.gt.s32.totalorder %v4461_v41, 2  ;;  %vm2840_vm8 = vcmp.gt.s32.totalorder %v4461_v41, 5  ;;  %vm2847_vm9 = vcmp.gt.s32.totalorder %v4461_v41, 3 }
 0x144   :  { %vm4479_vm4 = vmpackc.low %vm2806_vm1, %vm2806_vm1  ;;  %vm2848_vm10 = vcmp.gt.s32.totalorder %v4461_v41, 4 }
 0x14b   :  { %v1183_v17 = vpop.f32.mrf.mxu1 }
 0x14c   :  { %v1184_v15 = vadd.f32 %v1183_v17, %v4449_v49 }
 0x14d   :  { %v1185_v25 = vpop.f32.mrf.mxu1 }
 0x14e   :  { %v1218_v8 = vmul.f32 %v3095_v5, %v1184_v15  ;;  %v1186_v32 = vadd.f32 %v1185_v25, %v4453_v10  ;;  %v3099_v1 = vpop.eup %3098 }
 0x14f   :  { %v1187_v23 = vpop.f32.mrf.mxu1  ;;  %v1224_v9 = vsub.f32 1.0, %v3099_v1  ;;  %v1228_v17 = vmul.f32 0.0, %v3099_v1  ;;  %v4518_v1 = vld [vmem:[%s6462_s4 + $0x120] ss:$24 sps:$4 sm:$0xff]  }
 0x150   :  { %v1220_v39 = vadd.f32 %v1218_v8, %v358_v28  ;;  %v1219_v29 = vmul.f32 %v3097_v30, %v1186_v32  ;;  %v3101_v40 = vpop.eup %3100  ;;  %v6754_v23 = vld [vmem:[#allocation4_spill] sm:$0xff]  ;;  %v6794_v8 = vld [vmem:[#allocation27_spill] sm:$0xff] }
 0x151   :  { %v1188_v6 = vpop.f32.mrf.mxu1  ;;  %v1225_v45 = vsub.f32 1.0, %v3101_v40  ;;  %v1229_v43 = vmul.f32 0.0, %v3101_v40  ;;  %v4524_v40 = vld [vmem:[%s6462_s4 + $0xf4] ss:$24 sps:$4 sm:$0xff]  }
 0x152   :  { %3102 = vtanh.f32 %v1220_v39  ;;  %v1221_v37 = vadd.f32 %v1219_v29, %v360_v35  ;;  %v6755_v35 = vld [vmem:[#allocation6_spill] sm:$0xff]  ;;  %v4504_v39 = vld [vmem:[%s6462_s4 + $0x150] ss:$24 sps:$4 sm:$0xff]  }
 0x153   :  { %v4510_v29 = vld [vmem:[%s6462_s4 + $0x124] ss:$24 sps:$4 sm:$0xff]   ;;  %v6756_v6 = vld [vmem:[#allocation8_spill] sm:$0xff] }
 0x154   :  { %3104 = vtanh.f32 %v1221_v37  ;;  %v6757_v37 = vld [vmem:[#allocation10_spill] sm:$0xff] }
 0x15f   :  { %v3103_v33 = vpop.eup %3102 }
 0x160   :  { %v1226_v36 = vmul.f32 %v3103_v33, %v1224_v9  ;;  %v6758_v9 = vld [vmem:[#allocation12_spill] sm:$0xff]  ;;  %v6759_v33 = vld [vmem:[#allocation14_spill] sm:$0xff] }
 0x161   :  { %v3105_v15 = vpop.eup %3104 }
 0x162   :  { %v1227_v34 = vmul.f32 %v3105_v15, %v1225_v45  ;;  %v1230_v47 = vadd.f32 %v1228_v17, %v1226_v36  ;;  %v4532_v45 = vld [vmem:[%s6462_s4 + $0xf0] ss:$24 sps:$4 sm:$0xff]   ;;  %v4538_v36 = vld [vmem:[%s6462_s4 + $0xc4] ss:$24 sps:$4 sm:$0xff]  }
 0x163   :  { %v6760_v17 = vld [vmem:[#allocation16_spill] sm:$0xff]  ;;  %v6761_v15 = vld [vmem:[#allocation18_spill] sm:$0xff] }
 0x164   :  { %v1231_v5 = vadd.f32 %v1229_v43, %v1227_v34  ;;  %v4467_v25 = vsel %vm2806_vm1, %v1230_v47, 0.0  ;;  %v4487_v30 = vpack.c.bf16 %v1230_v47, %v1230_v47  ;;  %v4546_v34 = vld [vmem:[%s6462_s4 + $0xc0] ss:$24 sps:$4 sm:$0xff]   ;;  %v4552_v43 = vld [vmem:[%s6462_s4 + $0x94] ss:$24 sps:$4 sm:$0xff]  }
 0x165   :  { %1241 = vst [vmem:[%s6466_s8] sm:$0xff] %v4467_v25  ;;  %v6762_v47 = vld [vmem:[#allocation20_spill] sm:$0xff] }
 0x166   :  { %v2810_v28 = vpack.c.bf16 %v1231_v5, %v1231_v5  ;;  %v4485_v32 = vsel %vm2807_vm2, %v1231_v5, 0.0  ;;  %v6763_v5 = vld [vmem:[#allocation22_spill] sm:$0xff] }
 0x167   :  { %2808 = vst [vmem:[%s6466_s8 + $0x78] sm:$0xff] %v4485_v32 }
 0x168   :  { %2811 = vmatprep.mubr.msk.bf16.mxu0 %vm2809_vm3, %v2810_v28  ;;  %2817 = vmatprep.mubr.msk.bf16.mxu1 %vm2809_vm3, %v2810_v28 }
 0x169   :  { %2814 = vmatmul.mubr.msk.bf16.vlgmr.msra.gmra.mxu0 %vm4479_vm4, %v4487_v30  ;;  %2820 = vmatmul.mubr.msk.bf16.vlgmr.msra.gmra.mxu1 %vm4479_vm4, %v4487_v30 }
 0x16a   :  { %1338 = vmatpush1.bf16.msra.mxu0 %v6754_v23  ;;  %2823 = vmatprep.mubr.msk.bf16.mxu0 %vm2809_vm3, %v2810_v28  ;;  %v4560_v28 = vld [vmem:[%s6462_s4 + $0x90] ss:$24 sps:$4 sm:$0xff]   ;;  %v4566_v23 = vld [vmem:[%s6462_s4 + $0x64] ss:$24 sps:$4 sm:$0xff]  }
 0x16b   :  { %1339 = vmatprep.subr.bf16.mxu0 %v6755_v35  ;;  %1444 = vmatpush1.bf16.msra.mxu1 %v4504_v39  ;;  %v6764_v35 = vld [vmem:[#allocation24_spill] sm:$0xff] }
 0x16c   :  { %1445 = vmatprep.subr.bf16.mxu1 %v4510_v29 }
 0x16e   :  { %1340 = vmatpush1.bf16.msra.mxu0 %v6756_v6  ;;  %v6765_v6 = vld [vmem:[#allocation26_spill] sm:$0xff] }
 0x16f   :  { %1341 = vmatprep.subr.bf16.mxu0 %v6757_v37  ;;  %1446 = vmatpush1.bf16.msra.mxu1 %v4518_v1  ;;  %v4574_v37 = vld [vmem:[%s6462_s4 + $0x60] ss:$24 sps:$4 sm:$0xff]  }
 0x170   :  { %1447 = vmatprep.subr.bf16.mxu1 %v4524_v40 }
 0x172   :  { %1342 = vmatpush1.bf16.msra.mxu0 %v6758_v9  ;;  %v4580_v9 = vld [vmem:[%s6462_s4 + $0x34] ss:$24 sps:$4 sm:$0xff]  }
 0x173   :  { %1343 = vmatprep.subr.bf16.mxu0 %v6759_v33  ;;  %1448 = vmatpush1.bf16.msra.mxu1 %v4532_v45  ;;  %v6766_v33 = vld [vmem:[#allocation28_spill] sm:$0xff] }
 0x174   :  { %1449 = vmatprep.subr.bf16.mxu1 %v4538_v36 }
 0x176   :  { %1344 = vmatpush1.bf16.msra.mxu0 %v6760_v17  ;;  %v6767_v17 = vld [vmem:[#allocation30_spill] sm:$0xff] }
 0x177   :  { %1345 = vmatprep.subr.bf16.mxu0 %v6761_v15  ;;  %1450 = vmatpush1.bf16.msra.mxu1 %v4546_v34  ;;  %v4588_v15 = vld [vmem:[%s6462_s4 + $0x30] ss:$24 sps:$4 sm:$0xff]  }
 0x178   :  { %1451 = vmatprep.subr.bf16.mxu1 %v4552_v43  ;;  %6768 = vst [vmem:[#allocation4_spill] sm:$0xff] %v4588_v15 }
 0x17a   :  { %1346 = vmatpush1.bf16.msra.mxu0 %v6762_v47  ;;  %v4594_v47 = vld [vmem:[%s6462_s4 + $0x4] ss:$24 sps:$4 sm:$0xff]  }
 0x17b   :  { %1347 = vmatprep.subr.bf16.mxu0 %v6763_v5  ;;  %1452 = vmatpush1.bf16.msra.mxu1 %v4560_v28  ;;  %v6769_v5 = vld [vmem:[#allocation32_spill] sm:$0xff] }
 0x17c   :  { %1453 = vmatprep.subr.bf16.mxu1 %v4566_v23 }
 0x17e   :  { %1348 = vmatpush1.bf16.msra.mxu0 %v6764_v35  ;;  %v6770_v35 = vld [vmem:[#allocation33_spill] sm:$0xff] }
 0x17f   :  { %1349 = vmatprep.subr.bf16.mxu0 %v6765_v6  ;;  %1454 = vmatpush1.bf16.msra.mxu1 %v4574_v37  ;;  %v4602_v6 = vld [vmem:[%s6462_s4] ss:$24 sps:$4 sm:$0xff]  }
 0x180   :  { %1455 = vmatprep.subr.bf16.mxu1 %v4580_v9  ;;  %6771 = vst [vmem:[#allocation6_spill] sm:$0xff] %v4602_v6 }
 0x182   :  { %1350 = vmatpush1.bf16.msra.mxu0 %v6766_v33 }
 0x183   :  { %1351 = vmatprep.subr.bf16.mxu0 %v6767_v17  ;;  %1456 = vmatpush1.bf16.msra.mxu1 %v4588_v15  ;;  %v4608_v15 = vld [vmem:[%s6462_s4 + $0x2d4] ss:$24 sps:$4 sm:$0xff]   ;;  %v6772_v17 = vld [vmem:[#allocation34_spill] sm:$0xff] }
 0x184   :  { %1457 = vmatprep.subr.bf16.mxu1 %v4594_v47 }
 0x186   :  { %1352 = vmatpush1.bf16.msra.mxu0 %v6769_v5 }
 0x187   :  { %1353 = vmatprep.subr.bf16.mxu0 %v6770_v35  ;;  %1458 = vmatpush1.bf16.msra.mxu1 %v4602_v6  ;;  %v4616_v35 = vld [vmem:[%s6462_s4 + $0x2d0] ss:$24 sps:$4 sm:$0xff]   ;;  %v4622_v6 = vld [vmem:[%s6462_s4 + $0x2a4] ss:$24 sps:$4 sm:$0xff]  }
 0x188   :  { %1459 = vmatprep.subr.bf16.mxu1 %v4608_v15 }
 0x18a   :  { %1354 = vmatpush2.bf16.msra.mxu0 %v6772_v17 }
 0x18b   :  { %1355 = vmatprep.subr.bf16.mxu0 %v4085_v22  ;;  %1460 = vmatpush2.bf16.msra.mxu1 %v4616_v35  ;;  %v4630_v22 = vld [vmem:[%s6462_s4 + $0x2a0] ss:$24 sps:$4 sm:$0xff]  }
 0x18c   :  { %1461 = vmatprep.subr.bf16.mxu1 %v4622_v6 }
 0x18e   :  { %1356 = vmatpush2.bf16.msra.mxu0 %v4093_v24 }
 0x18f   :  { %1357 = vmatprep.subr.bf16.mxu0 %v4100_v16  ;;  %1462 = vmatpush2.bf16.msra.mxu1 %v4630_v22 }
 0x190   :  { %1463 = vmatprep.subr.bf16.mxu1 %v3726_v42  ;;  %v4658_v42 = vld [vmem:[%s6462_s4 + $0x15c] ss:$24 sps:$4 sm:$0xff]  }
 0x191   :  { %6773 = vst [vmem:[#allocation8_spill] sm:$0xff] %v4658_v42 }
 0x192   :  { %1358 = vmatpush2.bf16.msra.mxu0 %v4107_v7 }
 0x193   :  { %1359 = vmatprep.subr.bf16.mxu0 %v4114_v11  ;;  %1464 = vmatpush2.bf16.msra.mxu1 %v3737_v44  ;;  %v4669_v44 = vld [vmem:[%s6462_s4 + $0x158] ss:$24 sps:$4 sm:$0xff]  }
 0x194   :  { %1465 = vmatprep.subr.bf16.mxu1 %v3751_v46  ;;  %6774 = vst [vmem:[#allocation10_spill] sm:$0xff] %v4669_v44  ;;  %v4675_v46 = vld [vmem:[%s6462_s4 + $0x12c] ss:$24 sps:$4 sm:$0xff]  }
 0x195   :  { %6775 = vst [vmem:[#allocation12_spill] sm:$0xff] %v4675_v46 }
 0x196   :  { %1360 = vmatpush2.bf16.msra.mxu0 %v4121_v12 }
 0x197   :  { %1361 = vmatprep.subr.bf16.mxu0 %v4128_v13  ;;  %1466 = vmatpush2.bf16.msra.mxu1 %v3761_v48  ;;  %v4681_v48 = vld [vmem:[%s6462_s4 + $0x128] ss:$24 sps:$4 sm:$0xff]  }
 0x198   :  { %1467 = vmatprep.subr.bf16.mxu1 %v3777_v50  ;;  %6776 = vst [vmem:[#allocation14_spill] sm:$0xff] %v4681_v48  ;;  %v4687_v50 = vld [vmem:[%s6462_s4 + $0xfc] ss:$24 sps:$4 sm:$0xff]  }
 0x199   :  { %6777 = vst [vmem:[#allocation16_spill] sm:$0xff] %v4687_v50 }
 0x19a   :  { %1362 = vmatpush2.bf16.msra.mxu0 %v4135_v14 }
 0x19b   :  { %1363 = vmatprep.subr.bf16.mxu0 %v4142_v18  ;;  %1468 = vmatpush2.bf16.msra.mxu1 %v3788_v52  ;;  %v4693_v52 = vld [vmem:[%s6462_s4 + $0xf8] ss:$24 sps:$4 sm:$0xff]  }
 0x19c   :  { %1469 = vmatprep.subr.bf16.mxu1 %v3802_v54  ;;  %6778 = vst [vmem:[#allocation18_spill] sm:$0xff] %v4693_v52  ;;  %v4699_v54 = vld [vmem:[%s6462_s4 + $0xcc] ss:$24 sps:$4 sm:$0xff]  }
 0x19d   :  { %6779 = vst [vmem:[#allocation20_spill] sm:$0xff] %v4699_v54 }
 0x19e   :  { %1364 = vmatpush2.bf16.msra.mxu0 %v4149_v19 }
 0x19f   :  { %1365 = vmatprep.subr.bf16.mxu0 %v4156_v20  ;;  %1470 = vmatpush2.bf16.msra.mxu1 %v3812_v56  ;;  %v4705_v56 = vld [vmem:[%s6462_s4 + $0xc8] ss:$24 sps:$4 sm:$0xff]  }
 0x1a0   :  { %1471 = vmatprep.subr.bf16.mxu1 %v3828_v58  ;;  %6780 = vst [vmem:[#allocation22_spill] sm:$0xff] %v4705_v56  ;;  %v4711_v58 = vld [vmem:[%s6462_s4 + $0x9c] ss:$24 sps:$4 sm:$0xff]  }
 0x1a1   :  { %6781 = vst [vmem:[#allocation24_spill] sm:$0xff] %v4711_v58 }
 0x1a2   :  { %1366 = vmatpush2.bf16.msra.mxu0 %v4163_v21 }
 0x1a3   :  { %1367 = vmatprep.subr.bf16.mxu0 %v4170_v26  ;;  %1472 = vmatpush2.bf16.msra.mxu1 %v3839_v60  ;;  %v6782_v60 = vld [vmem:[#allocation3_spill] sm:$0xff] }
 0x1a4   :  { %1473 = vmatprep.subr.bf16.mxu1 %v3853_v62  ;;  %v6783_v62 = vld [vmem:[#allocation5_spill] sm:$0xff] }
 0x1a6   :  { %1368 = vmatpush2.bf16.msra.mxu0 %v4177_v27 }
 0x1a7   :  { %1484 = vmatprep.subr.bf16.mxu0 %v4658_v42  ;;  %1474 = vmatpush2.bf16.msra.mxu1 %v3863_v0  ;;  %v6784_v0 = vld [vmem:[#allocation7_spill] sm:$0xff] }
 0x1a8   :  { %1525 = vmatprep.subr.bf16.mxu1 %v3879_v3  ;;  %v6793_v3 = vld [vmem:[#allocation25_spill] sm:$0xff] }
 0x1a9   :  { %2826 = vmatmul.mubr.msk.bf16.vlgmr.msra.gmra.mxu0 %vm4479_vm4, %v4487_v30  ;;  %v6795_v30 = vld [vmem:[#allocation29_spill] sm:$0xff] }
 0x1aa   :  { %1485 = vmatpush1.bf16.msra.mxu0 %v4669_v44 }
 0x1ab   :  { %1486 = vmatprep.subr.bf16.mxu0 %v4675_v46 }
 0x1ae   :  { %1487 = vmatpush1.bf16.msra.mxu0 %v4681_v48 }
 0x1af   :  { %1488 = vmatprep.subr.bf16.mxu0 %v4687_v50 }
 0x1b2   :  { %1489 = vmatpush1.bf16.msra.mxu0 %v4693_v52 }
 0x1b3   :  { %1490 = vmatprep.subr.bf16.mxu0 %v4699_v54 }
 0x1b6   :  { %1491 = vmatpush1.bf16.msra.mxu0 %v4705_v56 }
 0x1b7   :  { %1492 = vmatprep.subr.bf16.mxu0 %v4711_v58  ;;  %v6800_v58 = vld [vmem:[#allocation39_spill] sm:$0xff] }
 0x1ba   :  { %1493 = vmatpush1.bf16.msra.mxu0 %v3783_v51  ;;  %v6785_v51 = vld [vmem:[#allocation9_spill] sm:$0xff] }
 0x1bb   :  { %1494 = vmatprep.subr.bf16.mxu0 %v3795_v53  ;;  %v6786_v53 = vld [vmem:[#allocation11_spill] sm:$0xff] }
 0x1be   :  { %1495 = vmatpush1.bf16.msra.mxu0 %v3807_v55  ;;  %v6787_v55 = vld [vmem:[#allocation13_spill] sm:$0xff] }
 0x1bf   :  { %1496 = vmatprep.subr.bf16.mxu0 %v3821_v57  ;;  %v6788_v57 = vld [vmem:[#allocation15_spill] sm:$0xff] }
 0x1c2   :  { %1497 = vmatpush1.bf16.msra.mxu0 %v3834_v59  ;;  %v6789_v59 = vld [vmem:[#allocation17_spill] sm:$0xff] }
 0x1c3   :  { %1498 = vmatprep.subr.bf16.mxu0 %v3846_v61  ;;  %v6790_v61 = vld [vmem:[#allocation19_spill] sm:$0xff] }
 0x1c6   :  { %1499 = vmatpush1.bf16.msra.mxu0 %v3858_v63  ;;  %v6791_v63 = vld [vmem:[#allocation21_spill] sm:$0xff] }
 0x1c7   :  { %1500 = vmatprep.subr.bf16.mxu0 %v3872_v2  ;;  %v6792_v2 = vld [vmem:[#allocation23_spill] sm:$0xff] }
 0x1ca   :  { %1501 = vmatpush2.bf16.msra.mxu0 %v6782_v60  ;;  %v6796_v60 = vld [vmem:[#allocation31_spill] sm:$0xff] }
 0x1cb   :  { %1502 = vmatprep.subr.bf16.mxu0 %v6783_v62  ;;  %v4740_v62 = vld [vmem:[%s6462_s4 + $0x154] ss:$24 sps:$4 sm:$0xff]  }
 0x1cc   :  { %6797 = vst [vmem:[#allocation26_spill] sm:$0xff] %v4740_v62 }
 0x1ce   :  { %1503 = vmatpush2.bf16.msra.mxu0 %v6784_v0 }
 0x1cf   :  { %1504 = vmatprep.subr.bf16.mxu0 %v6785_v51 }
 0x1d2   :  { %1505 = vmatpush2.bf16.msra.mxu0 %v6786_v53 }
 0x1d3   :  { %1506 = vmatprep.subr.bf16.mxu0 %v6787_v55 }
 0x1d6   :  { %1507 = vmatpush2.bf16.msra.mxu0 %v6788_v57 }
 0x1d7   :  { %1508 = vmatprep.subr.bf16.mxu0 %v6789_v59 }
 0x1da   :  { %1509 = vmatpush2.bf16.msra.mxu0 %v6790_v61 }
 0x1db   :  { %1510 = vmatprep.subr.bf16.mxu0 %v6791_v63 }
 0x1de   :  { %1511 = vmatpush2.bf16.msra.mxu0 %v6792_v2  ;;  %v6798_v2 = vld [vmem:[#allocation78_spill] sm:$0xff] }
 0x1df   :  { %1512 = vmatprep.subr.bf16.mxu0 %v6793_v3 }
 0x1e2   :  { %1513 = vmatpush2.bf16.msra.mxu0 %v6794_v8 }
 0x1e3   :  { %1514 = vmatprep.subr.bf16.mxu0 %v6795_v30  ;;  %v6799_v30 = vld [vmem:[#allocation37_spill] sm:$0xff] }
 0x1e6   :  { %1515 = vmatpush2.bf16.msra.mxu0 %v6796_v60 }
 0x1e7   :  { %1631 = vmatprep.subr.bf16.mxu0 %v4740_v62 }
 0x229   :  { %v1289_v0 = vpop.f32.mrf.mxu0  ;;  %v1330_v51 = vpop.f32.mrf.mxu1 }
 0x22a   :  { %v1290_v3 = vadd.f32 %v1289_v0, %v6798_v2  ;;  %v1331_v62 = vadd.f32 %v1330_v51, %v4435_v4 }
 0x22b   :  { %v1291_v53 = vpop.f32.mrf.mxu0  ;;  %v1332_v55 = vpop.f32.mrf.mxu1 }
 0x22c   :  { %v1292_v8 = vadd.f32 %v1291_v53, %v4425_v38  ;;  %v1378_v60 = vadd.f32 %v1290_v3, %v6799_v30  ;;  %v1333_v50 = vadd.f32 %v1332_v55, %v4439_v31 }
 0x22d   :  { %v1293_v57 = vpop.f32.mrf.mxu0  ;;  %v1334_v59 = vpop.f32.mrf.mxu1 }
 0x22e   :  { %v1379_v56 = vadd.f32 %v1292_v8, %v6800_v58  ;;  %v2827_v54 = vmul.f32 -1.442695, %v1378_v60  ;;  %v6801_v57 = vld [vmem:[#allocation36_spill] sm:$0xff] }
 0x22f   :  { %v1294_v61 = vpop.f32.mrf.mxu0  ;;  %v1335_v63 = vpop.f32.mrf.mxu1  ;;  %v1380_v59 = vadd.f32 %v1331_v62, %v6801_v57 }
 0x230   :  { %v2828_v52 = vmul.f32 -1.442695, %v1379_v56  ;;  %3106 = vpow2.f32 %v2827_v54  ;;  %v6802_v61 = vld [vmem:[#allocation38_spill] sm:$0xff] }
 0x231   :  { %v1381_v63 = vadd.f32 %v1333_v50, %v6802_v61  ;;  %v2829_v48 = vmul.f32 -1.442695, %v1380_v59 }
 0x232   :  { %3108 = vpow2.f32 %v2828_v52 }
 0x233   :  { %v2830_v0 = vmul.f32 -1.442695, %v1381_v63  ;;  %3110 = vpow2.f32 %v2829_v48 }
 0x235   :  { %3112 = vpow2.f32 %v2830_v0  ;;  %v6804_v0 = vld [vmem:[#allocation65_spill] sm:$0xff] }
 0x23d   :  { %v3107_v2 = vpop.eup %3106 }
 0x23e   :  { %v1394_v3 = vadd.f32 1.0, %v3107_v2  ;;  %v6803_v2 = vld [vmem:[#allocation64_spill] sm:$0xff] }
 0x23f   :  { %v3109_v53 = vpop.eup %3108 }
 0x240   :  { %v1395_v58 = vadd.f32 1.0, %v3109_v53  ;;  %3114 = vrcp.f32 %v1394_v3  ;;  %v3111_v54 = vpop.eup %3110 }
 0x241   :  { %v1396_v51 = vadd.f32 1.0, %v3111_v54 }
 0x242   :  { %3116 = vrcp.f32 %v1395_v58  ;;  %v3113_v56 = vpop.eup %3112 }
 0x243   :  { %v1397_v8 = vadd.f32 1.0, %v3113_v56  ;;  %3118 = vrcp.f32 %v1396_v51 }
 0x245   :  { %3120 = vrcp.f32 %v1397_v8 }
 0x24d   :  { %v3115_v62 = vpop.eup %3114 }
 0x24f   :  { %v3117_v48 = vpop.eup %3116 }
 0x250   :  { %v3119_v3 = vpop.eup %3118 }
 0x251   :  { %v1412_v54 = vsub.f32 1.0, %v3119_v3 }
 0x252   :  { %v3121_v58 = vpop.eup %3120 }
 0x253   :  { %v1417_v8 = vmul.f32 %v3121_v58, %v4485_v32 }
 0x269   :  { %v1371_v52 = vpop.f32.mrf.mxu0 }
 0x26a   :  { %v1372_v55 = vadd.f32 %v1371_v52, %v4449_v49  ;;  %v1413_v52 = vsub.f32 1.0, %v3121_v58  ;;  %v4824_v58 = vld [vmem:[%s6462_s4 + $0xd4] ss:$24 sps:$4 sm:$0xff]  }
 0x26b   :  { %v1373_v30 = vpop.f32.mrf.mxu0 }
 0x26c   :  { %v1406_v50 = vmul.f32 %v3115_v62, %v1372_v55  ;;  %v1374_v60 = vadd.f32 %v1373_v30, %v4453_v10  ;;  %v1416_v55 = vmul.f32 %v3119_v3, %v4467_v25  ;;  %v4818_v3 = vld [vmem:[%s6462_s4 + $0x100] ss:$24 sps:$4 sm:$0xff]  }
 0x26d   :  { %v1375_v57 = vpop.f32.mrf.mxu0 }
 0x26e   :  { %v1408_v59 = vadd.f32 %v1406_v50, %v6803_v2  ;;  %v1407_v61 = vmul.f32 %v3117_v48, %v1374_v60 }
 0x26f   :  { %v1376_v63 = vpop.f32.mrf.mxu0 }
 0x270   :  { %3122 = vtanh.f32 %v1408_v59  ;;  %v1409_v53 = vadd.f32 %v1407_v61, %v6804_v0  ;;  %v4804_v0 = vld [vmem:[%s6462_s4 + $0x130] ss:$24 sps:$4 sm:$0xff]  }
 0x272   :  { %3124 = vtanh.f32 %v1409_v53  ;;  %v4810_v53 = vld [vmem:[%s6462_s4 + $0x104] ss:$24 sps:$4 sm:$0xff]  }
 0x27d   :  { %v3123_v56 = vpop.eup %3122 }
 0x27e   :  { %v1414_v51 = vmul.f32 %v3123_v56, %v1412_v54  ;;  %v4832_v54 = vld [vmem:[%s6462_s4 + $0xd0] ss:$24 sps:$4 sm:$0xff]   ;;  %v4838_v56 = vld [vmem:[%s6462_s4 + $0xa4] ss:$24 sps:$4 sm:$0xff]  }
 0x27f   :  { %v3125_v62 = vpop.eup %3124 }
 0x280   :  { %v1415_v30 = vmul.f32 %v3125_v62, %v1413_v52  ;;  %v1418_v57 = vadd.f32 %v1416_v55, %v1414_v51  ;;  %v4846_v52 = vld [vmem:[%s6462_s4 + $0xa0] ss:$24 sps:$4 sm:$0xff]   ;;  %v4852_v51 = vld [vmem:[%s6462_s4 + $0x74] ss:$24 sps:$4 sm:$0xff]   ;;  %v4860_v55 = vld [vmem:[%s6462_s4 + $0x70] ss:$24 sps:$4 sm:$0xff]  }
 0x281   :  { %v4866_v62 = vld [vmem:[%s6462_s4 + $0x44] ss:$24 sps:$4 sm:$0xff]  }
 0x282   :  { %v1419_v50 = vadd.f32 %v1417_v8, %v1415_v30  ;;  %v1424_v60 = vsel %vm2831_vm5, %v1418_v57, 0.0  ;;  %v4767_v48 = vsel %vm2831_vm5, %v1418_v57, %v4467_v25  ;;  %v4790_v25 = vld [vmem:[%s6462_s4 + $0x160] ss:$24 sps:$4 sm:$0xff]   ;;  %v6806_v8 = vld [vmem:[#allocation4_spill] sm:$0xff]  ;;  %v6807_v57 = vld [vmem:[#allocation33_spill] sm:$0xff] }
 0x283   :  { %2833 = vst [vmem:[%s6466_s8 + $0x10] sm:$0xff] %v1424_v60  ;;  %v4783_v63 = vpack.c.bf16 %v4767_v48, %v4767_v48  ;;  %v6805_v30 = vld [vmem:[#allocation30_spill] sm:$0xff]  ;;  %v6809_v60 = vld [vmem:[#allocation35_spill] sm:$0xff] }
 0x284   :  { %v1425_v2 = vsel %vm2832_vm6, %v1419_v50, 0.0  ;;  %v4774_v59 = vsel %vm2832_vm6, %v1419_v50, %v4485_v32  ;;  %v4796_v32 = vld [vmem:[%s6462_s4 + $0x134] ss:$24 sps:$4 sm:$0xff]   ;;  %v6808_v50 = vld [vmem:[#allocation6_spill] sm:$0xff] }
 0x285   :  { %2834 = vst [vmem:[%s6466_s8 + $0x68] sm:$0xff] %v1425_v2  ;;  %v1442_v61 = vpack.c.bf16 %v4774_v59, %v4774_v59  ;;  %v6821_v2 = vld [vmem:[#allocation20_spill] sm:$0xff] }
 0x287   :  { %1475 = vmatprep.mubr.bf16.mxu1 %v1442_v61  ;;  %1516 = vmatprep.mubr.bf16.mxu0 %v1442_v61 }
 0x288   :  { %1476 = vmatmul.mubr.bf16.vlgmr.msra.gmra.mxu1 %v4783_v63  ;;  %1517 = vmatmul.mubr.bf16.vlgmr.msra.gmra.mxu0 %v4783_v63 }
 0x289   :  { %1526 = vmatpush1.bf16.msra.mxu1 %v4790_v25  ;;  %1557 = vmatprep.mubr.bf16.mxu1 %v1442_v61  ;;  %v6822_v61 = vld [vmem:[#allocation22_spill] sm:$0xff] }
 0x28a   :  { %1527 = vmatprep.subr.bf16.mxu1 %v4796_v32  ;;  %1632 = vmatpush1.bf16.msra.mxu0 %v4504_v39 }
 0x28b   :  { %1633 = vmatprep.subr.bf16.mxu0 %v4510_v29 }
 0x28d   :  { %1528 = vmatpush1.bf16.msra.mxu1 %v4804_v0 }
 0x28e   :  { %1529 = vmatprep.subr.bf16.mxu1 %v4810_v53  ;;  %1634 = vmatpush1.bf16.msra.mxu0 %v4518_v1 }
 0x28f   :  { %1635 = vmatprep.subr.bf16.mxu0 %v4524_v40 }
 0x291   :  { %1530 = vmatpush1.bf16.msra.mxu1 %v4818_v3 }
 0x292   :  { %1531 = vmatprep.subr.bf16.mxu1 %v4824_v58  ;;  %1636 = vmatpush1.bf16.msra.mxu0 %v4532_v45 }
 0x293   :  { %1637 = vmatprep.subr.bf16.mxu0 %v4538_v36 }
 0x295   :  { %1532 = vmatpush1.bf16.msra.mxu1 %v4832_v54 }
 0x296   :  { %1533 = vmatprep.subr.bf16.mxu1 %v4838_v56  ;;  %1638 = vmatpush1.bf16.msra.mxu0 %v4546_v34 }
 0x297   :  { %1639 = vmatprep.subr.bf16.mxu0 %v4552_v43 }
 0x299   :  { %1534 = vmatpush1.bf16.msra.mxu1 %v4846_v52 }
 0x29a   :  { %1535 = vmatprep.subr.bf16.mxu1 %v4852_v51  ;;  %1640 = vmatpush1.bf16.msra.mxu0 %v4560_v28 }
 0x29b   :  { %1641 = vmatprep.subr.bf16.mxu0 %v4566_v23 }
 0x29d   :  { %1536 = vmatpush1.bf16.msra.mxu1 %v4860_v55 }
 0x29e   :  { %1537 = vmatprep.subr.bf16.mxu1 %v4866_v62  ;;  %1642 = vmatpush1.bf16.msra.mxu0 %v4574_v37 }
 0x29f   :  { %1643 = vmatprep.subr.bf16.mxu0 %v4580_v9 }
 0x2a1   :  { %1538 = vmatpush1.bf16.msra.mxu1 %v6766_v33  ;;  %v4889_v33 = vld [vmem:[%s6462_s4 + $0x274] ss:$24 sps:$4 sm:$0xff]  }
 0x2a2   :  { %1539 = vmatprep.subr.bf16.mxu1 %v6805_v30  ;;  %1644 = vmatpush1.bf16.msra.mxu0 %v6806_v8  ;;  %v6823_v30 = vld [vmem:[#allocation24_spill] sm:$0xff] }
 0x2a3   :  { %1645 = vmatprep.subr.bf16.mxu0 %v4594_v47 }
 0x2a5   :  { %1540 = vmatpush1.bf16.msra.mxu1 %v6769_v5  ;;  %v6820_v5 = vld [vmem:[#allocation18_spill] sm:$0xff] }
 0x2a6   :  { %1541 = vmatprep.subr.bf16.mxu1 %v6807_v57  ;;  %1646 = vmatpush1.bf16.msra.mxu0 %v6808_v50  ;;  %v4994_v57 = vld [vmem:[%s6462_s4 + $0x6c] ss:$24 sps:$4 sm:$0xff]  }
 0x2a7   :  { %1647 = vmatprep.subr.bf16.mxu0 %v4608_v15  ;;  %6825 = vst [vmem:[#allocation15_spill] sm:$0xff] %v4994_v57 }
 0x2a9   :  { %1542 = vmatpush2.bf16.msra.mxu1 %v6772_v17  ;;  %v4897_v17 = vld [vmem:[%s6462_s4 + $0x270] ss:$24 sps:$4 sm:$0xff]  }
 0x2aa   :  { %1543 = vmatprep.subr.bf16.mxu1 %v6809_v60  ;;  %1648 = vmatpush2.bf16.msra.mxu0 %v4616_v35  ;;  %v5000_v60 = vld [vmem:[%s6462_s4 + $0x68] ss:$24 sps:$4 sm:$0xff]  }
 0x2ab   :  { %1649 = vmatprep.subr.bf16.mxu0 %v4622_v6  ;;  %6826 = vst [vmem:[#allocation17_spill] sm:$0xff] %v5000_v60 }
 0x2ad   :  { %1544 = vmatpush2.bf16.msra.mxu1 %v4093_v24  ;;  %v4903_v24 = vld [vmem:[%s6462_s4 + $0x244] ss:$24 sps:$4 sm:$0xff]  }
 0x2ae   :  { %1545 = vmatprep.subr.bf16.mxu1 %v4100_v16  ;;  %1650 = vmatpush2.bf16.msra.mxu0 %v4630_v22  ;;  %v4917_v16 = vld [vmem:[%s6462_s4 + $0x214] ss:$24 sps:$4 sm:$0xff]  }
 0x2af   :  { %1651 = vmatprep.subr.bf16.mxu0 %v4889_v33 }
 0x2b1   :  { %1546 = vmatpush2.bf16.msra.mxu1 %v4107_v7  ;;  %v4911_v7 = vld [vmem:[%s6462_s4 + $0x240] ss:$24 sps:$4 sm:$0xff]  }
 0x2b2   :  { %1547 = vmatprep.subr.bf16.mxu1 %v4114_v11  ;;  %1652 = vmatpush2.bf16.msra.mxu0 %v4897_v17  ;;  %v4925_v11 = vld [vmem:[%s6462_s4 + $0x210] ss:$24 sps:$4 sm:$0xff]  }
 0x2b3   :  { %1653 = vmatprep.subr.bf16.mxu0 %v4903_v24  ;;  %6810 = vst [vmem:[#allocation28_spill] sm:$0xff] %v4925_v11 }
 0x2b5   :  { %1548 = vmatpush2.bf16.msra.mxu1 %v4121_v12  ;;  %v4931_v12 = vld [vmem:[%s6462_s4 + $0x1e4] ss:$24 sps:$4 sm:$0xff]  }
 0x2b6   :  { %1549 = vmatprep.subr.bf16.mxu1 %v4128_v13  ;;  %1654 = vmatpush2.bf16.msra.mxu0 %v4911_v7  ;;  %6811 = vst [vmem:[#allocation32_spill] sm:$0xff] %v4931_v12  ;;  %v4939_v13 = vld [vmem:[%s6462_s4 + $0x1e0] ss:$24 sps:$4 sm:$0xff]  }
 0x2b7   :  { %1655 = vmatprep.subr.bf16.mxu0 %v4917_v16  ;;  %6812 = vst [vmem:[#allocation34_spill] sm:$0xff] %v4939_v13 }
 0x2b9   :  { %1550 = vmatpush2.bf16.msra.mxu1 %v4135_v14  ;;  %v4945_v14 = vld [vmem:[%s6462_s4 + $0x1b4] ss:$24 sps:$4 sm:$0xff]  }
 0x2ba   :  { %1551 = vmatprep.subr.bf16.mxu1 %v4142_v18  ;;  %1656 = vmatpush2.bf16.msra.mxu0 %v4925_v11  ;;  %6813 = vst [vmem:[#allocation3_spill] sm:$0xff] %v4945_v14  ;;  %v4953_v18 = vld [vmem:[%s6462_s4 + $0x1b0] ss:$24 sps:$4 sm:$0xff]  }
 0x2bb   :  { %1657 = vmatprep.subr.bf16.mxu0 %v4931_v12  ;;  %6814 = vst [vmem:[#allocation5_spill] sm:$0xff] %v4953_v18 }
 0x2bd   :  { %1552 = vmatpush2.bf16.msra.mxu1 %v4149_v19  ;;  %v4959_v19 = vld [vmem:[%s6462_s4 + $0x184] ss:$24 sps:$4 sm:$0xff]  }
 0x2be   :  { %1553 = vmatprep.subr.bf16.mxu1 %v4156_v20  ;;  %1658 = vmatpush2.bf16.msra.mxu0 %v4939_v13  ;;  %6815 = vst [vmem:[#allocation7_spill] sm:$0xff] %v4959_v19  ;;  %v4967_v20 = vld [vmem:[%s6462_s4 + $0x180] ss:$24 sps:$4 sm:$0xff]  }
 0x2bf   :  { %1659 = vmatprep.subr.bf16.mxu0 %v4945_v14  ;;  %6816 = vst [vmem:[#allocation9_spill] sm:$0xff] %v4967_v20 }
 0x2c1   :  { %1554 = vmatpush2.bf16.msra.mxu1 %v4163_v21  ;;  %v4973_v21 = vld [vmem:[%s6462_s4 + $0x164] ss:$24 sps:$4 sm:$0xff]  }
 0x2c2   :  { %1555 = vmatprep.subr.bf16.mxu1 %v4170_v26  ;;  %1660 = vmatpush2.bf16.msra.mxu0 %v4953_v18  ;;  %6817 = vst [vmem:[#allocation11_spill] sm:$0xff] %v4973_v21  ;;  %v6818_v26 = vld [vmem:[#allocation14_spill] sm:$0xff] }
 0x2c3   :  { %1661 = vmatprep.subr.bf16.mxu0 %v4959_v19  ;;  %v6850_v18 = vld [vmem:[#allocation42_spill] sm:$0xff] }
 0x2c5   :  { %1556 = vmatpush2.bf16.msra.mxu1 %v4177_v27  ;;  %v6819_v27 = vld [vmem:[#allocation16_spill] sm:$0xff] }
 0x2c6   :  { %1672 = vmatprep.subr.bf16.mxu1 %v4658_v42  ;;  %1662 = vmatpush2.bf16.msra.mxu0 %v4967_v20  ;;  %v6849_v42 = vld [vmem:[#allocation40_spill] sm:$0xff] }
 0x2c7   :  { %1713 = vmatprep.subr.bf16.mxu0 %v4973_v21  ;;  %v6848_v21 = vld [vmem:[#allocation78_spill] sm:$0xff] }
 0x2c8   :  { %1558 = vmatmul.mubr.bf16.vlgmr.msra.gmra.mxu1 %v4783_v63  ;;  %v4988_v63 = vld [vmem:[%s6462_s4 + $0x98] ss:$24 sps:$4 sm:$0xff]  }
 0x2c9   :  { %1673 = vmatpush1.bf16.msra.mxu1 %v4669_v44  ;;  %6824 = vst [vmem:[#allocation13_spill] sm:$0xff] %v4988_v63 }
 0x2ca   :  { %1674 = vmatprep.subr.bf16.mxu1 %v4675_v46 }
 0x2cd   :  { %1675 = vmatpush1.bf16.msra.mxu1 %v6818_v26 }
 0x2ce   :  { %1676 = vmatprep.subr.bf16.mxu1 %v6819_v27 }
 0x2d1   :  { %1677 = vmatpush1.bf16.msra.mxu1 %v6820_v5 }
 0x2d2   :  { %1678 = vmatprep.subr.bf16.mxu1 %v6821_v2 }
 0x2d5   :  { %1679 = vmatpush1.bf16.msra.mxu1 %v6822_v61 }
 0x2d6   :  { %1680 = vmatprep.subr.bf16.mxu1 %v6823_v30  ;;  %v5006_v30 = vld [vmem:[%s6462_s4 + $0x3c] ss:$24 sps:$4 sm:$0xff]  }
 0x2d7   :  { %6827 = vst [vmem:[#allocation19_spill] sm:$0xff] %v5006_v30 }
 0x2d9   :  { %1681 = vmatpush1.bf16.msra.mxu1 %v4988_v63  ;;  %v5012_v63 = vld [vmem:[%s6462_s4 + $0x38] ss:$24 sps:$4 sm:$0xff]  }
 0x2da   :  { %1682 = vmatprep.subr.bf16.mxu1 %v4994_v57  ;;  %6828 = vst [vmem:[#allocation21_spill] sm:$0xff] %v5012_v63  ;;  %v5018_v57 = vld [vmem:[%s6462_s4 + $0xc] ss:$24 sps:$4 sm:$0xff]  }
 0x2db   :  { %6829 = vst [vmem:[#allocation23_spill] sm:$0xff] %v5018_v57 }
 0x2dd   :  { %1683 = vmatpush1.bf16.msra.mxu1 %v5000_v60  ;;  %v5024_v60 = vld [vmem:[%s6462_s4 + $0x8] ss:$24 sps:$4 sm:$0xff]  }
 0x2de   :  { %1684 = vmatprep.subr.bf16.mxu1 %v5006_v30  ;;  %6830 = vst [vmem:[#allocation25_spill] sm:$0xff] %v5024_v60  ;;  %v5030_v30 = vld [vmem:[%s6462_s4 + $0x2dc] ss:$24 sps:$4 sm:$0xff]  }
 0x2df   :  { %6831 = vst [vmem:[#allocation27_spill] sm:$0xff] %v5030_v30 }
 0x2e1   :  { %1685 = vmatpush1.bf16.msra.mxu1 %v5012_v63  ;;  %v5036_v63 = vld [vmem:[%s6462_s4 + $0x2d8] ss:$24 sps:$4 sm:$0xff]  }
 0x2e2   :  { %1686 = vmatprep.subr.bf16.mxu1 %v5018_v57  ;;  %6832 = vst [vmem:[#allocation29_spill] sm:$0xff] %v5036_v63  ;;  %v5042_v57 = vld [vmem:[%s6462_s4 + $0x2ac] ss:$24 sps:$4 sm:$0xff]  }
 0x2e3   :  { %6833 = vst [vmem:[#allocation31_spill] sm:$0xff] %v5042_v57 }
 0x2e5   :  { %1687 = vmatpush1.bf16.msra.mxu1 %v5024_v60  ;;  %v5048_v60 = vld [vmem:[%s6462_s4 + $0x2a8] ss:$24 sps:$4 sm:$0xff]  }
 0x2e6   :  { %1688 = vmatprep.subr.bf16.mxu1 %v5030_v30  ;;  %6834 = vst [vmem:[#allocation37_spill] sm:$0xff] %v5048_v60  ;;  %v5054_v30 = vld [vmem:[%s6462_s4 + $0x27c] ss:$24 sps:$4 sm:$0xff]  }
 0x2e7   :  { %6835 = vst [vmem:[#allocation39_spill] sm:$0xff] %v5054_v30 }
 0x2e9   :  { %1689 = vmatpush2.bf16.msra.mxu1 %v5036_v63  ;;  %v5060_v63 = vld [vmem:[%s6462_s4 + $0x278] ss:$24 sps:$4 sm:$0xff]  }
 0x2ea   :  { %1690 = vmatprep.subr.bf16.mxu1 %v5042_v57  ;;  %6836 = vst [vmem:[#allocation36_spill] sm:$0xff] %v5060_v63  ;;  %v5066_v57 = vld [vmem:[%s6462_s4 + $0x24c] ss:$24 sps:$4 sm:$0xff]  }
 0x2eb   :  { %6837 = vst [vmem:[#allocation38_spill] sm:$0xff] %v5066_v57 }
 0x2ed   :  { %1691 = vmatpush2.bf16.msra.mxu1 %v5048_v60  ;;  %v5072_v60 = vld [vmem:[%s6462_s4 + $0x248] ss:$24 sps:$4 sm:$0xff]  }
 0x2ee   :  { %1692 = vmatprep.subr.bf16.mxu1 %v5054_v30  ;;  %6838 = vst [vmem:[#allocation64_spill] sm:$0xff] %v5072_v60  ;;  %v5078_v30 = vld [vmem:[%s6462_s4 + $0x21c] ss:$24 sps:$4 sm:$0xff]  }
 0x2ef   :  { %6839 = vst [vmem:[#allocation65_spill] sm:$0xff] %v5078_v30 }
 0x2f1   :  { %1693 = vmatpush2.bf16.msra.mxu1 %v5060_v63  ;;  %v5084_v63 = vld [vmem:[%s6462_s4 + $0x218] ss:$24 sps:$4 sm:$0xff]  }
 0x2f2   :  { %1694 = vmatprep.subr.bf16.mxu1 %v5066_v57  ;;  %6840 = vst [vmem:[#allocation30_spill] sm:$0xff] %v5084_v63  ;;  %v5090_v57 = vld [vmem:[%s6462_s4 + $0x1ec] ss:$24 sps:$4 sm:$0xff]  }
 0x2f3   :  { %6841 = vst [vmem:[#allocation4_spill] sm:$0xff] %v5090_v57 }
 0x2f5   :  { %1695 = vmatpush2.bf16.msra.mxu1 %v5072_v60  ;;  %v5096_v60 = vld [vmem:[%s6462_s4 + $0x1e8] ss:$24 sps:$4 sm:$0xff]  }
 0x2f6   :  { %1696 = vmatprep.subr.bf16.mxu1 %v5078_v30  ;;  %6842 = vst [vmem:[#allocation33_spill] sm:$0xff] %v5096_v60  ;;  %v5102_v30 = vld [vmem:[%s6462_s4 + $0x1bc] ss:$24 sps:$4 sm:$0xff]  }
 0x2f7   :  { %6843 = vst [vmem:[#allocation6_spill] sm:$0xff] %v5102_v30 }
 0x2f9   :  { %1697 = vmatpush2.bf16.msra.mxu1 %v5084_v63  ;;  %v5108_v63 = vld [vmem:[%s6462_s4 + $0x1b8] ss:$24 sps:$4 sm:$0xff]  }
 0x2fa   :  { %1698 = vmatprep.subr.bf16.mxu1 %v5090_v57  ;;  %6844 = vst [vmem:[#allocation35_spill] sm:$0xff] %v5108_v63  ;;  %v5114_v57 = vld [vmem:[%s6462_s4 + $0x18c] ss:$24 sps:$4 sm:$0xff]  }
 0x2fb   :  { %6845 = vst [vmem:[#allocation79_spill] sm:$0xff] %v5114_v57 }
 0x2fd   :  { %1699 = vmatpush2.bf16.msra.mxu1 %v5096_v60  ;;  %v5120_v60 = vld [vmem:[%s6462_s4 + $0x188] ss:$24 sps:$4 sm:$0xff]  }
 0x2fe   :  { %1700 = vmatprep.subr.bf16.mxu1 %v5102_v30  ;;  %6846 = vst [vmem:[#allocation80_spill] sm:$0xff] %v5120_v60  ;;  %v6847_v30 = vld [vmem:[#allocation26_spill] sm:$0xff] }
 0x301   :  { %1701 = vmatpush2.bf16.msra.mxu1 %v5108_v63 }
 0x302   :  { %1702 = vmatprep.subr.bf16.mxu1 %v5114_v57 }
 0x305   :  { %1703 = vmatpush2.bf16.msra.mxu1 %v5120_v60 }
 0x306   :  { %1819 = vmatprep.subr.bf16.mxu1 %v6847_v30 }
 0x348   :  { %v1477_v61 = vpop.f32.mrf.mxu1  ;;  %v1518_v2 = vpop.f32.mrf.mxu0 }
 0x349   :  { %v1478_v20 = vadd.f32 %v1477_v61, %v6848_v21  ;;  %v1519_v30 = vadd.f32 %v1518_v2, %v4435_v4 }
 0x34a   :  { %v1479_v5 = vpop.f32.mrf.mxu1  ;;  %v1520_v63 = vpop.f32.mrf.mxu0 }
 0x34b   :  { %v1480_v57 = vadd.f32 %v1479_v5, %v4425_v38  ;;  %v1566_v19 = vadd.f32 %v1478_v20, %v6849_v42  ;;  %v1521_v12 = vadd.f32 %v1520_v63, %v4439_v31 }
 0x34c   :  { %v1481_v27 = vpop.f32.mrf.mxu1  ;;  %v1522_v26 = vpop.f32.mrf.mxu0 }
 0x34d   :  { %v1567_v14 = vadd.f32 %v1480_v57, %v6850_v18  ;;  %v2835_v13 = vmul.f32 -1.442695, %v1566_v19  ;;  %v6851_v27 = vld [vmem:[#allocation41_spill] sm:$0xff] }
 0x34e   :  { %v1482_v46 = vpop.f32.mrf.mxu1  ;;  %v1523_v44 = vpop.f32.mrf.mxu0  ;;  %v1568_v26 = vadd.f32 %v1519_v30, %v6851_v27 }
 0x34f   :  { %v2836_v60 = vmul.f32 -1.442695, %v1567_v14  ;;  %3126 = vpow2.f32 %v2835_v13  ;;  %v6852_v46 = vld [vmem:[#allocation43_spill] sm:$0xff] }
 0x350   :  { %v1569_v44 = vadd.f32 %v1521_v12, %v6852_v46  ;;  %v2837_v11 = vmul.f32 -1.442695, %v1568_v26 }
 0x351   :  { %3128 = vpow2.f32 %v2836_v60 }
 0x352   :  { %v2838_v61 = vmul.f32 -1.442695, %v1569_v44  ;;  %3130 = vpow2.f32 %v2837_v11 }
 0x354   :  { %3132 = vpow2.f32 %v2838_v61  ;;  %v6854_v61 = vld [vmem:[#allocation67_spill] sm:$0xff] }
 0x35c   :  { %v3127_v21 = vpop.eup %3126 }
 0x35d   :  { %v1582_v42 = vadd.f32 1.0, %v3127_v21  ;;  %v6853_v21 = vld [vmem:[#allocation66_spill] sm:$0xff] }
 0x35e   :  { %v3129_v5 = vpop.eup %3128 }
 0x35f   :  { %v1583_v18 = vadd.f32 1.0, %v3129_v5  ;;  %3134 = vrcp.f32 %v1582_v42  ;;  %v3131_v13 = vpop.eup %3130 }
 0x360   :  { %v1584_v19 = vadd.f32 1.0, %v3131_v13 }
 0x361   :  { %3136 = vrcp.f32 %v1583_v18  ;;  %v3133_v14 = vpop.eup %3132 }
 0x362   :  { %v1585_v2 = vadd.f32 1.0, %v3133_v14  ;;  %3138 = vrcp.f32 %v1584_v19 }
 0x364   :  { %3140 = vrcp.f32 %v1585_v2 }
 0x36c   :  { %v3135_v30 = vpop.eup %3134 }
 0x36e   :  { %v3137_v11 = vpop.eup %3136 }
 0x36f   :  { %v3139_v42 = vpop.eup %3138 }
 0x370   :  { %v1600_v13 = vsub.f32 1.0, %v3139_v42 }
 0x371   :  { %v3141_v18 = vpop.eup %3140 }
 0x372   :  { %v1605_v2 = vmul.f32 %v3141_v18, %v4774_v59 }
 0x388   :  { %v1559_v20 = vpop.f32.mrf.mxu1 }
 0x389   :  { %v1560_v63 = vadd.f32 %v1559_v20, %v4449_v49  ;;  %v1601_v20 = vsub.f32 1.0, %v3141_v18  ;;  %v5321_v18 = vld [vmem:[%s6462_s4 + $0x190] ss:$24 sps:$4 sm:$0xff]  }
 0x38a   :  { %v1561_v57 = vpop.f32.mrf.mxu1  ;;  %6863 = vst [vmem:[#allocation41_spill] sm:$0xff] %v5321_v18 }
 0x38b   :  { %v1594_v12 = vmul.f32 %v3135_v30, %v1560_v63  ;;  %v1562_v60 = vadd.f32 %v1561_v57, %v4453_v10  ;;  %v1604_v63 = vmul.f32 %v3139_v42, %v4767_v48  ;;  %v6862_v42 = vld [vmem:[#allocation7_spill] sm:$0xff] }
 0x38c   :  { %v1563_v27 = vpop.f32.mrf.mxu1 }
 0x38d   :  { %v1596_v26 = vadd.f32 %v1594_v12, %v6853_v21  ;;  %v1595_v46 = vmul.f32 %v3137_v11, %v1562_v60 }
 0x38e   :  { %v1564_v44 = vpop.f32.mrf.mxu1 }
 0x38f   :  { %3142 = vtanh.f32 %v1596_v26  ;;  %v1597_v5 = vadd.f32 %v1595_v46, %v6854_v61  ;;  %v5313_v61 = vld [vmem:[%s6462_s4 + $0x194] ss:$24 sps:$4 sm:$0xff]  }
 0x390   :  { %6860 = vst [vmem:[#allocation42_spill] sm:$0xff] %v5313_v61 }
 0x391   :  { %3144 = vtanh.f32 %v1597_v5  ;;  %v6861_v5 = vld [vmem:[#allocation5_spill] sm:$0xff] }
 0x39c   :  { %v3143_v14 = vpop.eup %3142 }
 0x39d   :  { %v1602_v19 = vmul.f32 %v3143_v14, %v1600_v13  ;;  %v6864_v13 = vld [vmem:[#allocation8_spill] sm:$0xff]  ;;  %v6865_v14 = vld [vmem:[#allocation9_spill] sm:$0xff] }
 0x39e   :  { %v3145_v30 = vpop.eup %3144 }
 0x39f   :  { %v1603_v57 = vmul.f32 %v3145_v30, %v1601_v20  ;;  %v1606_v27 = vadd.f32 %v1604_v63, %v1602_v19  ;;  %v6866_v20 = vld [vmem:[#allocation11_spill] sm:$0xff]  ;;  %v6867_v19 = vld [vmem:[#allocation10_spill] sm:$0xff]  ;;  %v6868_v63 = vld [vmem:[#allocation12_spill] sm:$0xff] }
 0x3a0   :  { %v6869_v30 = vld [vmem:[#allocation14_spill] sm:$0xff] }
 0x3a1   :  { %v1607_v12 = vadd.f32 %v1605_v2, %v1603_v57  ;;  %v1612_v60 = vsel %vm2839_vm7, %v1606_v27, 0.0  ;;  %v5148_v11 = vsel %vm2839_vm7, %v1606_v27, %v4767_v48  ;;  %v5299_v48 = vld [vmem:[%s6462_s4 + $0x1c4] ss:$24 sps:$4 sm:$0xff]   ;;  %v6870_v57 = vld [vmem:[#allocation16_spill] sm:$0xff] }
 0x3a2   :  { %2841 = vst [vmem:[%s6466_s8 + $0x20] sm:$0xff] %v1612_v60  ;;  %v5164_v44 = vpack.c.bf16 %v5148_v11, %v5148_v11  ;;  %v6871_v2 = vld [vmem:[#allocation18_spill] sm:$0xff]  ;;  %v6872_v27 = vld [vmem:[#allocation20_spill] sm:$0xff] }
 0x3a3   :  { %v1613_v21 = vsel %vm2840_vm8, %v1607_v12, 0.0  ;;  %v5155_v26 = vsel %vm2840_vm8, %v1607_v12, %v4774_v59  ;;  %v6857_v59 = vld [vmem:[#allocation34_spill] sm:$0xff]  ;;  %v6874_v60 = vld [vmem:[#allocation24_spill] sm:$0xff] }
 0x3a4   :  { %2842 = vst [vmem:[%s6466_s8 + $0x58] sm:$0xff] %v1613_v21  ;;  %v1630_v46 = vpack.c.bf16 %v5155_v26, %v5155_v26  ;;  %v6873_v12 = vld [vmem:[#allocation22_spill] sm:$0xff]  ;;  %v6875_v21 = vld [vmem:[#allocation13_spill] sm:$0xff] }
 0x3a6   :  { %1663 = vmatprep.mubr.bf16.mxu0 %v1630_v46  ;;  %1704 = vmatprep.mubr.bf16.mxu1 %v1630_v46 }
 0x3a7   :  { %1664 = vmatmul.mubr.bf16.vlgmr.msra.gmra.mxu0 %v5164_v44  ;;  %1705 = vmatmul.mubr.bf16.vlgmr.msra.gmra.mxu1 %v5164_v44 }
 0x3a8   :  { %1714 = vmatpush1.bf16.msra.mxu0 %v4790_v25  ;;  %1745 = vmatprep.mubr.bf16.mxu0 %v1630_v46  ;;  %v6876_v46 = vld [vmem:[#allocation15_spill] sm:$0xff] }
 0x3a9   :  { %1715 = vmatprep.subr.bf16.mxu0 %v4796_v32  ;;  %1820 = vmatpush1.bf16.msra.mxu1 %v4504_v39  ;;  %v5195_v39 = vld [vmem:[%s6462_s4 + $0x40] ss:$24 sps:$4 sm:$0xff]  }
 0x3aa   :  { %1821 = vmatprep.subr.bf16.mxu1 %v4510_v29  ;;  %v5201_v29 = vld [vmem:[%s6462_s4 + $0x14] ss:$24 sps:$4 sm:$0xff]  }
 0x3ac   :  { %1716 = vmatpush1.bf16.msra.mxu0 %v4804_v0 }
 0x3ad   :  { %1717 = vmatprep.subr.bf16.mxu0 %v4810_v53  ;;  %1822 = vmatpush1.bf16.msra.mxu1 %v4518_v1  ;;  %v5209_v1 = vld [vmem:[%s6462_s4 + $0x10] ss:$24 sps:$4 sm:$0xff]  }
 0x3ae   :  { %1823 = vmatprep.subr.bf16.mxu1 %v4524_v40  ;;  %v5215_v40 = vld [vmem:[%s6462_s4 + $0x2e4] ss:$24 sps:$4 sm:$0xff]  }
 0x3b0   :  { %1718 = vmatpush1.bf16.msra.mxu0 %v4818_v3 }
 0x3b1   :  { %1719 = vmatprep.subr.bf16.mxu0 %v4824_v58  ;;  %1824 = vmatpush1.bf16.msra.mxu1 %v4532_v45  ;;  %v5223_v45 = vld [vmem:[%s6462_s4 + $0x2e0] ss:$24 sps:$4 sm:$0xff]  }
 0x3b2   :  { %1825 = vmatprep.subr.bf16.mxu1 %v4538_v36  ;;  %v5229_v36 = vld [vmem:[%s6462_s4 + $0x2b4] ss:$24 sps:$4 sm:$0xff]  }
 0x3b4   :  { %1720 = vmatpush1.bf16.msra.mxu0 %v4832_v54 }
 0x3b5   :  { %1721 = vmatprep.subr.bf16.mxu0 %v4838_v56  ;;  %1826 = vmatpush1.bf16.msra.mxu1 %v4546_v34  ;;  %v5237_v34 = vld [vmem:[%s6462_s4 + $0x2b0] ss:$24 sps:$4 sm:$0xff]  }
 0x3b6   :  { %1827 = vmatprep.subr.bf16.mxu1 %v4552_v43  ;;  %v5243_v43 = vld [vmem:[%s6462_s4 + $0x284] ss:$24 sps:$4 sm:$0xff]  }
 0x3b8   :  { %1722 = vmatpush1.bf16.msra.mxu0 %v4846_v52 }
 0x3b9   :  { %1723 = vmatprep.subr.bf16.mxu0 %v4852_v51  ;;  %1828 = vmatpush1.bf16.msra.mxu1 %v4560_v28  ;;  %v5251_v28 = vld [vmem:[%s6462_s4 + $0x280] ss:$24 sps:$4 sm:$0xff]  }
 0x3ba   :  { %1829 = vmatprep.subr.bf16.mxu1 %v4566_v23  ;;  %v5257_v23 = vld [vmem:[%s6462_s4 + $0x254] ss:$24 sps:$4 sm:$0xff]  }
 0x3bc   :  { %1724 = vmatpush1.bf16.msra.mxu0 %v4860_v55 }
 0x3bd   :  { %1725 = vmatprep.subr.bf16.mxu0 %v4866_v62  ;;  %1830 = vmatpush1.bf16.msra.mxu1 %v4574_v37  ;;  %v5271_v37 = vld [vmem:[%s6462_s4 + $0x224] ss:$24 sps:$4 sm:$0xff]  }
 0x3be   :  { %1831 = vmatprep.subr.bf16.mxu1 %v4580_v9  ;;  %v5279_v9 = vld [vmem:[%s6462_s4 + $0x220] ss:$24 sps:$4 sm:$0xff]  }
 0x3c0   :  { %1726 = vmatpush1.bf16.msra.mxu0 %v5195_v39 }
 0x3c1   :  { %1727 = vmatprep.subr.bf16.mxu0 %v5201_v29  ;;  %1832 = vmatpush1.bf16.msra.mxu1 %v6806_v8  ;;  %v6858_v8 = vld [vmem:[#allocation3_spill] sm:$0xff] }
 0x3c2   :  { %1833 = vmatprep.subr.bf16.mxu1 %v4594_v47  ;;  %v6855_v47 = vld [vmem:[#allocation28_spill] sm:$0xff] }
 0x3c4   :  { %1728 = vmatpush1.bf16.msra.mxu0 %v5209_v1 }
 0x3c5   :  { %1729 = vmatprep.subr.bf16.mxu0 %v5215_v40  ;;  %1834 = vmatpush1.bf16.msra.mxu1 %v6808_v50  ;;  %v5307_v50 = vld [vmem:[%s6462_s4 + $0x1c0] ss:$24 sps:$4 sm:$0xff]  }
 0x3c6   :  { %1835 = vmatprep.subr.bf16.mxu1 %v4608_v15  ;;  %v5285_v15 = vld [vmem:[%s6462_s4 + $0x1f4] ss:$24 sps:$4 sm:$0xff]   ;;  %6859 = vst [vmem:[#allocation40_spill] sm:$0xff] %v5307_v50 }
 0x3c8   :  { %1730 = vmatpush2.bf16.msra.mxu0 %v5223_v45 }
 0x3c9   :  { %1731 = vmatprep.subr.bf16.mxu0 %v5229_v36  ;;  %1836 = vmatpush2.bf16.msra.mxu1 %v4616_v35  ;;  %v6856_v35 = vld [vmem:[#allocation32_spill] sm:$0xff] }
 0x3ca   :  { %1837 = vmatprep.subr.bf16.mxu1 %v4622_v6  ;;  %v5293_v6 = vld [vmem:[%s6462_s4 + $0x1f0] ss:$24 sps:$4 sm:$0xff]  }
 0x3cc   :  { %1732 = vmatpush2.bf16.msra.mxu0 %v5237_v34 }
 0x3cd   :  { %1733 = vmatprep.subr.bf16.mxu0 %v5243_v43  ;;  %1838 = vmatpush2.bf16.msra.mxu1 %v4630_v22  ;;  %v5265_v22 = vld [vmem:[%s6462_s4 + $0x250] ss:$24 sps:$4 sm:$0xff]  }
 0x3ce   :  { %1839 = vmatprep.subr.bf16.mxu1 %v4889_v33 }
 0x3d0   :  { %1734 = vmatpush2.bf16.msra.mxu0 %v5251_v28 }
 0x3d1   :  { %1735 = vmatprep.subr.bf16.mxu0 %v5257_v23  ;;  %1840 = vmatpush2.bf16.msra.mxu1 %v4897_v17 }
 0x3d2   :  { %1841 = vmatprep.subr.bf16.mxu1 %v4903_v24 }
 0x3d4   :  { %1736 = vmatpush2.bf16.msra.mxu0 %v5265_v22 }
 0x3d5   :  { %1737 = vmatprep.subr.bf16.mxu0 %v5271_v37  ;;  %1842 = vmatpush2.bf16.msra.mxu1 %v4911_v7 }
 0x3d6   :  { %1843 = vmatprep.subr.bf16.mxu1 %v4917_v16 }
 0x3d8   :  { %1738 = vmatpush2.bf16.msra.mxu0 %v5279_v9 }
 0x3d9   :  { %1739 = vmatprep.subr.bf16.mxu0 %v5285_v15  ;;  %1844 = vmatpush2.bf16.msra.mxu1 %v6855_v47 }
 0x3da   :  { %1845 = vmatprep.subr.bf16.mxu1 %v6856_v35 }
 0x3dc   :  { %1740 = vmatpush2.bf16.msra.mxu0 %v5293_v6 }
 0x3dd   :  { %1741 = vmatprep.subr.bf16.mxu0 %v5299_v48  ;;  %1846 = vmatpush2.bf16.msra.mxu1 %v6857_v59 }
 0x3de   :  { %1847 = vmatprep.subr.bf16.mxu1 %v6858_v8 }
 0x3e0   :  { %1742 = vmatpush2.bf16.msra.mxu0 %v5307_v50 }
 0x3e1   :  { %1743 = vmatprep.subr.bf16.mxu0 %v5313_v61  ;;  %1848 = vmatpush2.bf16.msra.mxu1 %v6861_v5  ;;  %v6901_v5 = vld [vmem:[#allocation46_spill] sm:$0xff] }
 0x3e2   :  { %1849 = vmatprep.subr.bf16.mxu1 %v6862_v42  ;;  %v6900_v42 = vld [vmem:[#allocation44_spill] sm:$0xff] }
 0x3e4   :  { %1744 = vmatpush2.bf16.msra.mxu0 %v5321_v18  ;;  %v6899_v18 = vld [vmem:[#allocation78_spill] sm:$0xff] }
 0x3e5   :  { %1860 = vmatprep.subr.bf16.mxu0 %v6864_v13  ;;  %1850 = vmatpush2.bf16.msra.mxu1 %v6865_v14  ;;  %v6878_v13 = vld [vmem:[#allocation19_spill] sm:$0xff] }
 0x3e6   :  { %1901 = vmatprep.subr.bf16.mxu1 %v6866_v20 }
 0x3e7   :  { %1746 = vmatmul.mubr.bf16.vlgmr.msra.gmra.mxu0 %v5164_v44  ;;  %v6877_v44 = vld [vmem:[#allocation17_spill] sm:$0xff] }
 0x3e8   :  { %1861 = vmatpush1.bf16.msra.mxu0 %v6867_v19  ;;  %v6879_v19 = vld [vmem:[#allocation21_spill] sm:$0xff] }
 0x3e9   :  { %1862 = vmatprep.subr.bf16.mxu0 %v6868_v63  ;;  %v6880_v63 = vld [vmem:[#allocation23_spill] sm:$0xff] }
 0x3ec   :  { %1863 = vmatpush1.bf16.msra.mxu0 %v6869_v30  ;;  %v6881_v30 = vld [vmem:[#allocation25_spill] sm:$0xff] }
 0x3ed   :  { %1864 = vmatprep.subr.bf16.mxu0 %v6870_v57  ;;  %v6882_v57 = vld [vmem:[#allocation27_spill] sm:$0xff] }
 0x3f0   :  { %1865 = vmatpush1.bf16.msra.mxu0 %v6871_v2  ;;  %v6883_v2 = vld [vmem:[#allocation29_spill] sm:$0xff] }
 0x3f1   :  { %1866 = vmatprep.subr.bf16.mxu0 %v6872_v27  ;;  %v6884_v27 = vld [vmem:[#allocation31_spill] sm:$0xff] }
 0x3f4   :  { %1867 = vmatpush1.bf16.msra.mxu0 %v6873_v12  ;;  %v6885_v12 = vld [vmem:[#allocation37_spill] sm:$0xff] }
 0x3f5   :  { %1868 = vmatprep.subr.bf16.mxu0 %v6874_v60  ;;  %v6886_v60 = vld [vmem:[#allocation39_spill] sm:$0xff] }
 0x3f8   :  { %1869 = vmatpush1.bf16.msra.mxu0 %v6875_v21 }
 0x3f9   :  { %1870 = vmatprep.subr.bf16.mxu0 %v6876_v46  ;;  %v6887_v46 = vld [vmem:[#allocation36_spill] sm:$0xff] }
 0x3fc   :  { %1871 = vmatpush1.bf16.msra.mxu0 %v6877_v44  ;;  %v6888_v44 = vld [vmem:[#allocation38_spill] sm:$0xff] }
 0x3fd   :  { %1872 = vmatprep.subr.bf16.mxu0 %v6878_v13  ;;  %v6889_v13 = vld [vmem:[#allocation64_spill] sm:$0xff] }
 0x400   :  { %1873 = vmatpush1.bf16.msra.mxu0 %v6879_v19  ;;  %v6890_v19 = vld [vmem:[#allocation65_spill] sm:$0xff] }
 0x401   :  { %1874 = vmatprep.subr.bf16.mxu0 %v6880_v63  ;;  %v6891_v63 = vld [vmem:[#allocation30_spill] sm:$0xff] }
 0x404   :  { %1875 = vmatpush1.bf16.msra.mxu0 %v6881_v30  ;;  %v6892_v30 = vld [vmem:[#allocation4_spill] sm:$0xff] }
 0x405   :  { %1876 = vmatprep.subr.bf16.mxu0 %v6882_v57  ;;  %v6893_v57 = vld [vmem:[#allocation33_spill] sm:$0xff] }
 0x408   :  { %1877 = vmatpush2.bf16.msra.mxu0 %v6883_v2  ;;  %v6894_v2 = vld [vmem:[#allocation6_spill] sm:$0xff] }
 0x409   :  { %1878 = vmatprep.subr.bf16.mxu0 %v6884_v27  ;;  %v6895_v27 = vld [vmem:[#allocation35_spill] sm:$0xff] }
 0x40c   :  { %1879 = vmatpush2.bf16.msra.mxu0 %v6885_v12  ;;  %v6896_v12 = vld [vmem:[#allocation79_spill] sm:$0xff] }
 0x40d   :  { %1880 = vmatprep.subr.bf16.mxu0 %v6886_v60  ;;  %v6897_v60 = vld [vmem:[#allocation80_spill] sm:$0xff] }
 0x410   :  { %1881 = vmatpush2.bf16.msra.mxu0 %v6887_v46  ;;  %v6898_v46 = vld [vmem:[#allocation26_spill] sm:$0xff] }
 0x411   :  { %1882 = vmatprep.subr.bf16.mxu0 %v6888_v44 }
 0x414   :  { %1883 = vmatpush2.bf16.msra.mxu0 %v6889_v13 }
 0x415   :  { %1884 = vmatprep.subr.bf16.mxu0 %v6890_v19 }
 0x418   :  { %1885 = vmatpush2.bf16.msra.mxu0 %v6891_v63 }
 0x419   :  { %1886 = vmatprep.subr.bf16.mxu0 %v6892_v30 }
 0x41c   :  { %1887 = vmatpush2.bf16.msra.mxu0 %v6893_v57 }
 0x41d   :  { %1888 = vmatprep.subr.bf16.mxu0 %v6894_v2 }
 0x420   :  { %1889 = vmatpush2.bf16.msra.mxu0 %v6895_v27 }
 0x421   :  { %1890 = vmatprep.subr.bf16.mxu0 %v6896_v12 }
 0x424   :  { %1891 = vmatpush2.bf16.msra.mxu0 %v6897_v60 }
 0x425   :  { %2005 = vmatprep.subr.bf16.mxu0 %v6898_v46 }
 0x467   :  { %v1665_v44 = vpop.f32.mrf.mxu0  ;;  %v1706_v13 = vpop.f32.mrf.mxu1 }
 0x468   :  { %v1666_v57 = vadd.f32 %v1665_v44, %v6899_v18  ;;  %v1707_v46 = vadd.f32 %v1706_v13, %v4435_v4 }
 0x469   :  { %v1667_v21 = vpop.f32.mrf.mxu0  ;;  %v1708_v19 = vpop.f32.mrf.mxu1 }
 0x46a   :  { %v1668_v2 = vadd.f32 %v1667_v21, %v4425_v38  ;;  %v1754_v27 = vadd.f32 %v1666_v57, %v6900_v42  ;;  %v1709_v50 = vadd.f32 %v1708_v19, %v4439_v31 }
 0x46b   :  { %v1669_v20 = vpop.f32.mrf.mxu0  ;;  %v1710_v63 = vpop.f32.mrf.mxu1 }
 0x46c   :  { %v1755_v12 = vadd.f32 %v1668_v2, %v6901_v5  ;;  %v2843_v61 = vmul.f32 -1.442695, %v1754_v27  ;;  %v6902_v20 = vld [vmem:[#allocation45_spill] sm:$0xff] }
 0x46d   :  { %v1670_v14 = vpop.f32.mrf.mxu0  ;;  %v1711_v30 = vpop.f32.mrf.mxu1  ;;  %v1756_v63 = vadd.f32 %v1707_v46, %v6902_v20 }
 0x46e   :  { %v2844_v60 = vmul.f32 -1.442695, %v1755_v12  ;;  %3146 = vpow2.f32 %v2843_v61  ;;  %v6903_v14 = vld [vmem:[#allocation47_spill] sm:$0xff] }
 0x46f   :  { %v1757_v30 = vadd.f32 %v1709_v50, %v6903_v14  ;;  %v2845_v8 = vmul.f32 -1.442695, %v1756_v63 }
 0x470   :  { %3148 = vpow2.f32 %v2844_v60 }
 0x471   :  { %v2846_v44 = vmul.f32 -1.442695, %v1757_v30  ;;  %3150 = vpow2.f32 %v2845_v8 }
 0x473   :  { %3152 = vpow2.f32 %v2846_v44  ;;  %v6905_v44 = vld [vmem:[#allocation69_spill] sm:$0xff] }
 0x47b   :  { %v3147_v18 = vpop.eup %3146 }
 0x47c   :  { %v1770_v42 = vadd.f32 1.0, %v3147_v18  ;;  %v6904_v18 = vld [vmem:[#allocation68_spill] sm:$0xff] }
 0x47d   :  { %v3149_v21 = vpop.eup %3148 }
 0x47e   :  { %v1771_v5 = vadd.f32 1.0, %v3149_v21  ;;  %3154 = vrcp.f32 %v1770_v42  ;;  %v3151_v61 = vpop.eup %3150 }
 0x47f   :  { %v1772_v13 = vadd.f32 1.0, %v3151_v61 }
 0x480   :  { %3156 = vrcp.f32 %v1771_v5  ;;  %v3153_v57 = vpop.eup %3152 }
 0x481   :  { %v1773_v27 = vadd.f32 1.0, %v3153_v57  ;;  %3158 = vrcp.f32 %v1772_v13 }
 0x483   :  { %3160 = vrcp.f32 %v1773_v27 }
 0x48b   :  { %v3155_v12 = vpop.eup %3154 }
 0x48d   :  { %v3157_v8 = vpop.eup %3156 }
 0x48e   :  { %v3159_v42 = vpop.eup %3158 }
 0x48f   :  { %v1788_v61 = vsub.f32 1.0, %v3159_v42 }
 0x490   :  { %v3161_v5 = vpop.eup %3160 }
 0x491   :  { %v1793_v27 = vmul.f32 %v3161_v5, %v5155_v26 }
 0x4a7   :  { %v1747_v2 = vpop.f32.mrf.mxu0 }
 0x4a8   :  { %v1748_v19 = vadd.f32 %v1747_v2, %v4449_v49  ;;  %v1789_v2 = vsub.f32 1.0, %v3161_v5  ;;  %v5527_v5 = vld [vmem:[%s6462_s4 + $0x2a4] ss:$24 sps:$4 sm:$0xff]  }
 0x4a9   :  { %v1749_v60 = vpop.f32.mrf.mxu0 }
 0x4aa   :  { %v1782_v50 = vmul.f32 %v3155_v12, %v1748_v19  ;;  %v1750_v46 = vadd.f32 %v1749_v60, %v4453_v10  ;;  %v1792_v19 = vmul.f32 %v3159_v42, %v5148_v11  ;;  %v5521_v42 = vld [vmem:[%s6462_s4 + $0x2d0] ss:$24 sps:$4 sm:$0xff]  }
 0x4ab   :  { %v1751_v20 = vpop.f32.mrf.mxu0 }
 0x4ac   :  { %v1784_v63 = vadd.f32 %v1782_v50, %v6904_v18  ;;  %v1783_v14 = vmul.f32 %v3157_v8, %v1750_v46 }
 0x4ad   :  { %v1752_v30 = vpop.f32.mrf.mxu0 }
 0x4ae   :  { %3162 = vtanh.f32 %v1784_v63  ;;  %v1785_v21 = vadd.f32 %v1783_v14, %v6905_v44  ;;  %v5507_v44 = vld [vmem:[%s6462_s4] ss:$24 sps:$4 sm:$0xff]  }
 0x4b0   :  { %3164 = vtanh.f32 %v1785_v21  ;;  %v5513_v21 = vld [vmem:[%s6462_s4 + $0x2d4] ss:$24 sps:$4 sm:$0xff]  }
 0x4bb   :  { %v3163_v57 = vpop.eup %3162 }
 0x4bc   :  { %v1790_v13 = vmul.f32 %v3163_v57, %v1788_v61  ;;  %v5535_v61 = vld [vmem:[%s6462_s4 + $0x2a0] ss:$24 sps:$4 sm:$0xff]   ;;  %v6911_v57 = vld [vmem:[#allocation41_spill] sm:$0xff] }
 0x4bd   :  { %v3165_v12 = vpop.eup %3164 }
 0x4be   :  { %v1791_v60 = vmul.f32 %v3165_v12, %v1789_v2  ;;  %v1794_v20 = vadd.f32 %v1792_v19, %v1790_v13  ;;  %v5572_v2 = vld [vmem:[%s6462_s4 + $0x158] ss:$24 sps:$4 sm:$0xff]   ;;  %v5578_v13 = vld [vmem:[%s6462_s4 + $0x12c] ss:$24 sps:$4 sm:$0xff]   ;;  %v5584_v19 = vld [vmem:[%s6462_s4 + $0x128] ss:$24 sps:$4 sm:$0xff]  }
 0x4bf   :  { %6915 = vst [vmem:[#allocation66_spill] sm:$0xff] %v5572_v2  ;;  %6916 = vst [vmem:[#allocation67_spill] sm:$0xff] %v5578_v13  ;;  %v5590_v12 = vld [vmem:[%s6462_s4 + $0xfc] ss:$24 sps:$4 sm:$0xff]  }
 0x4c0   :  { %v1795_v50 = vadd.f32 %v1793_v27, %v1791_v60  ;;  %v1800_v46 = vsel %vm2847_vm9, %v1794_v20, 0.0  ;;  %v5384_v8 = vsel %vm2847_vm9, %v1794_v20, %v5148_v11  ;;  %v5409_v11 = vld [vmem:[%s6462_s4 + $0x150] ss:$24 sps:$4 sm:$0xff]   ;;  %6917 = vst [vmem:[#allocation28_spill] sm:$0xff] %v5584_v19  ;;  %6918 = vst [vmem:[#allocation32_spill] sm:$0xff] %v5590_v12 }
 0x4c1   :  { %2849 = vst [vmem:[%s6466_s8 + $0x30] sm:$0xff] %v1800_v46  ;;  %v5400_v30 = vpack.c.bf16 %v5384_v8, %v5384_v8  ;;  %v5596_v60 = vld [vmem:[%s6462_s4 + $0xf8] ss:$24 sps:$4 sm:$0xff]   ;;  %v5602_v27 = vld [vmem:[%s6462_s4 + $0xcc] ss:$24 sps:$4 sm:$0xff]  }
 0x4c2   :  { %v1801_v18 = vsel %vm2848_vm10, %v1795_v50, 0.0  ;;  %v5391_v63 = vsel %vm2848_vm10, %v1795_v50, %v5155_v26  ;;  %v5415_v26 = vld [vmem:[%s6462_s4 + $0x124] ss:$24 sps:$4 sm:$0xff]   ;;  %6919 = vst [vmem:[#allocation34_spill] sm:$0xff] %v5596_v60  ;;  %6920 = vst [vmem:[#allocation8_spill] sm:$0xff] %v5602_v27  ;;  %v6923_v46 = vld [vmem:[#allocation13_spill] sm:$0xff] }
 0x4c3   :  { %2850 = vst [vmem:[%s6466_s8 + $0x48] sm:$0xff] %v1801_v18  ;;  %v1818_v14 = vpack.c.bf16 %v5391_v63, %v5391_v63  ;;  %v5608_v20 = vld [vmem:[%s6462_s4 + $0xc8] ss:$24 sps:$4 sm:$0xff]   ;;  %v5614_v50 = vld [vmem:[%s6462_s4 + $0x9c] ss:$24 sps:$4 sm:$0xff]  }
 0x4c4   :  { %6921 = vst [vmem:[#allocation10_spill] sm:$0xff] %v5608_v20  ;;  %6922 = vst [vmem:[#allocation12_spill] sm:$0xff] %v5614_v50  ;;  %v6924_v18 = vld [vmem:[#allocation15_spill] sm:$0xff] }
 0x4c5   :  { %1851 = vmatprep.mubr.bf16.mxu1 %v1818_v14  ;;  %1892 = vmatprep.mubr.bf16.mxu0 %v1818_v14 }
 0x4c6   :  { %1852 = vmatmul.mubr.bf16.vlgmr.msra.gmra.mxu1 %v5400_v30  ;;  %1893 = vmatmul.mubr.bf16.vlgmr.msra.gmra.mxu0 %v5400_v30 }
 0x4c7   :  { %1902 = vmatpush1.bf16.msra.mxu1 %v4790_v25  ;;  %1933 = vmatprep.mubr.bf16.mxu1 %v1818_v14  ;;  %v5423_v25 = vld [vmem:[%s6462_s4 + $0x120] ss:$24 sps:$4 sm:$0xff]   ;;  %v6925_v14 = vld [vmem:[#allocation17_spill] sm:$0xff] }
 0x4c8   :  { %1903 = vmatprep.subr.bf16.mxu1 %v4796_v32  ;;  %2006 = vmatpush1.bf16.msra.mxu0 %v5409_v11  ;;  %v5429_v32 = vld [vmem:[%s6462_s4 + $0xf4] ss:$24 sps:$4 sm:$0xff]  }
 0x4c9   :  { %2007 = vmatprep.subr.bf16.mxu0 %v5415_v26 }
 0x4cb   :  { %1904 = vmatpush1.bf16.msra.mxu1 %v4804_v0  ;;  %v5437_v0 = vld [vmem:[%s6462_s4 + $0xf0] ss:$24 sps:$4 sm:$0xff]  }
 0x4cc   :  { %1905 = vmatprep.subr.bf16.mxu1 %v4810_v53  ;;  %2008 = vmatpush1.bf16.msra.mxu0 %v5423_v25  ;;  %v5443_v53 = vld [vmem:[%s6462_s4 + $0xc4] ss:$24 sps:$4 sm:$0xff]  }
 0x4cd   :  { %2009 = vmatprep.subr.bf16.mxu0 %v5429_v32 }
 0x4cf   :  { %1906 = vmatpush1.bf16.msra.mxu1 %v4818_v3  ;;  %v5451_v3 = vld [vmem:[%s6462_s4 + $0xc0] ss:$24 sps:$4 sm:$0xff]  }
 0x4d0   :  { %1907 = vmatprep.subr.bf16.mxu1 %v4824_v58  ;;  %2010 = vmatpush1.bf16.msra.mxu0 %v5437_v0  ;;  %v5457_v58 = vld [vmem:[%s6462_s4 + $0x94] ss:$24 sps:$4 sm:$0xff]  }
 0x4d1   :  { %2011 = vmatprep.subr.bf16.mxu0 %v5443_v53 }
 0x4d3   :  { %1908 = vmatpush1.bf16.msra.mxu1 %v4832_v54  ;;  %v5465_v54 = vld [vmem:[%s6462_s4 + $0x90] ss:$24 sps:$4 sm:$0xff]  }
 0x4d4   :  { %1909 = vmatprep.subr.bf16.mxu1 %v4838_v56  ;;  %2012 = vmatpush1.bf16.msra.mxu0 %v5451_v3  ;;  %v5471_v56 = vld [vmem:[%s6462_s4 + $0x64] ss:$24 sps:$4 sm:$0xff]  }
 0x4d5   :  { %2013 = vmatprep.subr.bf16.mxu0 %v5457_v58 }
 0x4d7   :  { %1910 = vmatpush1.bf16.msra.mxu1 %v4846_v52  ;;  %v5479_v52 = vld [vmem:[%s6462_s4 + $0x60] ss:$24 sps:$4 sm:$0xff]  }
 0x4d8   :  { %1911 = vmatprep.subr.bf16.mxu1 %v4852_v51  ;;  %2014 = vmatpush1.bf16.msra.mxu0 %v5465_v54  ;;  %v5485_v51 = vld [vmem:[%s6462_s4 + $0x34] ss:$24 sps:$4 sm:$0xff]  }
 0x4d9   :  { %2015 = vmatprep.subr.bf16.mxu0 %v5471_v56 }
 0x4db   :  { %1912 = vmatpush1.bf16.msra.mxu1 %v4860_v55  ;;  %v5493_v55 = vld [vmem:[%s6462_s4 + $0x30] ss:$24 sps:$4 sm:$0xff]  }
 0x4dc   :  { %1913 = vmatprep.subr.bf16.mxu1 %v4866_v62  ;;  %2016 = vmatpush1.bf16.msra.mxu0 %v5479_v52  ;;  %v5499_v62 = vld [vmem:[%s6462_s4 + $0x4] ss:$24 sps:$4 sm:$0xff]  }
 0x4dd   :  { %2017 = vmatprep.subr.bf16.mxu0 %v5485_v51 }
 0x4df   :  { %1914 = vmatpush1.bf16.msra.mxu1 %v5195_v39 }
 0x4e0   :  { %1915 = vmatprep.subr.bf16.mxu1 %v5201_v29  ;;  %2018 = vmatpush1.bf16.msra.mxu0 %v5493_v55 }
 0x4e1   :  { %2019 = vmatprep.subr.bf16.mxu0 %v5499_v62 }
 0x4e3   :  { %1916 = vmatpush1.bf16.msra.mxu1 %v5209_v1 }
 0x4e4   :  { %1917 = vmatprep.subr.bf16.mxu1 %v5215_v40  ;;  %2020 = vmatpush1.bf16.msra.mxu0 %v5507_v44 }
 0x4e5   :  { %2021 = vmatprep.subr.bf16.mxu0 %v5513_v21 }
 0x4e7   :  { %1918 = vmatpush2.bf16.msra.mxu1 %v5223_v45 }
 0x4e8   :  { %1919 = vmatprep.subr.bf16.mxu1 %v5229_v36  ;;  %2022 = vmatpush2.bf16.msra.mxu0 %v5521_v42 }
 0x4e9   :  { %2023 = vmatprep.subr.bf16.mxu0 %v5527_v5 }
 0x4eb   :  { %1920 = vmatpush2.bf16.msra.mxu1 %v5237_v34 }
 0x4ec   :  { %1921 = vmatprep.subr.bf16.mxu1 %v5243_v43  ;;  %2024 = vmatpush2.bf16.msra.mxu0 %v5535_v61 }
 0x4ed   :  { %2025 = vmatprep.subr.bf16.mxu0 %v4889_v33  ;;  %v6906_v33 = vld [vmem:[#allocation3_spill] sm:$0xff] }
 0x4ef   :  { %1922 = vmatpush2.bf16.msra.mxu1 %v5251_v28 }
 0x4f0   :  { %1923 = vmatprep.subr.bf16.mxu1 %v5257_v23  ;;  %2026 = vmatpush2.bf16.msra.mxu0 %v4897_v17  ;;  %v6907_v17 = vld [vmem:[#allocation40_spill] sm:$0xff] }
 0x4f1   :  { %2027 = vmatprep.subr.bf16.mxu0 %v4903_v24  ;;  %v6908_v24 = vld [vmem:[#allocation42_spill] sm:$0xff] }
 0x4f3   :  { %1924 = vmatpush2.bf16.msra.mxu1 %v5265_v22 }
 0x4f4   :  { %1925 = vmatprep.subr.bf16.mxu1 %v5271_v37  ;;  %2028 = vmatpush2.bf16.msra.mxu0 %v4911_v7  ;;  %v6909_v7 = vld [vmem:[#allocation5_spill] sm:$0xff] }
 0x4f5   :  { %2029 = vmatprep.subr.bf16.mxu0 %v4917_v16  ;;  %v6910_v16 = vld [vmem:[#allocation7_spill] sm:$0xff] }
 0x4f7   :  { %1926 = vmatpush2.bf16.msra.mxu1 %v5279_v9 }
 0x4f8   :  { %1927 = vmatprep.subr.bf16.mxu1 %v5285_v15  ;;  %2030 = vmatpush2.bf16.msra.mxu0 %v6855_v47  ;;  %v5563_v47 = vld [vmem:[%s6462_s4 + $0x15c] ss:$24 sps:$4 sm:$0xff]  }
 0x4f9   :  { %2031 = vmatprep.subr.bf16.mxu0 %v6856_v35  ;;  %6912 = vst [vmem:[#allocation43_spill] sm:$0xff] %v5563_v47  ;;  %v6913_v35 = vld [vmem:[#allocation9_spill] sm:$0xff] }
 0x4fb   :  { %1928 = vmatpush2.bf16.msra.mxu1 %v5293_v6 }
 0x4fc   :  { %1929 = vmatprep.subr.bf16.mxu1 %v5299_v48  ;;  %2032 = vmatpush2.bf16.msra.mxu0 %v6857_v59  ;;  %v6914_v59 = vld [vmem:[#allocation11_spill] sm:$0xff] }
 0x4fd   :  { %2033 = vmatprep.subr.bf16.mxu0 %v6906_v33  ;;  %v6927_v33 = vld [vmem:[#allocation21_spill] sm:$0xff] }
 0x4ff   :  { %1930 = vmatpush2.bf16.msra.mxu1 %v6907_v17 }
 0x500   :  { %1931 = vmatprep.subr.bf16.mxu1 %v6908_v24  ;;  %2034 = vmatpush2.bf16.msra.mxu0 %v6909_v7  ;;  %v6928_v7 = vld [vmem:[#allocation23_spill] sm:$0xff] }
 0x501   :  { %2035 = vmatprep.subr.bf16.mxu0 %v6910_v16  ;;  %v6929_v16 = vld [vmem:[#allocation25_spill] sm:$0xff] }
 0x503   :  { %1932 = vmatpush2.bf16.msra.mxu1 %v6911_v57 }
 0x504   :  { %2046 = vmatprep.subr.bf16.mxu1 %v5563_v47  ;;  %2036 = vmatpush2.bf16.msra.mxu0 %v6913_v35  ;;  %v6930_v35 = vld [vmem:[#allocation27_spill] sm:$0xff] }
 0x505   :  { %2087 = vmatprep.subr.bf16.mxu0 %v6914_v59  ;;  %v6931_v59 = vld [vmem:[#allocation29_spill] sm:$0xff] }
 0x506   :  { %1934 = vmatmul.mubr.bf16.vlgmr.msra.gmra.mxu1 %v5400_v30  ;;  %v6926_v30 = vld [vmem:[#allocation19_spill] sm:$0xff] }
 0x507   :  { %2047 = vmatpush1.bf16.msra.mxu1 %v5572_v2 }
 0x508   :  { %2048 = vmatprep.subr.bf16.mxu1 %v5578_v13 }
 0x50b   :  { %2049 = vmatpush1.bf16.msra.mxu1 %v5584_v19  ;;  %v6949_v19 = vld [vmem:[#allocation50_spill] sm:$0xff] }
 0x50c   :  { %2050 = vmatprep.subr.bf16.mxu1 %v5590_v12 }
 0x50f   :  { %2051 = vmatpush1.bf16.msra.mxu1 %v5596_v60 }
 0x510   :  { %2052 = vmatprep.subr.bf16.mxu1 %v5602_v27 }
 0x513   :  { %2053 = vmatpush1.bf16.msra.mxu1 %v5608_v20  ;;  %v6932_v20 = vld [vmem:[#allocation31_spill] sm:$0xff] }
 0x514   :  { %2054 = vmatprep.subr.bf16.mxu1 %v5614_v50  ;;  %v6933_v50 = vld [vmem:[#allocation37_spill] sm:$0xff] }
 0x517   :  { %2055 = vmatpush1.bf16.msra.mxu1 %v6923_v46  ;;  %v6934_v46 = vld [vmem:[#allocation39_spill] sm:$0xff] }
 0x518   :  { %2056 = vmatprep.subr.bf16.mxu1 %v6924_v18  ;;  %v6935_v18 = vld [vmem:[#allocation36_spill] sm:$0xff] }
 0x51b   :  { %2057 = vmatpush1.bf16.msra.mxu1 %v6925_v14  ;;  %v6936_v14 = vld [vmem:[#allocation38_spill] sm:$0xff] }
 0x51c   :  { %2058 = vmatprep.subr.bf16.mxu1 %v6926_v30  ;;  %v6937_v30 = vld [vmem:[#allocation64_spill] sm:$0xff] }
 0x51f   :  { %2059 = vmatpush1.bf16.msra.mxu1 %v6927_v33  ;;  %v6938_v33 = vld [vmem:[#allocation65_spill] sm:$0xff] }
 0x520   :  { %2060 = vmatprep.subr.bf16.mxu1 %v6928_v7  ;;  %v6939_v7 = vld [vmem:[#allocation30_spill] sm:$0xff] }
 0x523   :  { %2061 = vmatpush1.bf16.msra.mxu1 %v6929_v16  ;;  %v6940_v16 = vld [vmem:[#allocation4_spill] sm:$0xff] }
 0x524   :  { %2062 = vmatprep.subr.bf16.mxu1 %v6930_v35  ;;  %v6941_v35 = vld [vmem:[#allocation33_spill] sm:$0xff] }
 0x527   :  { %2063 = vmatpush2.bf16.msra.mxu1 %v6931_v59  ;;  %v6942_v59 = vld [vmem:[#allocation6_spill] sm:$0xff] }
 0x528   :  { %2064 = vmatprep.subr.bf16.mxu1 %v6932_v20  ;;  %v6943_v20 = vld [vmem:[#allocation35_spill] sm:$0xff] }
 0x52b   :  { %2065 = vmatpush2.bf16.msra.mxu1 %v6933_v50  ;;  %v6944_v50 = vld [vmem:[#allocation79_spill] sm:$0xff] }
 0x52c   :  { %2066 = vmatprep.subr.bf16.mxu1 %v6934_v46  ;;  %v6945_v46 = vld [vmem:[#allocation80_spill] sm:$0xff] }
 0x52f   :  { %2067 = vmatpush2.bf16.msra.mxu1 %v6935_v18  ;;  %v5643_v18 = vld [vmem:[%s6462_s4 + $0x154] ss:$24 sps:$4 sm:$0xff]  }
 0x530   :  { %2068 = vmatprep.subr.bf16.mxu1 %v6936_v14  ;;  %6946 = vst [vmem:[#allocation14_spill] sm:$0xff] %v5643_v18 }
 0x533   :  { %2069 = vmatpush2.bf16.msra.mxu1 %v6937_v30 }
 0x534   :  { %2070 = vmatprep.subr.bf16.mxu1 %v6938_v33 }
 0x537   :  { %2071 = vmatpush2.bf16.msra.mxu1 %v6939_v7 }
 0x538   :  { %2072 = vmatprep.subr.bf16.mxu1 %v6940_v16 }
 0x53b   :  { %2073 = vmatpush2.bf16.msra.mxu1 %v6941_v35 }
 0x53c   :  { %2074 = vmatprep.subr.bf16.mxu1 %v6942_v59 }
 0x53f   :  { %2075 = vmatpush2.bf16.msra.mxu1 %v6943_v20  ;;  %v6947_v20 = vld [vmem:[#allocation78_spill] sm:$0xff] }
 0x540   :  { %2076 = vmatprep.subr.bf16.mxu1 %v6944_v50 }
 0x543   :  { %2077 = vmatpush2.bf16.msra.mxu1 %v6945_v46  ;;  %v6948_v46 = vld [vmem:[#allocation48_spill] sm:$0xff] }
 0x544   :  { %2191 = vmatprep.subr.bf16.mxu1 %v5643_v18 }
 0x586   :  { %v1853_v14 = vpop.f32.mrf.mxu1  ;;  %v1894_v30 = vpop.f32.mrf.mxu0 }
 0x587   :  { %v1854_v60 = vadd.f32 %v1853_v14, %v6947_v20  ;;  %v1895_v18 = vadd.f32 %v1894_v30, %v4435_v4 }
 0x588   :  { %v1855_v33 = vpop.f32.mrf.mxu1  ;;  %v1896_v7 = vpop.f32.mrf.mxu0 }
 0x589   :  { %v1856_v50 = vadd.f32 %v1855_v33, %v4425_v38  ;;  %v1942_v12 = vadd.f32 %v1854_v60, %v6948_v46  ;;  %v1897_v57 = vadd.f32 %v1896_v7, %v4439_v31 }
 0x58a   :  { %v1857_v16 = vpop.f32.mrf.mxu1  ;;  %v1898_v35 = vpop.f32.mrf.mxu0 }
 0x58b   :  { %v1943_v13 = vadd.f32 %v1856_v50, %v6949_v19  ;;  %v2851_v2 = vmul.f32 -1.442695, %v1942_v12  ;;  %v6950_v16 = vld [vmem:[#allocation49_spill] sm:$0xff] }
 0x58c   :  { %v1858_v59 = vpop.f32.mrf.mxu1  ;;  %v1899_v27 = vpop.f32.mrf.mxu0  ;;  %v1944_v35 = vadd.f32 %v1895_v18, %v6950_v16 }
 0x58d   :  { %v2852_v47 = vmul.f32 -1.442695, %v1943_v13  ;;  %3166 = vpow2.f32 %v2851_v2  ;;  %v6951_v59 = vld [vmem:[#allocation51_spill] sm:$0xff] }
 0x58e   :  { %v1945_v27 = vadd.f32 %v1897_v57, %v6951_v59  ;;  %v2853_v24 = vmul.f32 -1.442695, %v1944_v35 }
 0x58f   :  { %3168 = vpow2.f32 %v2852_v47 }
 0x590   :  { %v2854_v14 = vmul.f32 -1.442695, %v1945_v27  ;;  %3170 = vpow2.f32 %v2853_v24 }
 0x592   :  { %3172 = vpow2.f32 %v2854_v14  ;;  %v6953_v14 = vld [vmem:[#allocation71_spill] sm:$0xff] }
 0x59a   :  { %v3167_v20 = vpop.eup %3166 }
 0x59b   :  { %v1958_v60 = vadd.f32 1.0, %v3167_v20  ;;  %v6952_v20 = vld [vmem:[#allocation70_spill] sm:$0xff] }
 0x59c   :  { %v3169_v33 = vpop.eup %3168 }
 0x59d   :  { %v1959_v19 = vadd.f32 1.0, %v3169_v33  ;;  %3174 = vrcp.f32 %v1958_v60  ;;  %v3171_v2 = vpop.eup %3170 }
 0x59e   :  { %v1960_v12 = vadd.f32 1.0, %v3171_v2 }
 0x59f   :  { %3176 = vrcp.f32 %v1959_v19  ;;  %v3173_v13 = vpop.eup %3172 }
 0x5a0   :  { %v1961_v30 = vadd.f32 1.0, %v3173_v13  ;;  %3178 = vrcp.f32 %v1960_v12 }
 0x5a2   :  { %3180 = vrcp.f32 %v1961_v30 }
 0x5aa   :  { %v3175_v18 = vpop.eup %3174 }
 0x5ac   :  { %v3177_v24 = vpop.eup %3176 }
 0x5ad   :  { %v3179_v60 = vpop.eup %3178 }
 0x5ae   :  { %v1976_v2 = vsub.f32 1.0, %v3179_v60 }
 0x5af   :  { %v3181_v19 = vpop.eup %3180 }
 0x5b0   :  { %v1981_v30 = vmul.f32 %v3181_v19, %v5391_v63 }
 0x5c6   :  { %v1935_v47 = vpop.f32.mrf.mxu1 }
 0x5c7   :  { %v1936_v7 = vadd.f32 %v1935_v47, %v4449_v49  ;;  %v1977_v47 = vsub.f32 1.0, %v3181_v19  ;;  %v5725_v19 = vld [vmem:[%s6462_s4 + $0xd4] ss:$24 sps:$4 sm:$0xff]  }
 0x5c8   :  { %v1937_v50 = vpop.f32.mrf.mxu1 }
 0x5c9   :  { %v1970_v57 = vmul.f32 %v3175_v18, %v1936_v7  ;;  %v1938_v46 = vadd.f32 %v1937_v50, %v4453_v10  ;;  %v1980_v7 = vmul.f32 %v3179_v60, %v5384_v8  ;;  %v5719_v60 = vld [vmem:[%s6462_s4 + $0x100] ss:$24 sps:$4 sm:$0xff]  }
 0x5ca   :  { %v1939_v16 = vpop.f32.mrf.mxu1 }
 0x5cb   :  { %v1972_v35 = vadd.f32 %v1970_v57, %v6952_v20  ;;  %v1971_v59 = vmul.f32 %v3177_v24, %v1938_v46 }
 0x5cc   :  { %v1940_v27 = vpop.f32.mrf.mxu1 }
 0x5cd   :  { %3182 = vtanh.f32 %v1972_v35  ;;  %v1973_v33 = vadd.f32 %v1971_v59, %v6953_v14  ;;  %v5705_v14 = vld [vmem:[%s6462_s4 + $0x130] ss:$24 sps:$4 sm:$0xff]  }
 0x5cf   :  { %3184 = vtanh.f32 %v1973_v33  ;;  %v5711_v33 = vld [vmem:[%s6462_s4 + $0x104] ss:$24 sps:$4 sm:$0xff]  }
 0x5da   :  { %v3183_v13 = vpop.eup %3182 }
 0x5db   :  { %v1978_v12 = vmul.f32 %v3183_v13, %v1976_v2  ;;  %v5733_v2 = vld [vmem:[%s6462_s4 + $0xd0] ss:$24 sps:$4 sm:$0xff]   ;;  %v5739_v13 = vld [vmem:[%s6462_s4 + $0xa4] ss:$24 sps:$4 sm:$0xff]  }
 0x5dc   :  { %v3185_v18 = vpop.eup %3184 }
 0x5dd   :  { %v1979_v50 = vmul.f32 %v3185_v18, %v1977_v47  ;;  %v1982_v16 = vadd.f32 %v1980_v7, %v1978_v12  ;;  %v5747_v47 = vld [vmem:[%s6462_s4 + $0xa0] ss:$24 sps:$4 sm:$0xff]   ;;  %v5753_v12 = vld [vmem:[%s6462_s4 + $0x74] ss:$24 sps:$4 sm:$0xff]   ;;  %v5761_v7 = vld [vmem:[%s6462_s4 + $0x70] ss:$24 sps:$4 sm:$0xff]  }
 0x5de   :  { %v5767_v18 = vld [vmem:[%s6462_s4 + $0x44] ss:$24 sps:$4 sm:$0xff]  }
 0x5df   :  { %v1983_v57 = vadd.f32 %v1981_v30, %v1979_v50  ;;  %v1988_v46 = vsel %vm2848_vm10, %v1982_v16, 0.0  ;;  %v5668_v24 = vsel %vm2848_vm10, %v1982_v16, %v5384_v8  ;;  %v5691_v8 = vld [vmem:[%s6462_s4 + $0x160] ss:$24 sps:$4 sm:$0xff]   ;;  %v6967_v30 = vld [vmem:[#allocation28_spill] sm:$0xff] }
 0x5e0   :  { %2857 = vst [vmem:[%s6466_s8 + $0x40] sm:$0xff] %v1988_v46  ;;  %v5684_v27 = vpack.c.bf16 %v5668_v24, %v5668_v24  ;;  %v6966_v50 = vld [vmem:[#allocation67_spill] sm:$0xff]  ;;  %v6968_v16 = vld [vmem:[#allocation32_spill] sm:$0xff] }
 0x5e1   :  { %v1989_v20 = vsel %vm2847_vm9, %v1983_v57, 0.0  ;;  %v5675_v35 = vsel %vm2847_vm9, %v1983_v57, %v5391_v63  ;;  %v5697_v63 = vld [vmem:[%s6462_s4 + $0x134] ss:$24 sps:$4 sm:$0xff]   ;;  %v6969_v57 = vld [vmem:[#allocation34_spill] sm:$0xff] }
 0x5e2   :  { %2858 = vst [vmem:[%s6466_s8 + $0x38] sm:$0xff] %v1989_v20  ;;  %v2004_v59 = vpack.c.bf16 %v5675_v35, %v5675_v35  ;;  %v6970_v46 = vld [vmem:[#allocation8_spill] sm:$0xff]  ;;  %v6971_v20 = vld [vmem:[#allocation10_spill] sm:$0xff] }
 0x5e4   :  { %2037 = vmatprep.mubr.bf16.mxu0 %v2004_v59  ;;  %2078 = vmatprep.mubr.bf16.mxu1 %v2004_v59 }
 0x5e5   :  { %2038 = vmatmul.mubr.bf16.vlgmr.msra.gmra.mxu0 %v5684_v27  ;;  %2079 = vmatmul.mubr.bf16.vlgmr.msra.gmra.mxu1 %v5684_v27 }
 0x5e6   :  { %2088 = vmatpush1.bf16.msra.mxu0 %v5691_v8  ;;  %2119 = vmatprep.mubr.bf16.mxu0 %v2004_v59  ;;  %v6972_v59 = vld [vmem:[#allocation12_spill] sm:$0xff] }
 0x5e7   :  { %2089 = vmatprep.subr.bf16.mxu0 %v5697_v63  ;;  %2192 = vmatpush1.bf16.msra.mxu1 %v5409_v11 }
 0x5e8   :  { %2193 = vmatprep.subr.bf16.mxu1 %v5415_v26 }
 0x5ea   :  { %2090 = vmatpush1.bf16.msra.mxu0 %v5705_v14 }
 0x5eb   :  { %2091 = vmatprep.subr.bf16.mxu0 %v5711_v33  ;;  %2194 = vmatpush1.bf16.msra.mxu1 %v5423_v25 }
 0x5ec   :  { %2195 = vmatprep.subr.bf16.mxu1 %v5429_v32 }
 0x5ee   :  { %2092 = vmatpush1.bf16.msra.mxu0 %v5719_v60 }
 0x5ef   :  { %2093 = vmatprep.subr.bf16.mxu0 %v5725_v19  ;;  %2196 = vmatpush1.bf16.msra.mxu1 %v5437_v0 }
 0x5f0   :  { %2197 = vmatprep.subr.bf16.mxu1 %v5443_v53 }
 0x5f2   :  { %2094 = vmatpush1.bf16.msra.mxu0 %v5733_v2 }
 0x5f3   :  { %2095 = vmatprep.subr.bf16.mxu0 %v5739_v13  ;;  %2198 = vmatpush1.bf16.msra.mxu1 %v5451_v3 }
 0x5f4   :  { %2199 = vmatprep.subr.bf16.mxu1 %v5457_v58 }
 0x5f6   :  { %2096 = vmatpush1.bf16.msra.mxu0 %v5747_v47 }
 0x5f7   :  { %2097 = vmatprep.subr.bf16.mxu0 %v5753_v12  ;;  %2200 = vmatpush1.bf16.msra.mxu1 %v5465_v54 }
 0x5f8   :  { %2201 = vmatprep.subr.bf16.mxu1 %v5471_v56 }
 0x5fa   :  { %2098 = vmatpush1.bf16.msra.mxu0 %v5761_v7 }
 0x5fb   :  { %2099 = vmatprep.subr.bf16.mxu0 %v5767_v18  ;;  %2202 = vmatpush1.bf16.msra.mxu1 %v5479_v52 }
 0x5fc   :  { %2203 = vmatprep.subr.bf16.mxu1 %v5485_v51 }
 0x5fe   :  { %2100 = vmatpush1.bf16.msra.mxu0 %v5195_v39  ;;  %v5790_v39 = vld [vmem:[%s6462_s4 + $0x274] ss:$24 sps:$4 sm:$0xff]  }
 0x5ff   :  { %2101 = vmatprep.subr.bf16.mxu0 %v5201_v29  ;;  %2204 = vmatpush1.bf16.msra.mxu1 %v5493_v55  ;;  %v5798_v29 = vld [vmem:[%s6462_s4 + $0x270] ss:$24 sps:$4 sm:$0xff]  }
 0x600   :  { %2205 = vmatprep.subr.bf16.mxu1 %v5499_v62 }
 0x602   :  { %2102 = vmatpush1.bf16.msra.mxu0 %v5209_v1  ;;  %v5804_v1 = vld [vmem:[%s6462_s4 + $0x244] ss:$24 sps:$4 sm:$0xff]  }
 0x603   :  { %2103 = vmatprep.subr.bf16.mxu0 %v5215_v40  ;;  %2206 = vmatpush1.bf16.msra.mxu1 %v5507_v44  ;;  %v5812_v40 = vld [vmem:[%s6462_s4 + $0x240] ss:$24 sps:$4 sm:$0xff]  }
 0x604   :  { %2207 = vmatprep.subr.bf16.mxu1 %v5513_v21 }
 0x606   :  { %2104 = vmatpush2.bf16.msra.mxu0 %v5223_v45  ;;  %v5818_v45 = vld [vmem:[%s6462_s4 + $0x214] ss:$24 sps:$4 sm:$0xff]  }
 0x607   :  { %2105 = vmatprep.subr.bf16.mxu0 %v5229_v36  ;;  %2208 = vmatpush2.bf16.msra.mxu1 %v5521_v42  ;;  %v5826_v36 = vld [vmem:[%s6462_s4 + $0x210] ss:$24 sps:$4 sm:$0xff]  }
 0x608   :  { %2209 = vmatprep.subr.bf16.mxu1 %v5527_v5  ;;  %6954 = vst [vmem:[#allocation16_spill] sm:$0xff] %v5826_v36 }
 0x60a   :  { %2106 = vmatpush2.bf16.msra.mxu0 %v5237_v34  ;;  %v5832_v34 = vld [vmem:[%s6462_s4 + $0x1e4] ss:$24 sps:$4 sm:$0xff]  }
 0x60b   :  { %2107 = vmatprep.subr.bf16.mxu0 %v5243_v43  ;;  %2210 = vmatpush2.bf16.msra.mxu1 %v5535_v61  ;;  %6955 = vst [vmem:[#allocation18_spill] sm:$0xff] %v5832_v34  ;;  %v5840_v43 = vld [vmem:[%s6462_s4 + $0x1e0] ss:$24 sps:$4 sm:$0xff]  }
 0x60c   :  { %2211 = vmatprep.subr.bf16.mxu1 %v5790_v39  ;;  %6956 = vst [vmem:[#allocation20_spill] sm:$0xff] %v5840_v43 }
 0x60e   :  { %2108 = vmatpush2.bf16.msra.mxu0 %v5251_v28  ;;  %v5846_v28 = vld [vmem:[%s6462_s4 + $0x1b4] ss:$24 sps:$4 sm:$0xff]  }
 0x60f   :  { %2109 = vmatprep.subr.bf16.mxu0 %v5257_v23  ;;  %2212 = vmatpush2.bf16.msra.mxu1 %v5798_v29  ;;  %6957 = vst [vmem:[#allocation22_spill] sm:$0xff] %v5846_v28  ;;  %v6958_v23 = vld [vmem:[#allocation42_spill] sm:$0xff] }
 0x610   :  { %2213 = vmatprep.subr.bf16.mxu1 %v5804_v1 }
 0x612   :  { %2110 = vmatpush2.bf16.msra.mxu0 %v5265_v22  ;;  %v5854_v22 = vld [vmem:[%s6462_s4 + $0x1b0] ss:$24 sps:$4 sm:$0xff]  }
 0x613   :  { %2111 = vmatprep.subr.bf16.mxu0 %v5271_v37  ;;  %2214 = vmatpush2.bf16.msra.mxu1 %v5812_v40  ;;  %6959 = vst [vmem:[#allocation24_spill] sm:$0xff] %v5854_v22  ;;  %v5860_v37 = vld [vmem:[%s6462_s4 + $0x184] ss:$24 sps:$4 sm:$0xff]  }
 0x614   :  { %2215 = vmatprep.subr.bf16.mxu1 %v5818_v45  ;;  %6960 = vst [vmem:[#allocation26_spill] sm:$0xff] %v5860_v37 }
 0x616   :  { %2112 = vmatpush2.bf16.msra.mxu0 %v5279_v9  ;;  %v6961_v9 = vld [vmem:[#allocation41_spill] sm:$0xff] }
 0x617   :  { %2113 = vmatprep.subr.bf16.mxu0 %v5285_v15  ;;  %2216 = vmatpush2.bf16.msra.mxu1 %v5826_v36  ;;  %v6962_v15 = vld [vmem:[#allocation43_spill] sm:$0xff] }
 0x618   :  { %2217 = vmatprep.subr.bf16.mxu1 %v5832_v34 }
 0x61a   :  { %2114 = vmatpush2.bf16.msra.mxu0 %v5293_v6  ;;  %v5868_v6 = vld [vmem:[%s6462_s4 + $0x180] ss:$24 sps:$4 sm:$0xff]  }
 0x61b   :  { %2115 = vmatprep.subr.bf16.mxu0 %v5299_v48  ;;  %2218 = vmatpush2.bf16.msra.mxu1 %v5840_v43  ;;  %6963 = vst [vmem:[#allocation44_spill] sm:$0xff] %v5868_v6  ;;  %v5874_v48 = vld [vmem:[%s6462_s4 + $0x164] ss:$24 sps:$4 sm:$0xff]  }
 0x61c   :  { %2219 = vmatprep.subr.bf16.mxu1 %v5846_v28  ;;  %6964 = vst [vmem:[#allocation46_spill] sm:$0xff] %v5874_v48 }
 0x61e   :  { %2116 = vmatpush2.bf16.msra.mxu0 %v6907_v17  ;;  %v6965_v17 = vld [vmem:[#allocation66_spill] sm:$0xff] }
 0x61f   :  { %2117 = vmatprep.subr.bf16.mxu0 %v6958_v23  ;;  %2220 = vmatpush2.bf16.msra.mxu1 %v5854_v22  ;;  %v5895_v23 = vld [vmem:[%s6462_s4 + $0x6c] ss:$24 sps:$4 sm:$0xff]   ;;  %v6999_v22 = vld [vmem:[#allocation54_spill] sm:$0xff] }
 0x620   :  { %2221 = vmatprep.subr.bf16.mxu1 %v5860_v37  ;;  %6974 = vst [vmem:[#allocation47_spill] sm:$0xff] %v5895_v23 }
 0x622   :  { %2118 = vmatpush2.bf16.msra.mxu0 %v6961_v9  ;;  %v5901_v9 = vld [vmem:[%s6462_s4 + $0x68] ss:$24 sps:$4 sm:$0xff]  }
 0x623   :  { %2232 = vmatprep.subr.bf16.mxu0 %v6962_v15  ;;  %2222 = vmatpush2.bf16.msra.mxu1 %v5868_v6  ;;  %6975 = vst [vmem:[#allocation68_spill] sm:$0xff] %v5901_v9  ;;  %v6998_v15 = vld [vmem:[#allocation52_spill] sm:$0xff] }
 0x624   :  { %2273 = vmatprep.subr.bf16.mxu1 %v5874_v48  ;;  %v6997_v48 = vld [vmem:[#allocation78_spill] sm:$0xff] }
 0x625   :  { %2120 = vmatmul.mubr.bf16.vlgmr.msra.gmra.mxu0 %v5684_v27  ;;  %v5889_v27 = vld [vmem:[%s6462_s4 + $0x98] ss:$24 sps:$4 sm:$0xff]  }
 0x626   :  { %2233 = vmatpush1.bf16.msra.mxu0 %v6965_v17  ;;  %6973 = vst [vmem:[#allocation45_spill] sm:$0xff] %v5889_v27 }
 0x627   :  { %2234 = vmatprep.subr.bf16.mxu0 %v6966_v50 }
 0x62a   :  { %2235 = vmatpush1.bf16.msra.mxu0 %v6967_v30 }
 0x62b   :  { %2236 = vmatprep.subr.bf16.mxu0 %v6968_v16 }
 0x62e   :  { %2237 = vmatpush1.bf16.msra.mxu0 %v6969_v57 }
 0x62f   :  { %2238 = vmatprep.subr.bf16.mxu0 %v6970_v46 }
 0x632   :  { %2239 = vmatpush1.bf16.msra.mxu0 %v6971_v20 }
 0x633   :  { %2240 = vmatprep.subr.bf16.mxu0 %v6972_v59  ;;  %v5907_v59 = vld [vmem:[%s6462_s4 + $0x3c] ss:$24 sps:$4 sm:$0xff]  }
 0x634   :  { %6976 = vst [vmem:[#allocation69_spill] sm:$0xff] %v5907_v59 }
 0x636   :  { %2241 = vmatpush1.bf16.msra.mxu0 %v5889_v27  ;;  %v5913_v27 = vld [vmem:[%s6462_s4 + $0x38] ss:$24 sps:$4 sm:$0xff]  }
 0x637   :  { %2242 = vmatprep.subr.bf16.mxu0 %v5895_v23  ;;  %6977 = vst [vmem:[#allocation3_spill] sm:$0xff] %v5913_v27  ;;  %v5919_v23 = vld [vmem:[%s6462_s4 + $0xc] ss:$24 sps:$4 sm:$0xff]  }
 0x638   :  { %6978 = vst [vmem:[#allocation40_spill] sm:$0xff] %v5919_v23 }
 0x63a   :  { %2243 = vmatpush1.bf16.msra.mxu0 %v5901_v9  ;;  %v5925_v9 = vld [vmem:[%s6462_s4 + $0x8] ss:$24 sps:$4 sm:$0xff]  }
 0x63b   :  { %2244 = vmatprep.subr.bf16.mxu0 %v5907_v59  ;;  %6979 = vst [vmem:[#allocation5_spill] sm:$0xff] %v5925_v9  ;;  %v5931_v59 = vld [vmem:[%s6462_s4 + $0x2dc] ss:$24 sps:$4 sm:$0xff]  }
 0x63c   :  { %6980 = vst [vmem:[#allocation7_spill] sm:$0xff] %v5931_v59 }
 0x63e   :  { %2245 = vmatpush1.bf16.msra.mxu0 %v5913_v27  ;;  %v5937_v27 = vld [vmem:[%s6462_s4 + $0x2d8] ss:$24 sps:$4 sm:$0xff]  }
 0x63f   :  { %2246 = vmatprep.subr.bf16.mxu0 %v5919_v23  ;;  %6981 = vst [vmem:[#allocation9_spill] sm:$0xff] %v5937_v27  ;;  %v5943_v23 = vld [vmem:[%s6462_s4 + $0x2ac] ss:$24 sps:$4 sm:$0xff]  }
 0x640   :  { %6982 = vst [vmem:[#allocation11_spill] sm:$0xff] %v5943_v23 }
 0x642   :  { %2247 = vmatpush1.bf16.msra.mxu0 %v5925_v9  ;;  %v5949_v9 = vld [vmem:[%s6462_s4 + $0x2a8] ss:$24 sps:$4 sm:$0xff]  }
 0x643   :  { %2248 = vmatprep.subr.bf16.mxu0 %v5931_v59  ;;  %6983 = vst [vmem:[#allocation13_spill] sm:$0xff] %v5949_v9  ;;  %v5955_v59 = vld [vmem:[%s6462_s4 + $0x27c] ss:$24 sps:$4 sm:$0xff]  }
 0x644   :  { %6984 = vst [vmem:[#allocation15_spill] sm:$0xff] %v5955_v59 }
 0x646   :  { %2249 = vmatpush2.bf16.msra.mxu0 %v5937_v27  ;;  %v5961_v27 = vld [vmem:[%s6462_s4 + $0x278] ss:$24 sps:$4 sm:$0xff]  }
 0x647   :  { %2250 = vmatprep.subr.bf16.mxu0 %v5943_v23  ;;  %6985 = vst [vmem:[#allocation17_spill] sm:$0xff] %v5961_v27  ;;  %v5967_v23 = vld [vmem:[%s6462_s4 + $0x24c] ss:$24 sps:$4 sm:$0xff]  }
 0x648   :  { %6986 = vst [vmem:[#allocation19_spill] sm:$0xff] %v5967_v23 }
 0x64a   :  { %2251 = vmatpush2.bf16.msra.mxu0 %v5949_v9  ;;  %v5973_v9 = vld [vmem:[%s6462_s4 + $0x248] ss:$24 sps:$4 sm:$0xff]  }
 0x64b   :  { %2252 = vmatprep.subr.bf16.mxu0 %v5955_v59  ;;  %6987 = vst [vmem:[#allocation21_spill] sm:$0xff] %v5973_v9  ;;  %v5979_v59 = vld [vmem:[%s6462_s4 + $0x21c] ss:$24 sps:$4 sm:$0xff]  }
 0x64c   :  { %6988 = vst [vmem:[#allocation23_spill] sm:$0xff] %v5979_v59 }
 0x64e   :  { %2253 = vmatpush2.bf16.msra.mxu0 %v5961_v27  ;;  %v5985_v27 = vld [vmem:[%s6462_s4 + $0x218] ss:$24 sps:$4 sm:$0xff]  }
 0x64f   :  { %2254 = vmatprep.subr.bf16.mxu0 %v5967_v23  ;;  %6989 = vst [vmem:[#allocation25_spill] sm:$0xff] %v5985_v27  ;;  %v5991_v23 = vld [vmem:[%s6462_s4 + $0x1ec] ss:$24 sps:$4 sm:$0xff]  }
 0x650   :  { %6990 = vst [vmem:[#allocation27_spill] sm:$0xff] %v5991_v23 }
 0x652   :  { %2255 = vmatpush2.bf16.msra.mxu0 %v5973_v9  ;;  %v5997_v9 = vld [vmem:[%s6462_s4 + $0x1e8] ss:$24 sps:$4 sm:$0xff]  }
 0x653   :  { %2256 = vmatprep.subr.bf16.mxu0 %v5979_v59  ;;  %6991 = vst [vmem:[#allocation29_spill] sm:$0xff] %v5997_v9  ;;  %v6003_v59 = vld [vmem:[%s6462_s4 + $0x1bc] ss:$24 sps:$4 sm:$0xff]  }
 0x654   :  { %6992 = vst [vmem:[#allocation31_spill] sm:$0xff] %v6003_v59 }
 0x656   :  { %2257 = vmatpush2.bf16.msra.mxu0 %v5985_v27  ;;  %v6009_v27 = vld [vmem:[%s6462_s4 + $0x1b8] ss:$24 sps:$4 sm:$0xff]  }
 0x657   :  { %2258 = vmatprep.subr.bf16.mxu0 %v5991_v23  ;;  %6993 = vst [vmem:[#allocation37_spill] sm:$0xff] %v6009_v27  ;;  %v6015_v23 = vld [vmem:[%s6462_s4 + $0x18c] ss:$24 sps:$4 sm:$0xff]  }
 0x658   :  { %6994 = vst [vmem:[#allocation39_spill] sm:$0xff] %v6015_v23 }
 0x65a   :  { %2259 = vmatpush2.bf16.msra.mxu0 %v5997_v9  ;;  %v6021_v9 = vld [vmem:[%s6462_s4 + $0x188] ss:$24 sps:$4 sm:$0xff]  }
 0x65b   :  { %2260 = vmatprep.subr.bf16.mxu0 %v6003_v59  ;;  %6995 = vst [vmem:[#allocation36_spill] sm:$0xff] %v6021_v9  ;;  %v6996_v59 = vld [vmem:[#allocation14_spill] sm:$0xff] }
 0x65e   :  { %2261 = vmatpush2.bf16.msra.mxu0 %v6009_v27 }
 0x65f   :  { %2262 = vmatprep.subr.bf16.mxu0 %v6015_v23 }
 0x662   :  { %2263 = vmatpush2.bf16.msra.mxu0 %v6021_v9 }
 0x663   :  { %2377 = vmatprep.subr.bf16.mxu0 %v6996_v59 }
 0x6a5   :  { %v2039_v20 = vpop.f32.mrf.mxu0  ;;  %v2080_v46 = vpop.f32.mrf.mxu1 }
 0x6a6   :  { %v2040_v6 = vadd.f32 %v2039_v20, %v6997_v48  ;;  %v2081_v59 = vadd.f32 %v2080_v46, %v4435_v4 }
 0x6a7   :  { %v2041_v57 = vpop.f32.mrf.mxu0  ;;  %v2082_v27 = vpop.f32.mrf.mxu1 }
 0x6a8   :  { %v2042_v23 = vadd.f32 %v2041_v57, %v4425_v38  ;;  %v2128_v37 = vadd.f32 %v2040_v6, %v6998_v15  ;;  %v2083_v34 = vadd.f32 %v2082_v27, %v4439_v31 }
 0x6a9   :  { %v2043_v16 = vpop.f32.mrf.mxu0  ;;  %v2084_v30 = vpop.f32.mrf.mxu1 }
 0x6aa   :  { %v2129_v28 = vadd.f32 %v2042_v23, %v6999_v22  ;;  %v2859_v43 = vmul.f32 -1.442695, %v2128_v37  ;;  %v7000_v16 = vld [vmem:[#allocation53_spill] sm:$0xff] }
 0x6ab   :  { %v2044_v50 = vpop.f32.mrf.mxu0  ;;  %v2085_v17 = vpop.f32.mrf.mxu1  ;;  %v2130_v30 = vadd.f32 %v2081_v59, %v7000_v16 }
 0x6ac   :  { %v2860_v9 = vmul.f32 -1.442695, %v2129_v28  ;;  %3186 = vpow2.f32 %v2859_v43  ;;  %v7001_v50 = vld [vmem:[#allocation55_spill] sm:$0xff] }
 0x6ad   :  { %v2131_v17 = vadd.f32 %v2083_v34, %v7001_v50  ;;  %v2861_v36 = vmul.f32 -1.442695, %v2130_v30 }
 0x6ae   :  { %3188 = vpow2.f32 %v2860_v9 }
 0x6af   :  { %v2862_v20 = vmul.f32 -1.442695, %v2131_v17  ;;  %3190 = vpow2.f32 %v2861_v36 }
 0x6b1   :  { %3192 = vpow2.f32 %v2862_v20  ;;  %v7003_v20 = vld [vmem:[#allocation73_spill] sm:$0xff] }
 0x6b9   :  { %v3187_v48 = vpop.eup %3186 }
 0x6ba   :  { %v2144_v15 = vadd.f32 1.0, %v3187_v48  ;;  %v7002_v48 = vld [vmem:[#allocation72_spill] sm:$0xff] }
 0x6bb   :  { %v3189_v57 = vpop.eup %3188 }
 0x6bc   :  { %v2145_v22 = vadd.f32 1.0, %v3189_v57  ;;  %3194 = vrcp.f32 %v2144_v15  ;;  %v3191_v43 = vpop.eup %3190 }
 0x6bd   :  { %v2146_v37 = vadd.f32 1.0, %v3191_v43 }
 0x6be   :  { %3196 = vrcp.f32 %v2145_v22  ;;  %v3193_v28 = vpop.eup %3192 }
 0x6bf   :  { %v2147_v46 = vadd.f32 1.0, %v3193_v28  ;;  %3198 = vrcp.f32 %v2146_v37 }
 0x6c1   :  { %3200 = vrcp.f32 %v2147_v46 }
 0x6c9   :  { %v3195_v23 = vpop.eup %3194 }
 0x6cb   :  { %v3197_v36 = vpop.eup %3196 }
 0x6cc   :  { %v3199_v15 = vpop.eup %3198 }
 0x6cd   :  { %v2162_v43 = vsub.f32 1.0, %v3199_v15 }
 0x6ce   :  { %v3201_v22 = vpop.eup %3200 }
 0x6cf   :  { %v2167_v46 = vmul.f32 %v3201_v22, %v5675_v35 }
 0x6e5   :  { %v2121_v6 = vpop.f32.mrf.mxu0 }
 0x6e6   :  { %v2122_v27 = vadd.f32 %v2121_v6, %v4449_v49  ;;  %v2163_v6 = vsub.f32 1.0, %v3201_v22  ;;  %v7014_v22 = vld [vmem:[#allocation67_spill] sm:$0xff] }
 0x6e7   :  { %v2123_v9 = vpop.f32.mrf.mxu0 }
 0x6e8   :  { %v2156_v34 = vmul.f32 %v3195_v23, %v2122_v27  ;;  %v2124_v59 = vadd.f32 %v2123_v9, %v4453_v10  ;;  %v2166_v27 = vmul.f32 %v3199_v15, %v5668_v24  ;;  %v7013_v15 = vld [vmem:[#allocation66_spill] sm:$0xff] }
 0x6e9   :  { %v2125_v16 = vpop.f32.mrf.mxu0 }
 0x6ea   :  { %v2158_v30 = vadd.f32 %v2156_v34, %v7002_v48  ;;  %v2157_v50 = vmul.f32 %v3197_v36, %v2124_v59 }
 0x6eb   :  { %v2126_v17 = vpop.f32.mrf.mxu0 }
 0x6ec   :  { %3202 = vtanh.f32 %v2158_v30  ;;  %v2159_v57 = vadd.f32 %v2157_v50, %v7003_v20  ;;  %v7011_v20 = vld [vmem:[#allocation44_spill] sm:$0xff] }
 0x6ee   :  { %3204 = vtanh.f32 %v2159_v57  ;;  %v7012_v57 = vld [vmem:[#allocation46_spill] sm:$0xff] }
 0x6f9   :  { %v3203_v28 = vpop.eup %3202 }
 0x6fa   :  { %v2164_v37 = vmul.f32 %v3203_v28, %v2162_v43  ;;  %v7015_v43 = vld [vmem:[#allocation28_spill] sm:$0xff] }
 0x6fb   :  { %v3205_v23 = vpop.eup %3204  ;;  %v7016_v28 = vld [vmem:[#allocation32_spill] sm:$0xff] }
 0x6fc   :  { %v2165_v9 = vmul.f32 %v3205_v23, %v2163_v6  ;;  %v2168_v16 = vadd.f32 %v2166_v27, %v2164_v37  ;;  %v7017_v6 = vld [vmem:[#allocation34_spill] sm:$0xff]  ;;  %v7018_v37 = vld [vmem:[#allocation8_spill] sm:$0xff] }
 0x6fd   :  { %v7019_v27 = vld [vmem:[#allocation10_spill] sm:$0xff]  ;;  %v7020_v23 = vld [vmem:[#allocation12_spill] sm:$0xff] }
 0x6fe   :  { %v2169_v34 = vadd.f32 %v2167_v46, %v2165_v9  ;;  %v2174_v59 = vsel %vm2840_vm8, %v2168_v16, 0.0  ;;  %v6047_v36 = vsel %vm2840_vm8, %v2168_v16, %v5668_v24  ;;  %v7007_v24 = vld [vmem:[#allocation22_spill] sm:$0xff]  ;;  %v7021_v9 = vld [vmem:[#allocation45_spill] sm:$0xff]  ;;  %v7022_v46 = vld [vmem:[#allocation47_spill] sm:$0xff] }
 0x6ff   :  { %2865 = vst [vmem:[%s6466_s8 + $0x50] sm:$0xff] %v2174_v59  ;;  %v6063_v17 = vpack.c.bf16 %v6047_v36, %v6047_v36  ;;  %v7023_v16 = vld [vmem:[#allocation68_spill] sm:$0xff]  ;;  %v7025_v59 = vld [vmem:[#allocation3_spill] sm:$0xff] }
 0x700   :  { %v2175_v48 = vsel %vm2839_vm7, %v2169_v34, 0.0  ;;  %v6054_v30 = vsel %vm2839_vm7, %v2169_v34, %v5675_v35  ;;  %v6206_v35 = vld [vmem:[%s6462_s4 + $0x1c0] ss:$24 sps:$4 sm:$0xff]   ;;  %v7024_v34 = vld [vmem:[#allocation69_spill] sm:$0xff] }
 0x701   :  { %2866 = vst [vmem:[%s6466_s8 + $0x28] sm:$0xff] %v2175_v48  ;;  %v2190_v50 = vpack.c.bf16 %v6054_v30, %v6054_v30  ;;  %v7026_v48 = vld [vmem:[#allocation40_spill] sm:$0xff] }
 0x703   :  { %2223 = vmatprep.mubr.bf16.mxu1 %v2190_v50  ;;  %2264 = vmatprep.mubr.bf16.mxu0 %v2190_v50 }
 0x704   :  { %2224 = vmatmul.mubr.bf16.vlgmr.msra.gmra.mxu1 %v6063_v17  ;;  %2265 = vmatmul.mubr.bf16.vlgmr.msra.gmra.mxu0 %v6063_v17 }
 0x705   :  { %2274 = vmatpush1.bf16.msra.mxu1 %v5691_v8  ;;  %2305 = vmatprep.mubr.bf16.mxu1 %v2190_v50  ;;  %v7027_v50 = vld [vmem:[#allocation5_spill] sm:$0xff] }
 0x706   :  { %2275 = vmatprep.subr.bf16.mxu1 %v5697_v63  ;;  %2378 = vmatpush1.bf16.msra.mxu0 %v5409_v11  ;;  %v6094_v11 = vld [vmem:[%s6462_s4 + $0x40] ss:$24 sps:$4 sm:$0xff]  }
 0x707   :  { %2379 = vmatprep.subr.bf16.mxu0 %v5415_v26  ;;  %v6100_v26 = vld [vmem:[%s6462_s4 + $0x14] ss:$24 sps:$4 sm:$0xff]  }
 0x709   :  { %2276 = vmatpush1.bf16.msra.mxu1 %v5705_v14 }
 0x70a   :  { %2277 = vmatprep.subr.bf16.mxu1 %v5711_v33  ;;  %2380 = vmatpush1.bf16.msra.mxu0 %v5423_v25  ;;  %v6108_v25 = vld [vmem:[%s6462_s4 + $0x10] ss:$24 sps:$4 sm:$0xff]  }
 0x70b   :  { %2381 = vmatprep.subr.bf16.mxu0 %v5429_v32  ;;  %v6114_v32 = vld [vmem:[%s6462_s4 + $0x2e4] ss:$24 sps:$4 sm:$0xff]  }
 0x70d   :  { %2278 = vmatpush1.bf16.msra.mxu1 %v5719_v60 }
 0x70e   :  { %2279 = vmatprep.subr.bf16.mxu1 %v5725_v19  ;;  %2382 = vmatpush1.bf16.msra.mxu0 %v5437_v0  ;;  %v6122_v0 = vld [vmem:[%s6462_s4 + $0x2e0] ss:$24 sps:$4 sm:$0xff]  }
 0x70f   :  { %2383 = vmatprep.subr.bf16.mxu0 %v5443_v53  ;;  %v6128_v53 = vld [vmem:[%s6462_s4 + $0x2b4] ss:$24 sps:$4 sm:$0xff]  }
 0x711   :  { %2280 = vmatpush1.bf16.msra.mxu1 %v5733_v2 }
 0x712   :  { %2281 = vmatprep.subr.bf16.mxu1 %v5739_v13  ;;  %2384 = vmatpush1.bf16.msra.mxu0 %v5451_v3  ;;  %v6136_v3 = vld [vmem:[%s6462_s4 + $0x2b0] ss:$24 sps:$4 sm:$0xff]  }
 0x713   :  { %2385 = vmatprep.subr.bf16.mxu0 %v5457_v58  ;;  %v6142_v58 = vld [vmem:[%s6462_s4 + $0x284] ss:$24 sps:$4 sm:$0xff]  }
 0x715   :  { %2282 = vmatpush1.bf16.msra.mxu1 %v5747_v47 }
 0x716   :  { %2283 = vmatprep.subr.bf16.mxu1 %v5753_v12  ;;  %2386 = vmatpush1.bf16.msra.mxu0 %v5465_v54  ;;  %v6150_v54 = vld [vmem:[%s6462_s4 + $0x280] ss:$24 sps:$4 sm:$0xff]  }
 0x717   :  { %2387 = vmatprep.subr.bf16.mxu0 %v5471_v56  ;;  %v6156_v56 = vld [vmem:[%s6462_s4 + $0x254] ss:$24 sps:$4 sm:$0xff]  }
 0x719   :  { %2284 = vmatpush1.bf16.msra.mxu1 %v5761_v7 }
 0x71a   :  { %2285 = vmatprep.subr.bf16.mxu1 %v5767_v18  ;;  %2388 = vmatpush1.bf16.msra.mxu0 %v5479_v52  ;;  %v6164_v52 = vld [vmem:[%s6462_s4 + $0x250] ss:$24 sps:$4 sm:$0xff]  }
 0x71b   :  { %2389 = vmatprep.subr.bf16.mxu0 %v5485_v51  ;;  %v6170_v51 = vld [vmem:[%s6462_s4 + $0x224] ss:$24 sps:$4 sm:$0xff]  }
 0x71d   :  { %2286 = vmatpush1.bf16.msra.mxu1 %v6094_v11 }
 0x71e   :  { %2287 = vmatprep.subr.bf16.mxu1 %v6100_v26  ;;  %2390 = vmatpush1.bf16.msra.mxu0 %v5493_v55  ;;  %v6178_v55 = vld [vmem:[%s6462_s4 + $0x220] ss:$24 sps:$4 sm:$0xff]  }
 0x71f   :  { %2391 = vmatprep.subr.bf16.mxu0 %v5499_v62  ;;  %v6184_v62 = vld [vmem:[%s6462_s4 + $0x1f4] ss:$24 sps:$4 sm:$0xff]  }
 0x721   :  { %2288 = vmatpush1.bf16.msra.mxu1 %v6108_v25 }
 0x722   :  { %2289 = vmatprep.subr.bf16.mxu1 %v6114_v32  ;;  %2392 = vmatpush1.bf16.msra.mxu0 %v5507_v44  ;;  %v7004_v44 = vld [vmem:[#allocation16_spill] sm:$0xff] }
 0x723   :  { %2393 = vmatprep.subr.bf16.mxu0 %v5513_v21  ;;  %v7005_v21 = vld [vmem:[#allocation18_spill] sm:$0xff] }
 0x725   :  { %2290 = vmatpush2.bf16.msra.mxu1 %v6122_v0 }
 0x726   :  { %2291 = vmatprep.subr.bf16.mxu1 %v6128_v53  ;;  %2394 = vmatpush2.bf16.msra.mxu0 %v5521_v42  ;;  %v6192_v42 = vld [vmem:[%s6462_s4 + $0x1f0] ss:$24 sps:$4 sm:$0xff]  }
 0x727   :  { %2395 = vmatprep.subr.bf16.mxu0 %v5527_v5  ;;  %v6198_v5 = vld [vmem:[%s6462_s4 + $0x1c4] ss:$24 sps:$4 sm:$0xff]  }
 0x729   :  { %2292 = vmatpush2.bf16.msra.mxu1 %v6136_v3 }
 0x72a   :  { %2293 = vmatprep.subr.bf16.mxu1 %v6142_v58  ;;  %2396 = vmatpush2.bf16.msra.mxu0 %v5535_v61  ;;  %v7006_v61 = vld [vmem:[#allocation20_spill] sm:$0xff] }
 0x72b   :  { %2397 = vmatprep.subr.bf16.mxu0 %v5790_v39  ;;  %v6212_v39 = vld [vmem:[%s6462_s4 + $0x194] ss:$24 sps:$4 sm:$0xff]  }
 0x72d   :  { %2294 = vmatpush2.bf16.msra.mxu1 %v6150_v54 }
 0x72e   :  { %2295 = vmatprep.subr.bf16.mxu1 %v6156_v56  ;;  %2398 = vmatpush2.bf16.msra.mxu0 %v5798_v29  ;;  %v7008_v29 = vld [vmem:[#allocation24_spill] sm:$0xff] }
 0x72f   :  { %2399 = vmatprep.subr.bf16.mxu0 %v5804_v1  ;;  %v7009_v1 = vld [vmem:[#allocation26_spill] sm:$0xff] }
 0x731   :  { %2296 = vmatpush2.bf16.msra.mxu1 %v6164_v52 }
 0x732   :  { %2297 = vmatprep.subr.bf16.mxu1 %v6170_v51  ;;  %2400 = vmatpush2.bf16.msra.mxu0 %v5812_v40  ;;  %v6220_v40 = vld [vmem:[%s6462_s4 + $0x190] ss:$24 sps:$4 sm:$0xff]  }
 0x733   :  { %2401 = vmatprep.subr.bf16.mxu0 %v5818_v45  ;;  %v7010_v45 = vld [vmem:[#allocation43_spill] sm:$0xff] }
 0x735   :  { %2298 = vmatpush2.bf16.msra.mxu1 %v6178_v55 }
 0x736   :  { %2299 = vmatprep.subr.bf16.mxu1 %v6184_v62  ;;  %2402 = vmatpush2.bf16.msra.mxu0 %v7004_v44  ;;  %v7029_v44 = vld [vmem:[#allocation9_spill] sm:$0xff] }
 0x737   :  { %2403 = vmatprep.subr.bf16.mxu0 %v7005_v21  ;;  %v7030_v21 = vld [vmem:[#allocation11_spill] sm:$0xff] }
 0x739   :  { %2300 = vmatpush2.bf16.msra.mxu1 %v6192_v42 }
 0x73a   :  { %2301 = vmatprep.subr.bf16.mxu1 %v6198_v5  ;;  %2404 = vmatpush2.bf16.msra.mxu0 %v7006_v61  ;;  %v7031_v61 = vld [vmem:[#allocation13_spill] sm:$0xff] }
 0x73b   :  { %2405 = vmatprep.subr.bf16.mxu0 %v7007_v24  ;;  %v7032_v24 = vld [vmem:[#allocation15_spill] sm:$0xff] }
 0x73d   :  { %2302 = vmatpush2.bf16.msra.mxu1 %v6206_v35 }
 0x73e   :  { %2303 = vmatprep.subr.bf16.mxu1 %v6212_v39  ;;  %2406 = vmatpush2.bf16.msra.mxu0 %v7008_v29  ;;  %v7033_v29 = vld [vmem:[#allocation17_spill] sm:$0xff] }
 0x73f   :  { %2407 = vmatprep.subr.bf16.mxu0 %v7009_v1  ;;  %v7034_v1 = vld [vmem:[#allocation19_spill] sm:$0xff] }
 0x741   :  { %2304 = vmatpush2.bf16.msra.mxu1 %v6220_v40 }
 0x742   :  { %2418 = vmatprep.subr.bf16.mxu1 %v7010_v45  ;;  %2408 = vmatpush2.bf16.msra.mxu0 %v7011_v20  ;;  %v7035_v45 = vld [vmem:[#allocation21_spill] sm:$0xff]  ;;  %v7036_v20 = vld [vmem:[#allocation23_spill] sm:$0xff] }
 0x743   :  { %2459 = vmatprep.subr.bf16.mxu0 %v7012_v57  ;;  %v7037_v57 = vld [vmem:[#allocation25_spill] sm:$0xff] }
 0x744   :  { %2306 = vmatmul.mubr.bf16.vlgmr.msra.gmra.mxu1 %v6063_v17  ;;  %v7028_v17 = vld [vmem:[#allocation7_spill] sm:$0xff] }
 0x745   :  { %2419 = vmatpush1.bf16.msra.mxu1 %v7013_v15  ;;  %v7038_v15 = vld [vmem:[#allocation27_spill] sm:$0xff] }
 0x746   :  { %2420 = vmatprep.subr.bf16.mxu1 %v7014_v22  ;;  %v7039_v22 = vld [vmem:[#allocation29_spill] sm:$0xff] }
 0x749   :  { %2421 = vmatpush1.bf16.msra.mxu1 %v7015_v43  ;;  %v7040_v43 = vld [vmem:[#allocation31_spill] sm:$0xff] }
 0x74a   :  { %2422 = vmatprep.subr.bf16.mxu1 %v7016_v28  ;;  %v7041_v28 = vld [vmem:[#allocation37_spill] sm:$0xff] }
 0x74d   :  { %2423 = vmatpush1.bf16.msra.mxu1 %v7017_v6  ;;  %v7042_v6 = vld [vmem:[#allocation39_spill] sm:$0xff] }
 0x74e   :  { %2424 = vmatprep.subr.bf16.mxu1 %v7018_v37  ;;  %v7043_v37 = vld [vmem:[#allocation36_spill] sm:$0xff] }
 0x751   :  { %2425 = vmatpush1.bf16.msra.mxu1 %v7019_v27 }
 0x752   :  { %2426 = vmatprep.subr.bf16.mxu1 %v7020_v23 }
 0x755   :  { %2427 = vmatpush1.bf16.msra.mxu1 %v7021_v9 }
 0x756   :  { %2428 = vmatprep.subr.bf16.mxu1 %v7022_v46 }
 0x759   :  { %2429 = vmatpush1.bf16.msra.mxu1 %v7023_v16 }
 0x75a   :  { %2430 = vmatprep.subr.bf16.mxu1 %v7024_v34 }
 0x75d   :  { %2431 = vmatpush1.bf16.msra.mxu1 %v7025_v59 }
 0x75e   :  { %2432 = vmatprep.subr.bf16.mxu1 %v7026_v48 }
 0x761   :  { %2433 = vmatpush1.bf16.msra.mxu1 %v7027_v50  ;;  %v7044_v50 = vld [vmem:[#allocation78_spill] sm:$0xff] }
 0x762   :  { %2434 = vmatprep.subr.bf16.mxu1 %v7028_v17 }
 0x765   :  { %2435 = vmatpush2.bf16.msra.mxu1 %v7029_v44 }
 0x766   :  { %2436 = vmatprep.subr.bf16.mxu1 %v7030_v21  ;;  %v7045_v21 = vld [vmem:[#allocation56_spill] sm:$0xff] }
 0x769   :  { %2437 = vmatpush2.bf16.msra.mxu1 %v7031_v61 }
 0x76a   :  { %2438 = vmatprep.subr.bf16.mxu1 %v7032_v24  ;;  %v7046_v24 = vld [vmem:[#allocation58_spill] sm:$0xff] }
 0x76d   :  { %2439 = vmatpush2.bf16.msra.mxu1 %v7033_v29 }
 0x76e   :  { %2440 = vmatprep.subr.bf16.mxu1 %v7034_v1 }
 0x771   :  { %2441 = vmatpush2.bf16.msra.mxu1 %v7035_v45 }
 0x772   :  { %2442 = vmatprep.subr.bf16.mxu1 %v7036_v20 }
 0x775   :  { %2443 = vmatpush2.bf16.msra.mxu1 %v7037_v57 }
 0x776   :  { %2444 = vmatprep.subr.bf16.mxu1 %v7038_v15  ;;  %v7047_v15 = vld [vmem:[#allocation57_spill] sm:$0xff] }
 0x779   :  { %2445 = vmatpush2.bf16.msra.mxu1 %v7039_v22 }
 0x77a   :  { %2446 = vmatprep.subr.bf16.mxu1 %v7040_v43  ;;  %v7048_v43 = vld [vmem:[#allocation59_spill] sm:$0xff] }
 0x77d   :  { %2447 = vmatpush2.bf16.msra.mxu1 %v7041_v28 }
 0x77e   :  { %2448 = vmatprep.subr.bf16.mxu1 %v7042_v6 }
 0x781   :  { %2449 = vmatpush2.bf16.msra.mxu1 %v7043_v37 }
 0x7c4   :  { %v2225_v27 = vpop.f32.mrf.mxu1  ;;  %v2266_v23 = vpop.f32.mrf.mxu0 }
 0x7c5   :  { %v2226_v17 = vadd.f32 %v2225_v27, %v7044_v50  ;;  %v2267_v20 = vadd.f32 %v2266_v23, %v4435_v4 }
 0x7c6   :  { %v2227_v9 = vpop.f32.mrf.mxu1  ;;  %v2268_v46 = vpop.f32.mrf.mxu0 }
 0x7c7   :  { %v2228_v44 = vadd.f32 %v2227_v9, %v4425_v38  ;;  %v2314_v61 = vadd.f32 %v2226_v17, %v7045_v21  ;;  %v2269_v57 = vadd.f32 %v2268_v46, %v4439_v31  ;;  %v2316_v22 = vadd.f32 %v2267_v20, %v7047_v15  ;;  %v7049_v20 = vld [vmem:[#allocation74_spill] sm:$0xff] }
 0x7c8   :  { %v2229_v16 = vpop.f32.mrf.mxu1  ;;  %v2270_v34 = vpop.f32.mrf.mxu0 }
 0x7c9   :  { %v2315_v29 = vadd.f32 %v2228_v44, %v7046_v24  ;;  %v2867_v1 = vmul.f32 -1.442695, %v2314_v61  ;;  %v2317_v28 = vadd.f32 %v2269_v57, %v7048_v43  ;;  %v2869_v6 = vmul.f32 -1.442695, %v2316_v22  ;;  %v7050_v43 = vld [vmem:[#allocation75_spill] sm:$0xff] }
 0x7ca   :  { %v2230_v59 = vpop.f32.mrf.mxu1  ;;  %v2271_v48 = vpop.f32.mrf.mxu0 }
 0x7cb   :  { %v2868_v45 = vmul.f32 -1.442695, %v2315_v29  ;;  %3206 = vpow2.f32 %v2867_v1  ;;  %v2870_v37 = vmul.f32 -1.442695, %v2317_v28 }
 0x7cd   :  { %3208 = vpow2.f32 %v2868_v45 }
 0x7ce   :  { %3210 = vpow2.f32 %v2869_v6 }
 0x7cf   :  { %3212 = vpow2.f32 %v2870_v37 }
 0x7d8   :  { %v3207_v27 = vpop.eup %3206 }
 0x7d9   :  { %v2330_v16 = vadd.f32 1.0, %v3207_v27 }
 0x7da   :  { %v3209_v9 = vpop.eup %3208 }
 0x7db   :  { %v2331_v34 = vadd.f32 1.0, %v3209_v9  ;;  %3214 = vrcp.f32 %v2330_v16  ;;  %v3211_v59 = vpop.eup %3210 }
 0x7dc   :  { %v3213_v48 = vpop.eup %3212  ;;  %v2332_v23 = vadd.f32 1.0, %v3211_v59 }
 0x7dd   :  { %3216 = vrcp.f32 %v2331_v34  ;;  %v2333_v44 = vadd.f32 1.0, %v3213_v48 }
 0x7de   :  { %3218 = vrcp.f32 %v2332_v23 }
 0x7df   :  { %3220 = vrcp.f32 %v2333_v44 }
 0x7e8   :  { %v3215_v21 = vpop.eup %3214 }
 0x7ea   :  { %v3217_v1 = vpop.eup %3216 }
 0x7eb   :  { %v3219_v6 = vpop.eup %3218 }
 0x7ec   :  { %v3221_v37 = vpop.eup %3220  ;;  %v2348_v27 = vsub.f32 1.0, %v3219_v6  ;;  %v2352_v59 = vmul.f32 %v3219_v6, %v6047_v36 }
 0x7ed   :  { %v2349_v16 = vsub.f32 1.0, %v3221_v37 }
 0x804   :  { %v2307_v17 = vpop.f32.mrf.mxu1 }
 0x805   :  { %v2308_v46 = vadd.f32 %v2307_v17, %v4449_v49  ;;  %v2353_v17 = vmul.f32 %v3221_v37, %v6054_v30 }
 0x806   :  { %v2309_v61 = vpop.f32.mrf.mxu1 }
 0x807   :  { %v2342_v24 = vmul.f32 %v3215_v21, %v2308_v46  ;;  %v2310_v29 = vadd.f32 %v2309_v61, %v4453_v10 }
 0x808   :  { %v2311_v45 = vpop.f32.mrf.mxu1 }
 0x809   :  { %v2344_v57 = vadd.f32 %v2342_v24, %v7049_v20  ;;  %v2343_v15 = vmul.f32 %v3217_v1, %v2310_v29 }
 0x80a   :  { %v2312_v22 = vpop.f32.mrf.mxu1 }
 0x80b   :  { %3222 = vtanh.f32 %v2344_v57  ;;  %v2345_v28 = vadd.f32 %v2343_v15, %v7050_v43 }
 0x80d   :  { %3224 = vtanh.f32 %v2345_v28 }
 0x818   :  { %v3223_v9 = vpop.eup %3222 }
 0x819   :  { %v2350_v34 = vmul.f32 %v3223_v9, %v2348_v27  ;;  %v7051_v9 = vld [vmem:[#allocation60_spill] sm:$0xff] }
 0x81a   :  { %v3225_v48 = vpop.eup %3224 }
 0x81b   :  { %v2351_v23 = vmul.f32 %v3225_v48, %v2349_v16  ;;  %v2354_v44 = vadd.f32 %v2352_v59, %v2350_v34  ;;  %v7052_v34 = vld [vmem:[#allocation62_spill] sm:$0xff] }
 0x81d   :  { %v2355_v46 = vadd.f32 %v2353_v17, %v2351_v23  ;;  %v2360_v21 = vsel %vm2832_vm6, %v2354_v44, 0.0  ;;  %v6280_v61 = vsel %vm2832_vm6, %v2354_v44, %v6047_v36  ;;  %v2577_v36 = vld [vmem:[%s6467_s6 + $0xc8] sm:$0xff] }
 0x81e   :  { %2873 = vst [vmem:[%s6466_s8 + $0x60] sm:$0xff] %v2360_v21  ;;  %v2375_v45 = vpack.c.bf16 %v6280_v61, %v6280_v61 }
 0x81f   :  { %v2361_v24 = vsel %vm2831_vm5, %v2355_v46, 0.0  ;;  %v6287_v29 = vsel %vm2831_vm5, %v2355_v46, %v6054_v30  ;;  %v2561_v30 = vld [vmem:[%s6467_s6 + $0x48] sm:$0xff]  ;;  %v7053_v46 = vld [vmem:[#allocation61_spill] sm:$0xff] }
 0x820   :  { %2874 = vst [vmem:[%s6466_s8 + $0x18] sm:$0xff] %v2361_v24  ;;  %v2376_v1 = vpack.c.bf16 %v6287_v29, %v6287_v29  ;;  %v7054_v24 = vld [vmem:[#allocation63_spill] sm:$0xff] }
 0x822   :  { %2409 = vmatprep.mubr.bf16.mxu0 %v2376_v1  ;;  %2450 = vmatprep.mubr.bf16.mxu1 %v2376_v1 }
 0x823   :  { %2410 = vmatmul.mubr.bf16.vlgmr.msra.gmra.mxu0 %v2375_v45  ;;  %2451 = vmatmul.mubr.bf16.vlgmr.msra.gmra.mxu1 %v2375_v45 }
 0x824   :  { %2460 = vmatpush1.bf16.msra.mxu0 %v5691_v8  ;;  %2491 = vmatprep.mubr.bf16.mxu0 %v2376_v1  ;;  %v2583_v8 = vld [vmem:[%s6467_s6 + $0xf8] sm:$0xff] }
 0x825   :  { %2461 = vmatprep.subr.bf16.mxu0 %v5697_v63  ;;  %v2567_v63 = vld [vmem:[%s6467_s6 + $0x78] sm:$0xff]  ;;  %2883 = vmatprep.subr.mxu1 %v2583_v8 }
 0x826   :  { %2884 = vmatpush3.msra.mxu1 %v2567_v63 }
 0x828   :  { %2462 = vmatpush1.bf16.msra.mxu0 %v5705_v14  ;;  %v2582_v14 = vld [vmem:[%s6467_s6 + $0xf0] sm:$0xff] }
 0x829   :  { %2463 = vmatprep.subr.bf16.mxu0 %v5711_v33  ;;  %2885 = vmatprep.subr.mxu1 %v2582_v14  ;;  %v2566_v33 = vld [vmem:[%s6467_s6 + $0x70] sm:$0xff] }
 0x82a   :  { %2886 = vmatpush3.msra.mxu1 %v2566_v33 }
 0x82c   :  { %2464 = vmatpush1.bf16.msra.mxu0 %v5719_v60  ;;  %v2581_v60 = vld [vmem:[%s6467_s6 + $0xe8] sm:$0xff] }
 0x82d   :  { %2465 = vmatprep.subr.bf16.mxu0 %v5725_v19  ;;  %2887 = vmatprep.subr.mxu1 %v2581_v60  ;;  %v2565_v19 = vld [vmem:[%s6467_s6 + $0x68] sm:$0xff] }
 0x82e   :  { %2888 = vmatpush3.msra.mxu1 %v2565_v19 }
 0x830   :  { %2466 = vmatpush1.bf16.msra.mxu0 %v5733_v2  ;;  %v2580_v2 = vld [vmem:[%s6467_s6 + $0xe0] sm:$0xff] }
 0x831   :  { %2467 = vmatprep.subr.bf16.mxu0 %v5739_v13  ;;  %2889 = vmatprep.subr.mxu1 %v2580_v2  ;;  %v2564_v13 = vld [vmem:[%s6467_s6 + $0x60] sm:$0xff] }
 0x832   :  { %2890 = vmatpush3.msra.mxu1 %v2564_v13 }
 0x834   :  { %2468 = vmatpush1.bf16.msra.mxu0 %v5747_v47  ;;  %v2579_v47 = vld [vmem:[%s6467_s6 + $0xd8] sm:$0xff] }
 0x835   :  { %2469 = vmatprep.subr.bf16.mxu0 %v5753_v12  ;;  %2891 = vmatprep.subr.mxu1 %v2579_v47  ;;  %v2563_v12 = vld [vmem:[%s6467_s6 + $0x58] sm:$0xff] }
 0x836   :  { %2892 = vmatpush3.msra.mxu1 %v2563_v12 }
 0x838   :  { %2470 = vmatpush1.bf16.msra.mxu0 %v5761_v7  ;;  %v2578_v7 = vld [vmem:[%s6467_s6 + $0xd0] sm:$0xff] }
 0x839   :  { %2471 = vmatprep.subr.bf16.mxu0 %v5767_v18  ;;  %2893 = vmatprep.subr.mxu1 %v2578_v7  ;;  %v2562_v18 = vld [vmem:[%s6467_s6 + $0x50] sm:$0xff] }
 0x83a   :  { %2894 = vmatpush3.msra.mxu1 %v2562_v18 }
 0x83b   :  { %2895 = vmatprep.subr.mxu1 %v2577_v36 }
 0x83c   :  { %2472 = vmatpush1.bf16.msra.mxu0 %v6094_v11  ;;  %v2576_v11 = vld [vmem:[%s6467_s6 + $0xc0] sm:$0xff]  ;;  %2896 = vmatpush3.msra.mxu1 %v2561_v30  ;;  %v7055_v30 = vld [vmem:[#allocation76_spill] sm:$0xff] }
 0x83d   :  { %2473 = vmatprep.subr.bf16.mxu0 %v6100_v26  ;;  %v2560_v26 = vld [vmem:[%s6467_s6 + $0x40] sm:$0xff]  ;;  %2897 = vmatprep.subr.mxu1 %v2576_v11 }
 0x83e   :  { %2898 = vmatpush3.msra.mxu1 %v2560_v26 }
 0x840   :  { %2474 = vmatpush1.bf16.msra.mxu0 %v6108_v25  ;;  %v2575_v25 = vld [vmem:[%s6467_s6 + $0xb8] sm:$0xff] }
 0x841   :  { %2475 = vmatprep.subr.bf16.mxu0 %v6114_v32  ;;  %v2559_v32 = vld [vmem:[%s6467_s6 + $0x38] sm:$0xff]  ;;  %2899 = vmatprep.subr.mxu1 %v2575_v25 }
 0x842   :  { %2900 = vmatpush3.msra.mxu1 %v2559_v32  ;;  %v7056_v32 = vld [vmem:[#allocation77_spill] sm:$0xff] }
 0x844   :  { %2476 = vmatpush2.bf16.msra.mxu0 %v6122_v0  ;;  %v2574_v0 = vld [vmem:[%s6467_s6 + $0xb0] sm:$0xff] }
 0x845   :  { %2477 = vmatprep.subr.bf16.mxu0 %v6128_v53  ;;  %v2558_v53 = vld [vmem:[%s6467_s6 + $0x30] sm:$0xff]  ;;  %2901 = vmatprep.subr.mxu1 %v2574_v0 }
 0x846   :  { %2902 = vmatpush3.msra.mxu1 %v2558_v53 }
 0x848   :  { %2478 = vmatpush2.bf16.msra.mxu0 %v6136_v3  ;;  %v2573_v3 = vld [vmem:[%s6467_s6 + $0xa8] sm:$0xff] }
 0x849   :  { %2479 = vmatprep.subr.bf16.mxu0 %v6142_v58  ;;  %v2557_v58 = vld [vmem:[%s6467_s6 + $0x28] sm:$0xff]  ;;  %2903 = vmatprep.subr.mxu1 %v2573_v3 }
 0x84a   :  { %2904 = vmatpush3.msra.mxu1 %v2557_v58 }
 0x84c   :  { %2480 = vmatpush2.bf16.msra.mxu0 %v6150_v54  ;;  %v2572_v54 = vld [vmem:[%s6467_s6 + $0xa0] sm:$0xff] }
 0x84d   :  { %2481 = vmatprep.subr.bf16.mxu0 %v6156_v56  ;;  %v2556_v56 = vld [vmem:[%s6467_s6 + $0x20] sm:$0xff]  ;;  %2905 = vmatprep.subr.mxu1 %v2572_v54 }
 0x84e   :  { %2906 = vmatpush3.msra.mxu1 %v2556_v56 }
 0x850   :  { %2482 = vmatpush2.bf16.msra.mxu0 %v6164_v52  ;;  %v2571_v52 = vld [vmem:[%s6467_s6 + $0x98] sm:$0xff] }
 0x851   :  { %2483 = vmatprep.subr.bf16.mxu0 %v6170_v51  ;;  %v2555_v51 = vld [vmem:[%s6467_s6 + $0x18] sm:$0xff]  ;;  %2907 = vmatprep.subr.mxu1 %v2571_v52 }
 0x852   :  { %2908 = vmatpush3.msra.mxu1 %v2555_v51 }
 0x854   :  { %2484 = vmatpush2.bf16.msra.mxu0 %v6178_v55  ;;  %v2570_v55 = vld [vmem:[%s6467_s6 + $0x90] sm:$0xff] }
 0x855   :  { %2485 = vmatprep.subr.bf16.mxu0 %v6184_v62  ;;  %v2554_v62 = vld [vmem:[%s6467_s6 + $0x10] sm:$0xff]  ;;  %2909 = vmatprep.subr.mxu1 %v2570_v55 }
 0x856   :  { %2910 = vmatpush3.msra.mxu1 %v2554_v62 }
 0x858   :  { %2486 = vmatpush2.bf16.msra.mxu0 %v6192_v42  ;;  %v2569_v42 = vld [vmem:[%s6467_s6 + $0x88] sm:$0xff] }
 0x859   :  { %2487 = vmatprep.subr.bf16.mxu0 %v6198_v5  ;;  %v2553_v5 = vld [vmem:[%s6467_s6 + $0x8] sm:$0xff]  ;;  %2911 = vmatprep.subr.mxu1 %v2569_v42 }
 0x85a   :  { %2912 = vmatpush3.msra.mxu1 %v2553_v5 }
 0x85c   :  { %2488 = vmatpush2.bf16.msra.mxu0 %v6206_v35  ;;  %v2568_v35 = vld [vmem:[%s6467_s6 + $0x80] sm:$0xff] }
 0x85d   :  { %2489 = vmatprep.subr.bf16.mxu0 %v6212_v39  ;;  %v2552_v39 = vld [vmem:[%s6467_s6] sm:$0xff]  ;;  %2913 = vmatprep.subr.mxu1 %v2568_v35 }
 0x85e   :  { %2914 = vmatpush3.msra.mxu1 %v2552_v39 }
 0x860   :  { %2490 = vmatpush2.bf16.msra.mxu0 %v6220_v40 }
 0x863   :  { %2492 = vmatmul.mubr.bf16.vlgmr.msra.gmra.mxu0 %v2375_v45 }
 0x8e3   :  { %v2411_v40 = vpop.f32.mrf.mxu0  ;;  %v2452_v20 = vpop.f32.mrf.mxu1 }
 0x8e4   :  { %v2412_v37 = vadd.f32 %v2411_v40, %v7044_v50  ;;  %v2453_v17 = vadd.f32 %v2452_v20, %v4435_v4 }
 0x8e5   :  { %v2413_v57 = vpop.f32.mrf.mxu0  ;;  %v2454_v15 = vpop.f32.mrf.mxu1 }
 0x8e6   :  { %v2414_v27 = vadd.f32 %v2413_v57, %v4425_v38  ;;  %v2500_v16 = vadd.f32 %v2412_v37, %v7051_v9  ;;  %v2455_v44 = vadd.f32 %v2454_v15, %v4439_v31  ;;  %v2502_v21 = vadd.f32 %v2453_v17, %v7053_v46  ;;  %v2882_v57 = vld [vmem:[%s6468_s7] ss:$0 sm:$0xff] }
 0x8e7   :  { %v2415_v22 = vpop.f32.mrf.mxu0  ;;  %v2456_v43 = vpop.f32.mrf.mxu1 }
 0x8e8   :  { %v2501_v59 = vadd.f32 %v2414_v27, %v7052_v34  ;;  %v2875_v48 = vmul.f32 -1.442695, %v2500_v16  ;;  %v2503_v1 = vadd.f32 %v2455_v44, %v7054_v24  ;;  %v2877_v45 = vmul.f32 -1.442695, %v2502_v21 }
 0x8e9   :  { %v2416_v28 = vpop.f32.mrf.mxu0  ;;  %v2457_v6 = vpop.f32.mrf.mxu1 }
 0x8ea   :  { %v2876_v23 = vmul.f32 -1.442695, %v2501_v59  ;;  %3226 = vpow2.f32 %v2875_v48  ;;  %v2878_v50 = vmul.f32 -1.442695, %v2503_v1 }
 0x8ec   :  { %3228 = vpow2.f32 %v2876_v23 }
 0x8ed   :  { %3230 = vpow2.f32 %v2877_v45 }
 0x8ee   :  { %3232 = vpow2.f32 %v2878_v50 }
 0x8f7   :  { %v3227_v8 = vpop.eup %3226 }
 0x8f8   :  { %v2516_v63 = vadd.f32 1.0, %v3227_v8 }
 0x8f9   :  { %v3229_v38 = vpop.eup %3228 }
 0x8fa   :  { %v2517_v14 = vadd.f32 1.0, %v3229_v38  ;;  %3234 = vrcp.f32 %v2516_v63  ;;  %v3231_v33 = vpop.eup %3230 }
 0x8fb   :  { %v3233_v60 = vpop.eup %3232  ;;  %v2518_v4 = vadd.f32 1.0, %v3231_v33 }
 0x8fc   :  { %3236 = vrcp.f32 %v2517_v14  ;;  %v2519_v2 = vadd.f32 1.0, %v3233_v60 }
 0x8fd   :  { %3238 = vrcp.f32 %v2518_v4 }
 0x8fe   :  { %3240 = vrcp.f32 %v2519_v2 }
 0x907   :  { %v3235_v13 = vpop.eup %3234 }
 0x909   :  { %v3237_v18 = vpop.eup %3236 }
 0x90a   :  { %v3239_v53 = vpop.eup %3238 }
 0x90b   :  { %v3241_v3 = vpop.eup %3240  ;;  %v2538_v52 = vmul.f32 %v3239_v53, %v6280_v61 }
 0x90c   :  { %v2535_v54 = vsub.f32 1.0, %v3241_v3  ;;  %v2539_v55 = vmul.f32 %v3241_v3, %v6287_v29 }
 0x923   :  { %v2493_v19 = vpop.f32.mrf.mxu0 }
 0x924   :  { %v2494_v31 = vadd.f32 %v2493_v19, %v4449_v49  ;;  %v2534_v49 = vsub.f32 1.0, %v3239_v53 }
 0x925   :  { %v2495_v47 = vpop.f32.mrf.mxu0 }
 0x926   :  { %v2528_v12 = vmul.f32 %v3235_v13, %v2494_v31  ;;  %v2496_v7 = vadd.f32 %v2495_v47, %v4453_v10 }
 0x927   :  { %v2497_v36 = vpop.f32.mrf.mxu0 }
 0x928   :  { %v2530_v11 = vadd.f32 %v2528_v12, %v7055_v30  ;;  %v2529_v26 = vmul.f32 %v3237_v18, %v2496_v7 }
 0x929   :  { %v2498_v25 = vpop.f32.mrf.mxu0 }
 0x92a   :  { %3242 = vtanh.f32 %v2530_v11  ;;  %v2531_v0 = vadd.f32 %v2529_v26, %v7056_v32 }
 0x92c   :  { %3244 = vtanh.f32 %v2531_v0 }
 0x937   :  { %v3243_v58 = vpop.eup %3242 }
 0x938   :  { %v2536_v56 = vmul.f32 %v3243_v58, %v2534_v49 }
 0x939   :  { %v3245_v10 = vpop.eup %3244 }
 0x93a   :  { %v2537_v51 = vmul.f32 %v3245_v10, %v2535_v54  ;;  %v2540_v62 = vadd.f32 %v2538_v52, %v2536_v56 }
 0x93c   :  { %v2541_v42 = vadd.f32 %v2539_v55, %v2537_v51  ;;  %v2546_v5 = vsel %vm2807_vm2, %v2540_v62, 0.0  ;;  %v2550_v40 = vsel %vm2807_vm2, %v2540_v62, %v6280_v61 }
 0x93d   :  { %2881 = vst [vmem:[%s6466_s8 + $0x70] sm:$0xff] %v2546_v5 }
 0x93e   :  { %v2547_v35 = vsel %vm2806_vm1, %v2541_v42, 0.0  ;;  %v2551_v39 = vsel %vm2806_vm1, %v2541_v42, %v6287_v29 }
 0x93f   :  { %2549 = vst [vmem:[%s6466_s8 + $0x8] sm:$0xff] %v2547_v35  ;;  %2655 = vmatprep.mubr.f32.mxu1 %v2551_v39 }
 0x940   :  { %2656 = vmatmul.mubr.f32.vlgmr.msra.gmra.mxu1 %v2550_v40 }
 0xa00   :  { %v2915_v20 = vpop.f32.mrf.mxu1 }
 0xa02   :  { %v2916_v15 = vpop.f32.mrf.mxu1 }
 0xa03   :  { %v2917_v22 = vadd.f32 %v2916_v15, %v2915_v20 }
 0xa05   :  { %v2658_v43 = vadd.f32 %v2917_v22, %v2882_v57 }
 0xa07   :  { %3246 = vtanh.f32 %v2658_v43 }
 0xa14   :  { %v3247_v29 = vpop.eup %3246 }
 0xa15   :  { %2662 = vst.msk [vmem:[%s6469_s9] sm:$0xff] %vm164_vm0, %v3247_v29 }

</bundles_post_ra>
